<compile_context>
chip_gen: v7x
topology: tpu7x:2x2x1
jax: 0.10.0
libtpu: 0.0.40
codegen_flags: <defaults>
</compile_context>

<pallas_src>
import numpy as np
import jax
import jax.numpy as jnp
from jax import lax
from jax.experimental import pallas as pl
from jax.experimental.pallas import tpu as pltpu

# ---- configuration (mirrors LinearConvNBeatsBlock.__init__ at small sizes) ----
B = 2                           # batch
D = 4                           # input_dim (= output_dim)
D_PAD = 8                       # inputLayer contraction dim padded to a sublane group
S = 48                          # input_size (time length)
H = 128                         # layer_size
N_CONV = 2                      # linear_layers -> number of Conv1d layers
K = 9                           # kernel_size, stride=1, padding=0, dilation=1
S_OUT = S - N_CONV * (K - 1)    # compute_s_out applied N_CONV times -> 32
BACKCAST = S                    # GenericBasis: backcast over the input window
FORECAST = 16                   # forecast horizon
THETA = BACKCAST + FORECAST     # theta_size = 64
THETA_PAD = 128                 # lane-dense (padded) theta width
ROWS = B * S                    # flat (batch*time) matmul M dimension
W_DEQ_CHUNK = 128               # conv-weight rows dequantized per step (bounds vregs)

assert S % 8 == 0, "batch segments must start on a sublane boundary"
assert THETA <= THETA_PAD
assert (K * H) % W_DEQ_CHUNK == 0


def _check_roll_wrap_invariant():
    """The circular pltpu.roll wraps each batch segment's last K-1 rows into the
    next segment (and the block tail into its head).  Those contaminated rows
    must never be read by the next conv layer or by the basis slice."""
    valid = S
    for layer in range(N_CONV):
        valid_out = valid - (K - 1)
        assert valid_out >= 1, "conv stack consumes the whole input window"
        if layer < N_CONV - 1:
            # next conv layer's deepest input row
            deepest_read = (valid_out - (K - 1) - 1) + (K - 1)
        else:
            # basis slice reads rows [0, S_OUT)
            deepest_read = S_OUT - 1
        assert deepest_read < valid_out, (
            "roll-wrapped / stale rows would leak into valid conv outputs; "
            "revisit S / K / N_CONV")
        valid = valid_out
    assert valid == S_OUT


_check_roll_wrap_invariant()


def _nbeats_kernel(x_ref, w_in_ref, b_in_ref, w_cnn_ref, scale_ref, b_cnn_ref,
                   w_out_ref, b_out_ref, w_bas_ref, b_bas_ref,
                   theta_ref, slab_ref, w_deq_ref):
    """Single grid step: the whole (B*S, ...) problem folded into the matmul M dim.

    Activation layout is flat channels-last: row r = b*S + t holds (batch b,
    time t); rows with t beyond the current valid length carry garbage that is
    never read downstream (see _check_roll_wrap_invariant)."""
    rows = ROWS

    # inputLayer + relu : (rows, D_PAD) @ (D_PAD, H)   [contraction padded 4 -> 8]
    h = jnp.dot(x_ref[...], w_in_ref[...], preferred_element_type=jnp.float32)
    h = jnp.maximum(h + b_in_ref[...], 0.0)                       # (rows, H) f32

    # Conv1d stack (no nonlinearity between convs, matching the PyTorch module).
    # im2col per layer: tap k is h shifted up by k rows (pltpu.roll == jnp.roll,
    # so shift=rows-k gives tap[r] = h[r + k]); each tap is cast to bf16 and
    # written straight into the VMEM slab (only ONE tap live at a time), then a
    # single (rows, K*H) @ (K*H, H) MXU matmul with f32 accumulation per layer.
    for layer in range(N_CONV):
        # Dequantize this layer's int8 weights to bf16 in VMEM, chunked so the
        # elementwise cast never holds more than ~24 vregs live.
        for c in range(0, K * H, W_DEQ_CHUNK):
            w_deq_ref[c:c + W_DEQ_CHUNK, :] = (
                w_cnn_ref[layer, c:c + W_DEQ_CHUNK, :]
                .astype(jnp.float32).astype(jnp.bfloat16))        # exact: |q| <= 127

        for k in range(K):
            tap = h if k == 0 else pltpu.roll(h, shift=rows - k, axis=0)
            slab_ref[:, k * H:(k + 1) * H] = tap.astype(jnp.bfloat16)

        acc = jnp.dot(slab_ref[...], w_deq_ref[...],
                      preferred_element_type=jnp.float32)         # (rows, H) f32
        h = acc * scale_ref[layer] + b_cnn_ref[layer]             # per-channel rescale

    # outputLayer + relu : (rows, H) @ (H, D)
    y = jnp.dot(h, w_out_ref[...], preferred_element_type=jnp.float32)
    y = jnp.maximum(y + b_out_ref[...], 0.0)                      # (rows, D)

    # basis_parameters: per batch, contract the valid S_OUT rows (sublane-aligned
    # static slices since S % 8 == 0), then ONE lane/sublane-dense (B*D, 128)
    # full-vreg unmasked store instead of B masked (D, 128) stores.
    parts = []
    for b in range(B):
        yb = y[b * S:b * S + S_OUT, :]                            # (S_OUT, D)
        parts.append(lax.dot_general(
            yb, w_bas_ref[...],
            dimension_numbers=(((0,), (0,)), ((), ())),
            preferred_element_type=jnp.float32))                  # (D, THETA_PAD)
    theta = jnp.concatenate(parts, axis=0) + b_bas_ref[...]       # (B*D, THETA_PAD)
    theta_ref[...] = theta.astype(theta_ref.dtype)


def prepare_params(params):
    """One-time layout / quantization transform of the PyTorch-style parameters."""
    (w_in, b_in, w_cnn, b_cnn, w_out, b_out, w_bas, b_bas) = params
    # inputLayer: pad the contraction dim 4 -> 8 (zeros, exact result).
    w_in_p = jnp.zeros((D_PAD, H), jnp.float32).at[:D, :].set(w_in)
    # im2col conv weight: (layer, k, c_in, c_out) -> (layer, k*c_in, c_out), then
    # symmetric per-output-channel int8 quantization (halves the dominant DMA).
    w_flat = w_cnn.reshape(N_CONV, K * H, H)
    scale = jnp.max(jnp.abs(w_flat), axis=1, keepdims=True) / 127.0     # (L,1,H)
    scale = jnp.maximum(scale, 1e-12).astype(jnp.float32)
    w_q = jnp.clip(jnp.round(w_flat / scale), -127, 127).astype(jnp.int8)
    # Lane-dense (zero-padded to 128) basis weight / bias.
    w_bas_p = jnp.zeros((S_OUT, THETA_PAD), jnp.float32).at[:, :THETA].set(w_bas)
    b_bas_p = jnp.zeros((1, THETA_PAD), jnp.float32).at[:, :THETA].set(b_bas)
    return (w_in_p, b_in, w_q, scale, b_cnn, w_out, b_out, w_bas_p, b_bas_p)


@jax.jit
def linear_conv_nbeats_block(x_ncw, prepared):
    """x_ncw: (B, D, S) float32 (PyTorch NCW layout). Returns (backcast, forecast)."""
    (w_in, b_in, w_cnn_q, w_scale, b_cnn, w_out, b_out, w_bas, b_bas) = prepared
    # Glue: NCW -> flat channels-last (B*S, D), zero-padded to D_PAD lanes. Tiny; fused by XLA.
    x = jnp.transpose(x_ncw, (0, 2, 1)).reshape(ROWS, D)
    x_pad = jnp.zeros((ROWS, D_PAD), x.dtype).at[:, :D].set(x)

    def full(shape):
        n = len(shape)
        return pl.BlockSpec(shape, lambda i, _n=n: (0,) * _n)

    flops = 2 * (ROWS * D_PAD * H
                 + N_CONV * ROWS * (K * H) * H
                 + ROWS * H * D
                 + B * D * S_OUT * THETA_PAD)
    bytes_accessed = int(
        x_pad.size * 4
        + w_in.size * 4 + b_in.size * 4
        + w_cnn_q.size * 1 + w_scale.size * 4 + b_cnn.size * 4
        + w_out.size * 4 + b_out.size * 4
        + w_bas.size * 4 + b_bas.size * 4
        + B * D * THETA_PAD * 4)

    theta_pad = pl.pallas_call(
        _nbeats_kernel,
        out_shape=jax.ShapeDtypeStruct((B * D, THETA_PAD), jnp.float32),
        grid=(1,),
        in_specs=[
            pl.BlockSpec((ROWS, D_PAD), lambda i: (0, 0)),       # x (padded lanes)
            full((D_PAD, H)), full((1, H)),                      # inputLayer
            full((N_CONV, K * H, H)),                            # conv weights, int8
            full((N_CONV, 1, H)), full((N_CONV, 1, H)),          # conv scales / biases
            full((H, D)), full((1, D)),                          # outputLayer
            full((S_OUT, THETA_PAD)), full((1, THETA_PAD)),      # basis (lane-padded)
        ],
        out_specs=pl.BlockSpec((B * D, THETA_PAD), lambda i: (0, 0)),
        scratch_shapes=[
            pltpu.VMEM((ROWS, K * H), jnp.bfloat16),             # im2col slab (~216 KiB)
            pltpu.VMEM((K * H, H), jnp.bfloat16),                # dequantized conv weight
        ],
        compiler_params=pltpu.CompilerParams(
            dimension_semantics=("arbitrary",)),
        cost_estimate=pl.CostEstimate(flops=flops, transcendentals=0,
                                      bytes_accessed=bytes_accessed),
    )(x_pad, w_in, b_in, w_cnn_q, w_scale, b_cnn, w_out, b_out, w_bas, b_bas)

    # basis_function (GenericBasis): drop lane padding, split backcast/forecast.
    theta = theta_pad.reshape(B, D, THETA_PAD)[..., :THETA]
    return theta[..., :BACKCAST], theta[..., BACKCAST:]


def reference(x_ncw, params):
    """Pure-JAX (f32, unquantized) reference of the same forward pass."""
    (w_in, b_in, w_cnn, b_cnn, w_out, b_out, w_bas, b_bas) = params
    x = jnp.transpose(x_ncw, (0, 2, 1))                          # (B, S, D)
    h = jax.nn.relu(x @ w_in + b_in)                             # (B, S, H)
    for layer in range(N_CONV):
        l_out = h.shape[1] - (K - 1)
        acc = jnp.zeros((h.shape[0], l_out, H), jnp.float32) + b_cnn[layer]
        for k in range(K):
            acc = acc + h[:, k:k + l_out, :] @ w_cnn[layer, k]
        h = acc
    y = jax.nn.relu(h @ w_out + b_out)                           # (B, S_OUT, D)
    theta = jnp.einsum('bsd,st->bdt', y, w_bas) + b_bas          # (B, D, THETA)
    return theta[..., :BACKCAST], theta[..., BACKCAST:]


def init_params(key):
    ks = jax.random.split(key, 8)
    sc = 0.05
    w_in = sc * jax.random.normal(ks[0], (D, H), jnp.float32)
    b_in = sc * jax.random.normal(ks[1], (1, H), jnp.float32)
    w_cnn = sc * jax.random.normal(ks[2], (N_CONV, K, H, H), jnp.float32)
    b_cnn = sc * jax.random.normal(ks[3], (N_CONV, 1, H), jnp.float32)
    w_out = sc * jax.random.normal(ks[4], (H, D), jnp.float32)
    b_out = sc * jax.random.normal(ks[5], (1, D), jnp.float32)
    w_bas = sc * jax.random.normal(ks[6], (S_OUT, THETA), jnp.float32)
    b_bas = sc * jax.random.normal(ks[7], (1, THETA), jnp.float32)
    return (w_in, b_in, w_cnn, b_cnn, w_out, b_out, w_bas, b_bas)


if __name__ == "__main__":
    key = jax.random.PRNGKey(0)
    kx, kp = jax.random.split(key)
    x = jax.random.normal(kx, (B, D, S), jnp.float32)            # PyTorch NCW layout
    params = init_params(kp)
    prepared = prepare_params(params)                            # one-time layout/int8

    backcast, forecast = jax.block_until_ready(
        linear_conv_nbeats_block(x, prepared))
    ref_back, ref_fore = reference(x, params)

    assert backcast.shape == (B, D, BACKCAST)
    assert forecast.shape == (B, D, FORECAST)
    # Tolerance covers bf16 activations + per-channel int8 conv weights at these
    # sizes; revisit (or keep f32/bf16 weights) if K*H or the layer count grows.
    np.testing.assert_allclose(np.asarray(backcast), np.asarray(ref_back),
                               rtol=2e-2, atol=2e-2)
    np.testing.assert_allclose(np.asarray(forecast), np.asarray(ref_fore),
                               rtol=2e-2, atol=2e-2)
    print("KERNEL_OK")
</pallas_src>

<mosaic_0001>
module attributes {stable_mosaic.version = 11 : i64} {
  func.func @_nbeats_kernel(%arg0: i32, %arg1: memref<96x8xf32, #tpu.memory_space<vmem>>, %arg2: memref<8x128xf32, #tpu.memory_space<vmem>>, %arg3: memref<1x128xf32, #tpu.memory_space<vmem>>, %arg4: memref<2x1152x128xi8, #tpu.memory_space<vmem>>, %arg5: memref<2x1x128xf32, #tpu.memory_space<vmem>>, %arg6: memref<2x1x128xf32, #tpu.memory_space<vmem>>, %arg7: memref<128x4xf32, #tpu.memory_space<vmem>>, %arg8: memref<1x4xf32, #tpu.memory_space<vmem>>, %arg9: memref<32x128xf32, #tpu.memory_space<vmem>>, %arg10: memref<1x128xf32, #tpu.memory_space<vmem>>, %arg11: memref<8x128xf32, #tpu.memory_space<vmem>>, %arg12: memref<96x1152xbf16, #tpu.memory_space<vmem>>, %arg13: memref<1152x128xbf16, #tpu.memory_space<vmem>>) attributes {dimension_semantics = [#tpu.dimension_semantics<arbitrary>], iteration_bounds = array<i64: 1>, scalar_prefetch = 0 : i64, scratch_operands = 2 : i64, tpu.core_type = #tpu.core_type<tc>, window_params = [{pipeline_mode = #tpu.pipeline_mode<synchronous>, transform_indices = @transform_0, window_bounds = array<i64: 96, 8>}, {pipeline_mode = #tpu.pipeline_mode<synchronous>, transform_indices = @transform_1, window_bounds = array<i64: 8, 128>}, {pipeline_mode = #tpu.pipeline_mode<synchronous>, transform_indices = @transform_2, window_bounds = array<i64: 1, 128>}, {pipeline_mode = #tpu.pipeline_mode<synchronous>, transform_indices = @transform_3, window_bounds = array<i64: 2, 1152, 128>}, {pipeline_mode = #tpu.pipeline_mode<synchronous>, transform_indices = @transform_4, window_bounds = array<i64: 2, 1, 128>}, {pipeline_mode = #tpu.pipeline_mode<synchronous>, transform_indices = @transform_5, window_bounds = array<i64: 2, 1, 128>}, {pipeline_mode = #tpu.pipeline_mode<synchronous>, transform_indices = @transform_6, window_bounds = array<i64: 128, 4>}, {pipeline_mode = #tpu.pipeline_mode<synchronous>, transform_indices = @transform_7, window_bounds = array<i64: 1, 4>}, {pipeline_mode = #tpu.pipeline_mode<synchronous>, transform_indices = @transform_8, window_bounds = array<i64: 32, 128>}, {pipeline_mode = #tpu.pipeline_mode<synchronous>, transform_indices = @transform_9, window_bounds = array<i64: 1, 128>}, {pipeline_mode = #tpu.pipeline_mode<synchronous>, transform_indices = @transform_10, window_bounds = array<i64: 8, 128>}]} {
    %c0 = arith.constant 0 : index
    %c0_0 = arith.constant 0 : index
    %0 = vector.load %arg1[%c0, %c0_0] : memref<96x8xf32, #tpu.memory_space<vmem>>, vector<96x8xf32>
    %c0_1 = arith.constant 0 : index
    %c0_2 = arith.constant 0 : index
    %1 = vector.load %arg2[%c0_1, %c0_2] : memref<8x128xf32, #tpu.memory_space<vmem>>, vector<8x128xf32>
    %cst = arith.constant dense<0.000000e+00> : vector<96x128xf32>
    %2 = tpu.matmul %0, %1, %cst {dimension_numbers = #tpu.dot_dimension_numbers<[1], [0], [0], [1], [0, 0, 1, 1], [], []>} : vector<96x8xf32>, vector<8x128xf32>, vector<96x128xf32> -> vector<96x128xf32>
    %c0_3 = arith.constant 0 : index
    %c0_4 = arith.constant 0 : index
    %3 = vector.load %arg3[%c0_3, %c0_4] : memref<1x128xf32, #tpu.memory_space<vmem>>, vector<1x128xf32>
    %4 = vector.broadcast %3 : vector<1x128xf32> to vector<96x128xf32>
    %5 = arith.addf %2, %4 : vector<96x128xf32>
    %cst_5 = arith.constant 0.000000e+00 : f32
    %6 = vector.broadcast %cst_5 : f32 to vector<96x128xf32>
    %7 = arith.maximumf %5, %6 : vector<96x128xf32>
    %c0_6 = arith.constant 0 : index
    %c0_7 = arith.constant 0 : index
    %c0_8 = arith.constant 0 : index
    %8 = vector.load %arg4[%c0_6, %c0_7, %c0_8] : memref<2x1152x128xi8, #tpu.memory_space<vmem>>, vector<1x128x128xi8>
    %9 = vector.shape_cast %8 : vector<1x128x128xi8> to vector<128x128xi8>
    %10 = arith.sitofp %9 : vector<128x128xi8> to vector<128x128xf32>
    %11 = arith.truncf %10 : vector<128x128xf32> to vector<128x128xbf16>
    %c0_9 = arith.constant 0 : index
    %c0_10 = arith.constant 0 : index
    %12 = vector.load %arg13[%c0_9, %c0_10] : memref<1152x128xbf16, #tpu.memory_space<vmem>>, vector<128x128xbf16>
    tpu.vector_store %arg13[%c0_9, %c0_10], %11 {strides = array<i32>} : memref<1152x128xbf16, #tpu.memory_space<vmem>>, vector<128x128xbf16>,
    %c0_11 = arith.constant 0 : index
    %c128 = arith.constant 128 : index
    %c0_12 = arith.constant 0 : index
    %13 = vector.load %arg4[%c0_11, %c128, %c0_12] : memref<2x1152x128xi8, #tpu.memory_space<vmem>>, vector<1x128x128xi8>
    %14 = vector.shape_cast %13 : vector<1x128x128xi8> to vector<128x128xi8>
    %15 = arith.sitofp %14 : vector<128x128xi8> to vector<128x128xf32>
    %16 = arith.truncf %15 : vector<128x128xf32> to vector<128x128xbf16>
    %c128_13 = arith.constant 128 : index
    %c0_14 = arith.constant 0 : index
    %17 = vector.load %arg13[%c128_13, %c0_14] : memref<1152x128xbf16, #tpu.memory_space<vmem>>, vector<128x128xbf16>
    tpu.vector_store %arg13[%c128_13, %c0_14], %16 {strides = array<i32>} : memref<1152x128xbf16, #tpu.memory_space<vmem>>, vector<128x128xbf16>,
    %c0_15 = arith.constant 0 : index
    %c256 = arith.constant 256 : index
    %c0_16 = arith.constant 0 : index
    %18 = vector.load %arg4[%c0_15, %c256, %c0_16] : memref<2x1152x128xi8, #tpu.memory_space<vmem>>, vector<1x128x128xi8>
    %19 = vector.shape_cast %18 : vector<1x128x128xi8> to vector<128x128xi8>
    %20 = arith.sitofp %19 : vector<128x128xi8> to vector<128x128xf32>
    %21 = arith.truncf %20 : vector<128x128xf32> to vector<128x128xbf16>
    %c256_17 = arith.constant 256 : index
    %c0_18 = arith.constant 0 : index
    %22 = vector.load %arg13[%c256_17, %c0_18] : memref<1152x128xbf16, #tpu.memory_space<vmem>>, vector<128x128xbf16>
    tpu.vector_store %arg13[%c256_17, %c0_18], %21 {strides = array<i32>} : memref<1152x128xbf16, #tpu.memory_space<vmem>>, vector<128x128xbf16>,
    %c0_19 = arith.constant 0 : index
    %c384 = arith.constant 384 : index
    %c0_20 = arith.constant 0 : index
    %23 = vector.load %arg4[%c0_19, %c384, %c0_20] : memref<2x1152x128xi8, #tpu.memory_space<vmem>>, vector<1x128x128xi8>
    %24 = vector.shape_cast %23 : vector<1x128x128xi8> to vector<128x128xi8>
    %25 = arith.sitofp %24 : vector<128x128xi8> to vector<128x128xf32>
    %26 = arith.truncf %25 : vector<128x128xf32> to vector<128x128xbf16>
    %c384_21 = arith.constant 384 : index
    %c0_22 = arith.constant 0 : index
    %27 = vector.load %arg13[%c384_21, %c0_22] : memref<1152x128xbf16, #tpu.memory_space<vmem>>, vector<128x128xbf16>
    tpu.vector_store %arg13[%c384_21, %c0_22], %26 {strides = array<i32>} : memref<1152x128xbf16, #tpu.memory_space<vmem>>, vector<128x128xbf16>,
    %c0_23 = arith.constant 0 : index
    %c512 = arith.constant 512 : index
    %c0_24 = arith.constant 0 : index
    %28 = vector.load %arg4[%c0_23, %c512, %c0_24] : memref<2x1152x128xi8, #tpu.memory_space<vmem>>, vector<1x128x128xi8>
    %29 = vector.shape_cast %28 : vector<1x128x128xi8> to vector<128x128xi8>
    %30 = arith.sitofp %29 : vector<128x128xi8> to vector<128x128xf32>
    %31 = arith.truncf %30 : vector<128x128xf32> to vector<128x128xbf16>
    %c512_25 = arith.constant 512 : index
    %c0_26 = arith.constant 0 : index
    %32 = vector.load %arg13[%c512_25, %c0_26] : memref<1152x128xbf16, #tpu.memory_space<vmem>>, vector<128x128xbf16>
    tpu.vector_store %arg13[%c512_25, %c0_26], %31 {strides = array<i32>} : memref<1152x128xbf16, #tpu.memory_space<vmem>>, vector<128x128xbf16>,
    %c0_27 = arith.constant 0 : index
    %c640 = arith.constant 640 : index
    %c0_28 = arith.constant 0 : index
    %33 = vector.load %arg4[%c0_27, %c640, %c0_28] : memref<2x1152x128xi8, #tpu.memory_space<vmem>>, vector<1x128x128xi8>
    %34 = vector.shape_cast %33 : vector<1x128x128xi8> to vector<128x128xi8>
    %35 = arith.sitofp %34 : vector<128x128xi8> to vector<128x128xf32>
    %36 = arith.truncf %35 : vector<128x128xf32> to vector<128x128xbf16>
    %c640_29 = arith.constant 640 : index
    %c0_30 = arith.constant 0 : index
    %37 = vector.load %arg13[%c640_29, %c0_30] : memref<1152x128xbf16, #tpu.memory_space<vmem>>, vector<128x128xbf16>
    tpu.vector_store %arg13[%c640_29, %c0_30], %36 {strides = array<i32>} : memref<1152x128xbf16, #tpu.memory_space<vmem>>, vector<128x128xbf16>,
    %c0_31 = arith.constant 0 : index
    %c768 = arith.constant 768 : index
    %c0_32 = arith.constant 0 : index
    %38 = vector.load %arg4[%c0_31, %c768, %c0_32] : memref<2x1152x128xi8, #tpu.memory_space<vmem>>, vector<1x128x128xi8>
    %39 = vector.shape_cast %38 : vector<1x128x128xi8> to vector<128x128xi8>
    %40 = arith.sitofp %39 : vector<128x128xi8> to vector<128x128xf32>
    %41 = arith.truncf %40 : vector<128x128xf32> to vector<128x128xbf16>
    %c768_33 = arith.constant 768 : index
    %c0_34 = arith.constant 0 : index
    %42 = vector.load %arg13[%c768_33, %c0_34] : memref<1152x128xbf16, #tpu.memory_space<vmem>>, vector<128x128xbf16>
    tpu.vector_store %arg13[%c768_33, %c0_34], %41 {strides = array<i32>} : memref<1152x128xbf16, #tpu.memory_space<vmem>>, vector<128x128xbf16>,
    %c0_35 = arith.constant 0 : index
    %c896 = arith.constant 896 : index
    %c0_36 = arith.constant 0 : index
    %43 = vector.load %arg4[%c0_35, %c896, %c0_36] : memref<2x1152x128xi8, #tpu.memory_space<vmem>>, vector<1x128x128xi8>
    %44 = vector.shape_cast %43 : vector<1x128x128xi8> to vector<128x128xi8>
    %45 = arith.sitofp %44 : vector<128x128xi8> to vector<128x128xf32>
    %46 = arith.truncf %45 : vector<128x128xf32> to vector<128x128xbf16>
    %c896_37 = arith.constant 896 : index
    %c0_38 = arith.constant 0 : index
    %47 = vector.load %arg13[%c896_37, %c0_38] : memref<1152x128xbf16, #tpu.memory_space<vmem>>, vector<128x128xbf16>
    tpu.vector_store %arg13[%c896_37, %c0_38], %46 {strides = array<i32>} : memref<1152x128xbf16, #tpu.memory_space<vmem>>, vector<128x128xbf16>,
    %c0_39 = arith.constant 0 : index
    %c1024 = arith.constant 1024 : index
    %c0_40 = arith.constant 0 : index
    %48 = vector.load %arg4[%c0_39, %c1024, %c0_40] : memref<2x1152x128xi8, #tpu.memory_space<vmem>>, vector<1x128x128xi8>
    %49 = vector.shape_cast %48 : vector<1x128x128xi8> to vector<128x128xi8>
    %50 = arith.sitofp %49 : vector<128x128xi8> to vector<128x128xf32>
    %51 = arith.truncf %50 : vector<128x128xf32> to vector<128x128xbf16>
    %c1024_41 = arith.constant 1024 : index
    %c0_42 = arith.constant 0 : index
    %52 = vector.load %arg13[%c1024_41, %c0_42] : memref<1152x128xbf16, #tpu.memory_space<vmem>>, vector<128x128xbf16>
    tpu.vector_store %arg13[%c1024_41, %c0_42], %51 {strides = array<i32>} : memref<1152x128xbf16, #tpu.memory_space<vmem>>, vector<128x128xbf16>,
    %53 = arith.truncf %7 : vector<96x128xf32> to vector<96x128xbf16>
    %c0_43 = arith.constant 0 : index
    %c0_44 = arith.constant 0 : index
    %54 = vector.load %arg12[%c0_43, %c0_44] : memref<96x1152xbf16, #tpu.memory_space<vmem>>, vector<96x128xbf16>
    tpu.vector_store %arg12[%c0_43, %c0_44], %53 {strides = array<i32>} : memref<96x1152xbf16, #tpu.memory_space<vmem>>, vector<96x128xbf16>,
    %c95_i32 = arith.constant 95 : i32
    %55 = tpu.dynamic_rotate %7 by %c95_i32 dim 0 : vector<96x128xf32>, i32 -> vector<96x128xf32>
    %56 = arith.truncf %55 : vector<96x128xf32> to vector<96x128xbf16>
    %c0_45 = arith.constant 0 : index
    %c128_46 = arith.constant 128 : index
    %57 = vector.load %arg12[%c0_45, %c128_46] : memref<96x1152xbf16, #tpu.memory_space<vmem>>, vector<96x128xbf16>
    tpu.vector_store %arg12[%c0_45, %c128_46], %56 {strides = array<i32>} : memref<96x1152xbf16, #tpu.memory_space<vmem>>, vector<96x128xbf16>,
    %c94_i32 = arith.constant 94 : i32
    %58 = tpu.dynamic_rotate %7 by %c94_i32 dim 0 : vector<96x128xf32>, i32 -> vector<96x128xf32>
    %59 = arith.truncf %58 : vector<96x128xf32> to vector<96x128xbf16>
    %c0_47 = arith.constant 0 : index
    %c256_48 = arith.constant 256 : index
    %60 = vector.load %arg12[%c0_47, %c256_48] : memref<96x1152xbf16, #tpu.memory_space<vmem>>, vector<96x128xbf16>
    tpu.vector_store %arg12[%c0_47, %c256_48], %59 {strides = array<i32>} : memref<96x1152xbf16, #tpu.memory_space<vmem>>, vector<96x128xbf16>,
    %c93_i32 = arith.constant 93 : i32
    %61 = tpu.dynamic_rotate %7 by %c93_i32 dim 0 : vector<96x128xf32>, i32 -> vector<96x128xf32>
    %62 = arith.truncf %61 : vector<96x128xf32> to vector<96x128xbf16>
    %c0_49 = arith.constant 0 : index
    %c384_50 = arith.constant 384 : index
    %63 = vector.load %arg12[%c0_49, %c384_50] : memref<96x1152xbf16, #tpu.memory_space<vmem>>, vector<96x128xbf16>
    tpu.vector_store %arg12[%c0_49, %c384_50], %62 {strides = array<i32>} : memref<96x1152xbf16, #tpu.memory_space<vmem>>, vector<96x128xbf16>,
    %c92_i32 = arith.constant 92 : i32
    %64 = tpu.dynamic_rotate %7 by %c92_i32 dim 0 : vector<96x128xf32>, i32 -> vector<96x128xf32>
    %65 = arith.truncf %64 : vector<96x128xf32> to vector<96x128xbf16>
    %c0_51 = arith.constant 0 : index
    %c512_52 = arith.constant 512 : index
    %66 = vector.load %arg12[%c0_51, %c512_52] : memref<96x1152xbf16, #tpu.memory_space<vmem>>, vector<96x128xbf16>
    tpu.vector_store %arg12[%c0_51, %c512_52], %65 {strides = array<i32>} : memref<96x1152xbf16, #tpu.memory_space<vmem>>, vector<96x128xbf16>,
    %c91_i32 = arith.constant 91 : i32
    %67 = tpu.dynamic_rotate %7 by %c91_i32 dim 0 : vector<96x128xf32>, i32 -> vector<96x128xf32>
    %68 = arith.truncf %67 : vector<96x128xf32> to vector<96x128xbf16>
    %c0_53 = arith.constant 0 : index
    %c640_54 = arith.constant 640 : index
    %69 = vector.load %arg12[%c0_53, %c640_54] : memref<96x1152xbf16, #tpu.memory_space<vmem>>, vector<96x128xbf16>
    tpu.vector_store %arg12[%c0_53, %c640_54], %68 {strides = array<i32>} : memref<96x1152xbf16, #tpu.memory_space<vmem>>, vector<96x128xbf16>,
    %c90_i32 = arith.constant 90 : i32
    %70 = tpu.dynamic_rotate %7 by %c90_i32 dim 0 : vector<96x128xf32>, i32 -> vector<96x128xf32>
    %71 = arith.truncf %70 : vector<96x128xf32> to vector<96x128xbf16>
    %c0_55 = arith.constant 0 : index
    %c768_56 = arith.constant 768 : index
    %72 = vector.load %arg12[%c0_55, %c768_56] : memref<96x1152xbf16, #tpu.memory_space<vmem>>, vector<96x128xbf16>
    tpu.vector_store %arg12[%c0_55, %c768_56], %71 {strides = array<i32>} : memref<96x1152xbf16, #tpu.memory_space<vmem>>, vector<96x128xbf16>,
    %c89_i32 = arith.constant 89 : i32
    %73 = tpu.dynamic_rotate %7 by %c89_i32 dim 0 : vector<96x128xf32>, i32 -> vector<96x128xf32>
    %74 = arith.truncf %73 : vector<96x128xf32> to vector<96x128xbf16>
    %c0_57 = arith.constant 0 : index
    %c896_58 = arith.constant 896 : index
    %75 = vector.load %arg12[%c0_57, %c896_58] : memref<96x1152xbf16, #tpu.memory_space<vmem>>, vector<96x128xbf16>
    tpu.vector_store %arg12[%c0_57, %c896_58], %74 {strides = array<i32>} : memref<96x1152xbf16, #tpu.memory_space<vmem>>, vector<96x128xbf16>,
    %c88_i32 = arith.constant 88 : i32
    %76 = tpu.dynamic_rotate %7 by %c88_i32 dim 0 : vector<96x128xf32>, i32 -> vector<96x128xf32>
    %77 = arith.truncf %76 : vector<96x128xf32> to vector<96x128xbf16>
    %c0_59 = arith.constant 0 : index
    %c1024_60 = arith.constant 1024 : index
    %78 = vector.load %arg12[%c0_59, %c1024_60] : memref<96x1152xbf16, #tpu.memory_space<vmem>>, vector<96x128xbf16>
    tpu.vector_store %arg12[%c0_59, %c1024_60], %77 {strides = array<i32>} : memref<96x1152xbf16, #tpu.memory_space<vmem>>, vector<96x128xbf16>,
    %c0_61 = arith.constant 0 : index
    %c0_62 = arith.constant 0 : index
    %79 = vector.load %arg12[%c0_61, %c0_62] : memref<96x1152xbf16, #tpu.memory_space<vmem>>, vector<96x1152xbf16>
    %c0_63 = arith.constant 0 : index
    %c0_64 = arith.constant 0 : index
    %80 = vector.load %arg13[%c0_63, %c0_64] : memref<1152x128xbf16, #tpu.memory_space<vmem>>, vector<1152x128xbf16>
    %cst_65 = arith.constant dense<0.000000e+00> : vector<96x128xf32>
    %81 = tpu.matmul %79, %80, %cst_65 {dimension_numbers = #tpu.dot_dimension_numbers<[1], [0], [0], [1], [0, 0, 1, 1], [], []>} : vector<96x1152xbf16>, vector<1152x128xbf16>, vector<96x128xf32> -> vector<96x128xf32>
    %c0_66 = arith.constant 0 : index
    %c0_67 = arith.constant 0 : index
    %c0_68 = arith.constant 0 : index
    %82 = vector.load %arg5[%c0_66, %c0_67, %c0_68] : memref<2x1x128xf32, #tpu.memory_space<vmem>>, vector<1x1x128xf32>
    %83 = vector.shape_cast %82 : vector<1x1x128xf32> to vector<1x128xf32>
    %84 = vector.broadcast %83 : vector<1x128xf32> to vector<96x128xf32>
    %85 = arith.mulf %81, %84 : vector<96x128xf32>
    %c0_69 = arith.constant 0 : index
    %c0_70 = arith.constant 0 : index
    %c0_71 = arith.constant 0 : index
    %86 = vector.load %arg6[%c0_69, %c0_70, %c0_71] : memref<2x1x128xf32, #tpu.memory_space<vmem>>, vector<1x1x128xf32>
    %87 = vector.shape_cast %86 : vector<1x1x128xf32> to vector<1x128xf32>
    %88 = vector.broadcast %87 : vector<1x128xf32> to vector<96x128xf32>
    %89 = arith.addf %85, %88 : vector<96x128xf32>
    %c1 = arith.constant 1 : index
    %c0_72 = arith.constant 0 : index
    %c0_73 = arith.constant 0 : index
    %90 = vector.load %arg4[%c1, %c0_72, %c0_73] : memref<2x1152x128xi8, #tpu.memory_space<vmem>>, vector<1x128x128xi8>
    %91 = vector.shape_cast %90 : vector<1x128x128xi8> to vector<128x128xi8>
    %92 = arith.sitofp %91 : vector<128x128xi8> to vector<128x128xf32>
    %93 = arith.truncf %92 : vector<128x128xf32> to vector<128x128xbf16>
    %c0_74 = arith.constant 0 : index
    %c0_75 = arith.constant 0 : index
    %94 = vector.load %arg13[%c0_74, %c0_75] : memref<1152x128xbf16, #tpu.memory_space<vmem>>, vector<128x128xbf16>
    tpu.vector_store %arg13[%c0_74, %c0_75], %93 {strides = array<i32>} : memref<1152x128xbf16, #tpu.memory_space<vmem>>, vector<128x128xbf16>,
    %c1_76 = arith.constant 1 : index
    %c128_77 = arith.constant 128 : index
    %c0_78 = arith.constant 0 : index
    %95 = vector.load %arg4[%c1_76, %c128_77, %c0_78] : memref<2x1152x128xi8, #tpu.memory_space<vmem>>, vector<1x128x128xi8>
    %96 = vector.shape_cast %95 : vector<1x128x128xi8> to vector<128x128xi8>
    %97 = arith.sitofp %96 : vector<128x128xi8> to vector<128x128xf32>
    %98 = arith.truncf %97 : vector<128x128xf32> to vector<128x128xbf16>
    %c128_79 = arith.constant 128 : index
    %c0_80 = arith.constant 0 : index
    %99 = vector.load %arg13[%c128_79, %c0_80] : memref<1152x128xbf16, #tpu.memory_space<vmem>>, vector<128x128xbf16>
    tpu.vector_store %arg13[%c128_79, %c0_80], %98 {strides = array<i32>} : memref<1152x128xbf16, #tpu.memory_space<vmem>>, vector<128x128xbf16>,
    %c1_81 = arith.constant 1 : index
    %c256_82 = arith.constant 256 : index
    %c0_83 = arith.constant 0 : index
    %100 = vector.load %arg4[%c1_81, %c256_82, %c0_83] : memref<2x1152x128xi8, #tpu.memory_space<vmem>>, vector<1x128x128xi8>
    %101 = vector.shape_cast %100 : vector<1x128x128xi8> to vector<128x128xi8>
    %102 = arith.sitofp %101 : vector<128x128xi8> to vector<128x128xf32>
    %103 = arith.truncf %102 : vector<128x128xf32> to vector<128x128xbf16>
    %c256_84 = arith.constant 256 : index
    %c0_85 = arith.constant 0 : index
    %104 = vector.load %arg13[%c256_84, %c0_85] : memref<1152x128xbf16, #tpu.memory_space<vmem>>, vector<128x128xbf16>
    tpu.vector_store %arg13[%c256_84, %c0_85], %103 {strides = array<i32>} : memref<1152x128xbf16, #tpu.memory_space<vmem>>, vector<128x128xbf16>,
    %c1_86 = arith.constant 1 : index
    %c384_87 = arith.constant 384 : index
    %c0_88 = arith.constant 0 : index
    %105 = vector.load %arg4[%c1_86, %c384_87, %c0_88] : memref<2x1152x128xi8, #tpu.memory_space<vmem>>, vector<1x128x128xi8>
    %106 = vector.shape_cast %105 : vector<1x128x128xi8> to vector<128x128xi8>
    %107 = arith.sitofp %106 : vector<128x128xi8> to vector<128x128xf32>
    %108 = arith.truncf %107 : vector<128x128xf32> to vector<128x128xbf16>
    %c384_89 = arith.constant 384 : index
    %c0_90 = arith.constant 0 : index
    %109 = vector.load %arg13[%c384_89, %c0_90] : memref<1152x128xbf16, #tpu.memory_space<vmem>>, vector<128x128xbf16>
    tpu.vector_store %arg13[%c384_89, %c0_90], %108 {strides = array<i32>} : memref<1152x128xbf16, #tpu.memory_space<vmem>>, vector<128x128xbf16>,
    %c1_91 = arith.constant 1 : index
    %c512_92 = arith.constant 512 : index
    %c0_93 = arith.constant 0 : index
    %110 = vector.load %arg4[%c1_91, %c512_92, %c0_93] : memref<2x1152x128xi8, #tpu.memory_space<vmem>>, vector<1x128x128xi8>
    %111 = vector.shape_cast %110 : vector<1x128x128xi8> to vector<128x128xi8>
    %112 = arith.sitofp %111 : vector<128x128xi8> to vector<128x128xf32>
    %113 = arith.truncf %112 : vector<128x128xf32> to vector<128x128xbf16>
    %c512_94 = arith.constant 512 : index
    %c0_95 = arith.constant 0 : index
    %114 = vector.load %arg13[%c512_94, %c0_95] : memref<1152x128xbf16, #tpu.memory_space<vmem>>, vector<128x128xbf16>
    tpu.vector_store %arg13[%c512_94, %c0_95], %113 {strides = array<i32>} : memref<1152x128xbf16, #tpu.memory_space<vmem>>, vector<128x128xbf16>,
    %c1_96 = arith.constant 1 : index
    %c640_97 = arith.constant 640 : index
    %c0_98 = arith.constant 0 : index
    %115 = vector.load %arg4[%c1_96, %c640_97, %c0_98] : memref<2x1152x128xi8, #tpu.memory_space<vmem>>, vector<1x128x128xi8>
    %116 = vector.shape_cast %115 : vector<1x128x128xi8> to vector<128x128xi8>
    %117 = arith.sitofp %116 : vector<128x128xi8> to vector<128x128xf32>
    %118 = arith.truncf %117 : vector<128x128xf32> to vector<128x128xbf16>
    %c640_99 = arith.constant 640 : index
    %c0_100 = arith.constant 0 : index
    %119 = vector.load %arg13[%c640_99, %c0_100] : memref<1152x128xbf16, #tpu.memory_space<vmem>>, vector<128x128xbf16>
    tpu.vector_store %arg13[%c640_99, %c0_100], %118 {strides = array<i32>} : memref<1152x128xbf16, #tpu.memory_space<vmem>>, vector<128x128xbf16>,
    %c1_101 = arith.constant 1 : index
    %c768_102 = arith.constant 768 : index
    %c0_103 = arith.constant 0 : index
    %120 = vector.load %arg4[%c1_101, %c768_102, %c0_103] : memref<2x1152x128xi8, #tpu.memory_space<vmem>>, vector<1x128x128xi8>
    %121 = vector.shape_cast %120 : vector<1x128x128xi8> to vector<128x128xi8>
    %122 = arith.sitofp %121 : vector<128x128xi8> to vector<128x128xf32>
    %123 = arith.truncf %122 : vector<128x128xf32> to vector<128x128xbf16>
    %c768_104 = arith.constant 768 : index
    %c0_105 = arith.constant 0 : index
    %124 = vector.load %arg13[%c768_104, %c0_105] : memref<1152x128xbf16, #tpu.memory_space<vmem>>, vector<128x128xbf16>
    tpu.vector_store %arg13[%c768_104, %c0_105], %123 {strides = array<i32>} : memref<1152x128xbf16, #tpu.memory_space<vmem>>, vector<128x128xbf16>,
    %c1_106 = arith.constant 1 : index
    %c896_107 = arith.constant 896 : index
    %c0_108 = arith.constant 0 : index
    %125 = vector.load %arg4[%c1_106, %c896_107, %c0_108] : memref<2x1152x128xi8, #tpu.memory_space<vmem>>, vector<1x128x128xi8>
    %126 = vector.shape_cast %125 : vector<1x128x128xi8> to vector<128x128xi8>
    %127 = arith.sitofp %126 : vector<128x128xi8> to vector<128x128xf32>
    %128 = arith.truncf %127 : vector<128x128xf32> to vector<128x128xbf16>
    %c896_109 = arith.constant 896 : index
    %c0_110 = arith.constant 0 : index
    %129 = vector.load %arg13[%c896_109, %c0_110] : memref<1152x128xbf16, #tpu.memory_space<vmem>>, vector<128x128xbf16>
    tpu.vector_store %arg13[%c896_109, %c0_110], %128 {strides = array<i32>} : memref<1152x128xbf16, #tpu.memory_space<vmem>>, vector<128x128xbf16>,
    %c1_111 = arith.constant 1 : index
    %c1024_112 = arith.constant 1024 : index
    %c0_113 = arith.constant 0 : index
    %130 = vector.load %arg4[%c1_111, %c1024_112, %c0_113] : memref<2x1152x128xi8, #tpu.memory_space<vmem>>, vector<1x128x128xi8>
    %131 = vector.shape_cast %130 : vector<1x128x128xi8> to vector<128x128xi8>
    %132 = arith.sitofp %131 : vector<128x128xi8> to vector<128x128xf32>
    %133 = arith.truncf %132 : vector<128x128xf32> to vector<128x128xbf16>
    %c1024_114 = arith.constant 1024 : index
    %c0_115 = arith.constant 0 : index
    %134 = vector.load %arg13[%c1024_114, %c0_115] : memref<1152x128xbf16, #tpu.memory_space<vmem>>, vector<128x128xbf16>
    tpu.vector_store %arg13[%c1024_114, %c0_115], %133 {strides = array<i32>} : memref<1152x128xbf16, #tpu.memory_space<vmem>>, vector<128x128xbf16>,
    %135 = arith.truncf %89 : vector<96x128xf32> to vector<96x128xbf16>
    %c0_116 = arith.constant 0 : index
    %c0_117 = arith.constant 0 : index
    %136 = vector.load %arg12[%c0_116, %c0_117] : memref<96x1152xbf16, #tpu.memory_space<vmem>>, vector<96x128xbf16>
    tpu.vector_store %arg12[%c0_116, %c0_117], %135 {strides = array<i32>} : memref<96x1152xbf16, #tpu.memory_space<vmem>>, vector<96x128xbf16>,
    %c95_i32_118 = arith.constant 95 : i32
    %137 = tpu.dynamic_rotate %89 by %c95_i32_118 dim 0 : vector<96x128xf32>, i32 -> vector<96x128xf32>
    %138 = arith.truncf %137 : vector<96x128xf32> to vector<96x128xbf16>
    %c0_119 = arith.constant 0 : index
    %c128_120 = arith.constant 128 : index
    %139 = vector.load %arg12[%c0_119, %c128_120] : memref<96x1152xbf16, #tpu.memory_space<vmem>>, vector<96x128xbf16>
    tpu.vector_store %arg12[%c0_119, %c128_120], %138 {strides = array<i32>} : memref<96x1152xbf16, #tpu.memory_space<vmem>>, vector<96x128xbf16>,
    %c94_i32_121 = arith.constant 94 : i32
    %140 = tpu.dynamic_rotate %89 by %c94_i32_121 dim 0 : vector<96x128xf32>, i32 -> vector<96x128xf32>
    %141 = arith.truncf %140 : vector<96x128xf32> to vector<96x128xbf16>
    %c0_122 = arith.constant 0 : index
    %c256_123 = arith.constant 256 : index
    %142 = vector.load %arg12[%c0_122, %c256_123] : memref<96x1152xbf16, #tpu.memory_space<vmem>>, vector<96x128xbf16>
    tpu.vector_store %arg12[%c0_122, %c256_123], %141 {strides = array<i32>} : memref<96x1152xbf16, #tpu.memory_space<vmem>>, vector<96x128xbf16>,
    %c93_i32_124 = arith.constant 93 : i32
    %143 = tpu.dynamic_rotate %89 by %c93_i32_124 dim 0 : vector<96x128xf32>, i32 -> vector<96x128xf32>
    %144 = arith.truncf %143 : vector<96x128xf32> to vector<96x128xbf16>
    %c0_125 = arith.constant 0 : index
    %c384_126 = arith.constant 384 : index
    %145 = vector.load %arg12[%c0_125, %c384_126] : memref<96x1152xbf16, #tpu.memory_space<vmem>>, vector<96x128xbf16>
    tpu.vector_store %arg12[%c0_125, %c384_126], %144 {strides = array<i32>} : memref<96x1152xbf16, #tpu.memory_space<vmem>>, vector<96x128xbf16>,
    %c92_i32_127 = arith.constant 92 : i32
    %146 = tpu.dynamic_rotate %89 by %c92_i32_127 dim 0 : vector<96x128xf32>, i32 -> vector<96x128xf32>
    %147 = arith.truncf %146 : vector<96x128xf32> to vector<96x128xbf16>
    %c0_128 = arith.constant 0 : index
    %c512_129 = arith.constant 512 : index
    %148 = vector.load %arg12[%c0_128, %c512_129] : memref<96x1152xbf16, #tpu.memory_space<vmem>>, vector<96x128xbf16>
    tpu.vector_store %arg12[%c0_128, %c512_129], %147 {strides = array<i32>} : memref<96x1152xbf16, #tpu.memory_space<vmem>>, vector<96x128xbf16>,
    %c91_i32_130 = arith.constant 91 : i32
    %149 = tpu.dynamic_rotate %89 by %c91_i32_130 dim 0 : vector<96x128xf32>, i32 -> vector<96x128xf32>
    %150 = arith.truncf %149 : vector<96x128xf32> to vector<96x128xbf16>
    %c0_131 = arith.constant 0 : index
    %c640_132 = arith.constant 640 : index
    %151 = vector.load %arg12[%c0_131, %c640_132] : memref<96x1152xbf16, #tpu.memory_space<vmem>>, vector<96x128xbf16>
    tpu.vector_store %arg12[%c0_131, %c640_132], %150 {strides = array<i32>} : memref<96x1152xbf16, #tpu.memory_space<vmem>>, vector<96x128xbf16>,
    %c90_i32_133 = arith.constant 90 : i32
    %152 = tpu.dynamic_rotate %89 by %c90_i32_133 dim 0 : vector<96x128xf32>, i32 -> vector<96x128xf32>
    %153 = arith.truncf %152 : vector<96x128xf32> to vector<96x128xbf16>
    %c0_134 = arith.constant 0 : index
    %c768_135 = arith.constant 768 : index
    %154 = vector.load %arg12[%c0_134, %c768_135] : memref<96x1152xbf16, #tpu.memory_space<vmem>>, vector<96x128xbf16>
    tpu.vector_store %arg12[%c0_134, %c768_135], %153 {strides = array<i32>} : memref<96x1152xbf16, #tpu.memory_space<vmem>>, vector<96x128xbf16>,
    %c89_i32_136 = arith.constant 89 : i32
    %155 = tpu.dynamic_rotate %89 by %c89_i32_136 dim 0 : vector<96x128xf32>, i32 -> vector<96x128xf32>
    %156 = arith.truncf %155 : vector<96x128xf32> to vector<96x128xbf16>
    %c0_137 = arith.constant 0 : index
    %c896_138 = arith.constant 896 : index
    %157 = vector.load %arg12[%c0_137, %c896_138] : memref<96x1152xbf16, #tpu.memory_space<vmem>>, vector<96x128xbf16>
    tpu.vector_store %arg12[%c0_137, %c896_138], %156 {strides = array<i32>} : memref<96x1152xbf16, #tpu.memory_space<vmem>>, vector<96x128xbf16>,
    %c88_i32_139 = arith.constant 88 : i32
    %158 = tpu.dynamic_rotate %89 by %c88_i32_139 dim 0 : vector<96x128xf32>, i32 -> vector<96x128xf32>
    %159 = arith.truncf %158 : vector<96x128xf32> to vector<96x128xbf16>
    %c0_140 = arith.constant 0 : index
    %c1024_141 = arith.constant 1024 : index
    %160 = vector.load %arg12[%c0_140, %c1024_141] : memref<96x1152xbf16, #tpu.memory_space<vmem>>, vector<96x128xbf16>
    tpu.vector_store %arg12[%c0_140, %c1024_141], %159 {strides = array<i32>} : memref<96x1152xbf16, #tpu.memory_space<vmem>>, vector<96x128xbf16>,
    %c0_142 = arith.constant 0 : index
    %c0_143 = arith.constant 0 : index
    %161 = vector.load %arg12[%c0_142, %c0_143] : memref<96x1152xbf16, #tpu.memory_space<vmem>>, vector<96x1152xbf16>
    %c0_144 = arith.constant 0 : index
    %c0_145 = arith.constant 0 : index
    %162 = vector.load %arg13[%c0_144, %c0_145] : memref<1152x128xbf16, #tpu.memory_space<vmem>>, vector<1152x128xbf16>
    %cst_146 = arith.constant dense<0.000000e+00> : vector<96x128xf32>
    %163 = tpu.matmul %161, %162, %cst_146 {dimension_numbers = #tpu.dot_dimension_numbers<[1], [0], [0], [1], [0, 0, 1, 1], [], []>} : vector<96x1152xbf16>, vector<1152x128xbf16>, vector<96x128xf32> -> vector<96x128xf32>
    %c1_147 = arith.constant 1 : index
    %c0_148 = arith.constant 0 : index
    %c0_149 = arith.constant 0 : index
    %164 = vector.load %arg5[%c1_147, %c0_148, %c0_149] : memref<2x1x128xf32, #tpu.memory_space<vmem>>, vector<1x1x128xf32>
    %165 = vector.shape_cast %164 : vector<1x1x128xf32> to vector<1x128xf32>
    %166 = vector.broadcast %165 : vector<1x128xf32> to vector<96x128xf32>
    %167 = arith.mulf %163, %166 : vector<96x128xf32>
    %c1_150 = arith.constant 1 : index
    %c0_151 = arith.constant 0 : index
    %c0_152 = arith.constant 0 : index
    %168 = vector.load %arg6[%c1_150, %c0_151, %c0_152] : memref<2x1x128xf32, #tpu.memory_space<vmem>>, vector<1x1x128xf32>
    %169 = vector.shape_cast %168 : vector<1x1x128xf32> to vector<1x128xf32>
    %170 = vector.broadcast %169 : vector<1x128xf32> to vector<96x128xf32>
    %171 = arith.addf %167, %170 : vector<96x128xf32>
    %c0_153 = arith.constant 0 : index
    %c0_154 = arith.constant 0 : index
    %172 = vector.load %arg7[%c0_153, %c0_154] : memref<128x4xf32, #tpu.memory_space<vmem>>, vector<128x4xf32>
    %cst_155 = arith.constant dense<0.000000e+00> : vector<96x4xf32>
    %173 = tpu.matmul %171, %172, %cst_155 {dimension_numbers = #tpu.dot_dimension_numbers<[1], [0], [0], [1], [0, 0, 1, 1], [], []>} : vector<96x128xf32>, vector<128x4xf32>, vector<96x4xf32> -> vector<96x4xf32>
    %c0_156 = arith.constant 0 : index
    %c0_157 = arith.constant 0 : index
    %174 = vector.load %arg8[%c0_156, %c0_157] : memref<1x4xf32, #tpu.memory_space<vmem>>, vector<1x4xf32>
    %175 = vector.broadcast %174 : vector<1x4xf32> to vector<96x4xf32>
    %176 = arith.addf %173, %175 : vector<96x4xf32>
    %cst_158 = arith.constant 0.000000e+00 : f32
    %177 = vector.broadcast %cst_158 : f32 to vector<96x4xf32>
    %178 = arith.maximumf %176, %177 : vector<96x4xf32>
    %179 = vector.extract_strided_slice %178 {offsets = [0, 0], sizes = [32, 4], strides = [1, 1]} : vector<96x4xf32> to vector<32x4xf32>
    %c0_159 = arith.constant 0 : index
    %c0_160 = arith.constant 0 : index
    %180 = vector.load %arg9[%c0_159, %c0_160] : memref<32x128xf32, #tpu.memory_space<vmem>>, vector<32x128xf32>
    %cst_161 = arith.constant dense<0.000000e+00> : vector<4x128xf32>
    %181 = tpu.matmul %179, %180, %cst_161 {dimension_numbers = #tpu.dot_dimension_numbers<[0], [0], [1], [1], [0, 1, 1, 1], [], []>} : vector<32x4xf32>, vector<32x128xf32>, vector<4x128xf32> -> vector<4x128xf32>
    %182 = vector.extract_strided_slice %178 {offsets = [48, 0], sizes = [32, 4], strides = [1, 1]} : vector<96x4xf32> to vector<32x4xf32>
    %c0_162 = arith.constant 0 : index
    %c0_163 = arith.constant 0 : index
    %183 = vector.load %arg9[%c0_162, %c0_163] : memref<32x128xf32, #tpu.memory_space<vmem>>, vector<32x128xf32>
    %cst_164 = arith.constant dense<0.000000e+00> : vector<4x128xf32>
    %184 = tpu.matmul %182, %183, %cst_164 {dimension_numbers = #tpu.dot_dimension_numbers<[0], [0], [1], [1], [0, 1, 1, 1], [], []>} : vector<32x4xf32>, vector<32x128xf32>, vector<4x128xf32> -> vector<4x128xf32>
    %185 = tpu.concatenate %181, %184 in 0 : vector<4x128xf32>, vector<4x128xf32> -> vector<8x128xf32>
    %c0_165 = arith.constant 0 : index
    %c0_166 = arith.constant 0 : index
    %186 = vector.load %arg10[%c0_165, %c0_166] : memref<1x128xf32, #tpu.memory_space<vmem>>, vector<1x128xf32>
    %187 = vector.broadcast %186 : vector<1x128xf32> to vector<8x128xf32>
    %188 = arith.addf %185, %187 : vector<8x128xf32>
    %c0_167 = arith.constant 0 : index
    %c0_168 = arith.constant 0 : index
    %189 = vector.load %arg11[%c0_167, %c0_168] : memref<8x128xf32, #tpu.memory_space<vmem>>, vector<8x128xf32>
    tpu.vector_store %arg11[%c0_167, %c0_168], %188 {strides = array<i32>} : memref<8x128xf32, #tpu.memory_space<vmem>>, vector<8x128xf32>,
    return
  }
  func.func @transform_0(%arg0: i32) -> (i32, i32) {
    %c0_i32 = arith.constant 0 : i32
    %c0_i32_0 = arith.constant 0 : i32
    %c0_i32_1 = arith.constant 0 : i32
    return %c0_i32, %c0_i32_0 : i32, i32
  }
  func.func @transform_1(%arg0: i32) -> (i32, i32) {
    %c0_i32 = arith.constant 0 : i32
    %c0_i32_0 = arith.constant 0 : i32
    %c0_i32_1 = arith.constant 0 : i32
    return %c0_i32, %c0_i32_0 : i32, i32
  }
  func.func @transform_2(%arg0: i32) -> (i32, i32) {
    %c0_i32 = arith.constant 0 : i32
    %c0_i32_0 = arith.constant 0 : i32
    %c0_i32_1 = arith.constant 0 : i32
    return %c0_i32, %c0_i32_0 : i32, i32
  }
  func.func @transform_3(%arg0: i32) -> (i32, i32, i32) {
    %c0_i32 = arith.constant 0 : i32
    %c0_i32_0 = arith.constant 0 : i32
    %c0_i32_1 = arith.constant 0 : i32
    %c0_i32_2 = arith.constant 0 : i32
    return %c0_i32, %c0_i32_0, %c0_i32_1 : i32, i32, i32
  }
  func.func @transform_4(%arg0: i32) -> (i32, i32, i32) {
    %c0_i32 = arith.constant 0 : i32
    %c0_i32_0 = arith.constant 0 : i32
    %c0_i32_1 = arith.constant 0 : i32
    %c0_i32_2 = arith.constant 0 : i32
    return %c0_i32, %c0_i32_0, %c0_i32_1 : i32, i32, i32
  }
  func.func @transform_5(%arg0: i32) -> (i32, i32, i32) {
    %c0_i32 = arith.constant 0 : i32
    %c0_i32_0 = arith.constant 0 : i32
    %c0_i32_1 = arith.constant 0 : i32
    %c0_i32_2 = arith.constant 0 : i32
    return %c0_i32, %c0_i32_0, %c0_i32_1 : i32, i32, i32
  }
  func.func @transform_6(%arg0: i32) -> (i32, i32) {
    %c0_i32 = arith.constant 0 : i32
    %c0_i32_0 = arith.constant 0 : i32
    %c0_i32_1 = arith.constant 0 : i32
    return %c0_i32, %c0_i32_0 : i32, i32
  }
  func.func @transform_7(%arg0: i32) -> (i32, i32) {
    %c0_i32 = arith.constant 0 : i32
    %c0_i32_0 = arith.constant 0 : i32
    %c0_i32_1 = arith.constant 0 : i32
    return %c0_i32, %c0_i32_0 : i32, i32
  }
  func.func @transform_8(%arg0: i32) -> (i32, i32) {
    %c0_i32 = arith.constant 0 : i32
    %c0_i32_0 = arith.constant 0 : i32
    %c0_i32_1 = arith.constant 0 : i32
    return %c0_i32, %c0_i32_0 : i32, i32
  }
  func.func @transform_9(%arg0: i32) -> (i32, i32) {
    %c0_i32 = arith.constant 0 : i32
    %c0_i32_0 = arith.constant 0 : i32
    %c0_i32_1 = arith.constant 0 : i32
    return %c0_i32, %c0_i32_0 : i32, i32
  }
  func.func @transform_10(%arg0: i32) -> (i32, i32) {
    %c0_i32 = arith.constant 0 : i32
    %c0_i32_0 = arith.constant 0 : i32
    %c0_i32_1 = arith.constant 0 : i32
    return %c0_i32, %c0_i32_0 : i32, i32
  }
}

</mosaic_0001>

<bundles_post_ra>
// kernel: linear_conv_nbeats_block.1
= control target key start
LH: loop header
LB: loop body
LE: loop exit
PB: predicated region body
PF: predicated region fallthrough
CT: control target
= control target key end

     0   :  { %15 = vsyncpa [#allocation5], 0  ;;  %s3432_s13 = smov [#allocation4]   ;;  %s5233_s0 = inlined_call_operand.vmem [shape: f32[96,8], index: 0, kind: input, shape index: {}]   ;;  %s5234_s1 = inlined_call_operand.vmem [shape: f32[8,128], index: 1, kind: input, shape index: {}]   ;;  %s5235_s2 = inlined_call_operand.vmem [shape: f32[1,128], index: 2, kind: input, shape index: {}]   ;;  %s5236_s3 = inlined_call_operand.hbm [shape: s8[2,1152,128], index: 3, kind: input, shape index: {}]   ;;  %s5237_s4 = inlined_call_operand.vmem [shape: f32[2,1,128], index: 4, kind: input, shape index: {}]   ;;  %s5238_s5 = inlined_call_operand.vmem [shape: f32[2,1,128], index: 5, kind: input, shape index: {}]   ;;  %s5239_s6 = inlined_call_operand.vmem [shape: f32[128,4], index: 6, kind: input, shape index: {}]   ;;  %s5240_s7 = inlined_call_operand.vmem [shape: f32[1,4], index: 7, kind: input, shape index: {}]   ;;  %s5241_s8 = inlined_call_operand.vmem [shape: f32[32,128], index: 8, kind: input, shape index: {}]   ;;  %s5242_s9 = inlined_call_operand.vmem [shape: f32[1,128], index: 9, kind: input, shape index: {}]   ;;  %s5243_s10 = inlined_call_operand.vmem [shape: f32[8,128], index: 10, kind: output, shape index: {}]  }
   0x1   :  { %s27_s14 = sshll.u32 %s3432_s13, 4  ;;  %s3408_s17 = scalar_lea.hbm %s5236_s3, 9216  ;;  %s28_s14 = int_to_ptr.vmem [resolvable:$true] %s27_s14 }
   0x2   :  { %p3409_p0 = scmp.ne.s32.totalorder %s5236_s3, %s3408_s17  ;;  %p3412_p1 = scmp.lt.u32.totalorder %s3408_s17, %s5236_s3 }
   0x4   :  { %p3414_p2 = pnand %p3412_p1, %p3409_p0 }
   0x6   :  { %3417 = shalt.err (!%p3414_p2)
}
   0x7   :  { %s3418_s22 = scalar_lea.vmem %s28_s14, 9216  ;;  %p3423_p4 = scmp.lt.s32.totalorder %s28_s14, %s28_s14 }
   0x8   :  { %p3419_p3 = scmp.ne.s32.totalorder %s28_s14, %s3418_s22  ;;  %p3424_p5 = scmp.lt.s32.totalorder %s3418_s22, %s3418_s22 }
   0xa   :  { %p3425_p6 = por %p3424_p5, %p3423_p4 }
   0xc   :  { %p3426_p7 = pnand %p3425_p6, %p3419_p3 }
   0xe   :  { %3429 = shalt.err (!%p3426_p7)
}
   0xf   :  { %s3433_s23 = smov 128   ;;  %s3434_s24 = smov 8  }
  0x10   :  { %33 = dma.hbm_to_vmem [thread:$0]  %s5236_s3, 9216, %s28_s14, [#allocation5], %s3433_s23, %s3433_s23, %s3434_s24  }
  0x11   :  { %3430 = dma.done.wait [#allocation5], 9216  }
  0x12   :  { %3431 = vsyncadd [#allocation5], 4294958080  ;;  %vm70_vm0 = vcmask 64512   ;;  %v62_v0 = vld [vmem:[%s5234_s1] sm:$0xff]  ;;  %v51_v2 = vld [vmem:[%s5233_s0 + $0x8] sm:$0xff]  ;;  %vm3436_vm8 = vmmov 0  }
  0x13   :  { %v50_v1 = vld [vmem:[%s5233_s0] sm:$0xff]  ;;  %3210 = vmatprep.subr.mxu0 %v62_v0  ;;  %v52_v3 = vld [vmem:[%s5233_s0 + $0x10] sm:$0xff]  ;;  %v53_v4 = vld [vmem:[%s5233_s0 + $0x18] sm:$0xff]  ;;  %vm2494_vm9 = vcmask 261120   ;;  %vm2676_vm10 = vcmask 1043456  }
  0x14   :  { %3212 = vmatprep.mubr.msk.f32.mxu0 %vm70_vm0, %v50_v1  ;;  %3211 = vmatpush3.msra.mxu0 %v62_v0  ;;  %v264_v5 = vld [vmem:[#allocation4 + $0x20] sm:$0xff]  ;;  %v265_v15 = vld [vmem:[#allocation4 + $0x28] sm:$0xff]  ;;  %v56_v20 = vld [vmem:[%s5233_s0 + $0x30] sm:$0xff]  ;;  %v448_v1 = vlaneseq }
  0x15   :  { %3213 = vmatmul.mubr.msk.f32.vlgmr.msra.gmra.mrb[0].mxu0 %vm70_vm0, %v51_v2  ;;  %v244_v6 = vld [vmem:[#allocation4] sm:$0xff]  ;;  %v268_v8 = vunpack.c.l.s8.bf16 %v264_v5  ;;  %v269_v9 = vunpack.c.h.s8.bf16 %v264_v5  ;;  %v55_v17 = vld [vmem:[%s5233_s0 + $0x28] sm:$0xff]  ;;  %v270_v21 = vunpack.c.l.s8.bf16 %v265_v15  ;;  %v57_v26 = vld [vmem:[%s5233_s0 + $0x38] sm:$0xff]  ;;  %v271_v29 = vunpack.c.h.s8.bf16 %v265_v15 }
  0x16   :  { %3215 = vmatprep.mubr.msk.f32.mxu0 %vm70_vm0, %v52_v3  ;;  %v54_v7 = vld [vmem:[%s5233_s0 + $0x20] sm:$0xff]  ;;  %v248_v10 = vunpack.c.l.s8.bf16 %v244_v6  ;;  %v249_v18 = vunpack.c.h.s8.bf16 %v244_v6  ;;  %v305_v19 = vld [vmem:[#allocation4 + $0x68] sm:$0xff]  ;;  %v266_v31 = vld [vmem:[#allocation4 + $0x30] sm:$0xff]  ;;  %v3562_v2 = vshrl.u32 %v448_v1, 7 }
  0x17   :  { %v304_v11 = vld [vmem:[#allocation4 + $0x60] sm:$0xff]  ;;  %2728 = vmatprep.subr.bf16.mxu1 %v268_v8  ;;  %v245_v22 = vld [vmem:[#allocation4 + $0x8] sm:$0xff]  ;;  %v310_v24 = vunpack.c.l.s8.bf16 %v305_v19  ;;  %v311_v32 = vunpack.c.h.s8.bf16 %v305_v19  ;;  %v60_v35 = vld [vmem:[%s5233_s0 + $0x50] sm:$0xff]  ;;  %v272_v36 = vunpack.c.l.s8.bf16 %v266_v31  ;;  %v273_v45 = vunpack.c.h.s8.bf16 %v266_v31 }
  0x18   :  { %v284_v12 = vld [vmem:[#allocation4 + $0x40] sm:$0xff]  ;;  %v308_v13 = vunpack.c.l.s8.bf16 %v304_v11  ;;  %v309_v16 = vunpack.c.h.s8.bf16 %v304_v11  ;;  %2729 = vmatpush3.bf16.msra.mxu1 %v248_v10  ;;  %v285_v25 = vld [vmem:[#allocation4 + $0x48] sm:$0xff]  ;;  %v250_v27 = vunpack.c.l.s8.bf16 %v245_v22  ;;  %v251_v34 = vunpack.c.h.s8.bf16 %v245_v22  ;;  %v61_v38 = vld [vmem:[%s5233_s0 + $0x58] sm:$0xff] }
  0x19   :  { %v288_v14 = vunpack.c.l.s8.bf16 %v284_v12  ;;  %3216 = vmatmul.mubr.msk.f32.gmra.mrb[2].mxu0 %vm70_vm0, %v53_v4  ;;  %2730 = vmatprep.subr.bf16.mxu1 %v269_v9  ;;  %v289_v23 = vunpack.c.h.s8.bf16 %v284_v12  ;;  %v58_v28 = vld [vmem:[%s5233_s0 + $0x40] sm:$0xff]  ;;  %v290_v30 = vunpack.c.l.s8.bf16 %v285_v25  ;;  %v59_v33 = vld [vmem:[%s5233_s0 + $0x48] sm:$0xff]  ;;  %v291_v37 = vunpack.c.h.s8.bf16 %v285_v25  ;;  %v306_v39 = vld [vmem:[#allocation4 + $0x70] sm:$0xff] }
  0x1a   :  { %3218 = vmatprep.mubr.msk.f32.mxu0 %vm70_vm0, %v54_v7  ;;  %2780 = vmatprep.subr.bf16.mxu0 %v308_v13  ;;  %v246_v40 = vld [vmem:[#allocation4 + $0x10] sm:$0xff]  ;;  %v312_v41 = vunpack.c.l.s8.bf16 %v306_v39  ;;  %v313_v46 = vunpack.c.h.s8.bf16 %v306_v39  ;;  %v267_v49 = vld [vmem:[#allocation4 + $0x38] sm:$0xff]  ;;  %v3556_v61 = vld [vmem:[#allocation4 + $0xa0] sm:$0xff]  ;;  %vm450_vm1 = vcmp.lt.s32.totalorder %v3562_v2, 7  ;;  %vm524_vm2 = vcmp.lt.s32.totalorder %v3562_v2, 5 }
  0x1b   :  { %2781 = vmatpush3.bf16.msra.mxu0 %v288_v14  ;;  %v286_v42 = vld [vmem:[#allocation4 + $0x50] sm:$0xff]  ;;  %v252_v43 = vunpack.c.l.s8.bf16 %v246_v40  ;;  %v253_v47 = vunpack.c.h.s8.bf16 %v246_v40  ;;  %v307_v50 = vld [vmem:[#allocation4 + $0x78] sm:$0xff]  ;;  %v274_v51 = vunpack.c.l.s8.bf16 %v267_v49  ;;  %v275_v57 = vunpack.c.h.s8.bf16 %v267_v49  ;;  %v3559_v63 = vld [vmem:[#allocation4 + $0xe0] sm:$0xff] }
  0x1c   :  { %2782 = vmatprep.subr.bf16.mxu0 %v309_v16  ;;  %2731 = vmatpush3.bf16.msra.mxu1 %v249_v18  ;;  %v292_v44 = vunpack.c.l.s8.bf16 %v286_v42  ;;  %v293_v48 = vunpack.c.h.s8.bf16 %v286_v42  ;;  %v247_v52 = vld [vmem:[#allocation4 + $0x18] sm:$0xff]  ;;  %v314_v53 = vunpack.c.l.s8.bf16 %v307_v50  ;;  %v315_v58 = vunpack.c.h.s8.bf16 %v307_v50  ;;  %v3564_v3 = vld [vmem:[#allocation4 + $0x80] sm:$0xff]  ;;  %v3566_v4 = vld [vmem:[#allocation4 + $0xa8] sm:$0xff] }
  0x1d   :  { %3219 = vmatmul.mubr.msk.f32.gmra.mrb[4].mxu0 %vm70_vm0, %v55_v17  ;;  %2732 = vmatprep.subr.bf16.mxu1 %v270_v21  ;;  %v287_v54 = vld [vmem:[#allocation4 + $0x58] sm:$0xff]  ;;  %v254_v55 = vunpack.c.l.s8.bf16 %v247_v52  ;;  %v255_v59 = vunpack.c.h.s8.bf16 %v247_v52  ;;  %v348_v62 = vunpack.c.l.s8.bf16 %v3556_v61  ;;  %v388_v0 = vunpack.c.l.s8.bf16 %v3559_v63  ;;  %v3568_v5 = vld [vmem:[#allocation4 + $0x88] sm:$0xff]  ;;  %v3570_v6 = vld [vmem:[#allocation4 + $0xc0] sm:$0xff] }
  0x1e   :  { %3221 = vmatprep.mubr.msk.f32.mxu0 %vm70_vm0, %v56_v20  ;;  %v294_v56 = vunpack.c.l.s8.bf16 %v287_v54  ;;  %v295_v60 = vunpack.c.h.s8.bf16 %v287_v54  ;;  %v3572_v7 = vld [vmem:[#allocation4 + $0xb0] sm:$0xff]  ;;  %v328_v9 = vunpack.c.l.s8.bf16 %v3564_v3  ;;  %v349_v10 = vunpack.c.h.s8.bf16 %v3556_v61  ;;  %v3580_v13 = vld [vmem:[#allocation4 + $0xe8] sm:$0xff]  ;;  %v3587_v15 = vld [vmem:[%s5235_s2] ss:$0 sm:$0xff] }
  0x1f   :  { %2783 = vmatpush3.bf16.msra.mxu0 %v289_v23  ;;  %v3574_v8 = vld [vmem:[#allocation4 + $0x90] sm:$0xff]  ;;  %v329_v11 = vunpack.c.h.s8.bf16 %v3564_v3  ;;  %v350_v12 = vunpack.c.l.s8.bf16 %v3566_v4  ;;  %v3582_v14 = vld [vmem:[#allocation4 + $0xc8] sm:$0xff]  ;;  %v330_v16 = vunpack.c.l.s8.bf16 %v3568_v5  ;;  %v351_v17 = vunpack.c.h.s8.bf16 %v3566_v4 }
  0x20   :  { %2784 = vmatprep.subr.bf16.mxu0 %v310_v24  ;;  %2733 = vmatpush3.bf16.msra.mxu1 %v250_v27  ;;  %v389_v19 = vunpack.c.h.s8.bf16 %v3559_v63  ;;  %v3595_v20 = vld [vmem:[#allocation4 + $0xf0] sm:$0xff]  ;;  %vm487_vm3 = vcmp.lt.s32.totalorder %v3562_v2, 6  ;;  %v368_v21 = vunpack.c.l.s8.bf16 %v3570_v6  ;;  %v369_v22 = vunpack.c.h.s8.bf16 %v3570_v6  ;;  %v3606_v27 = vld [vmem:[#allocation4 + $0x98] sm:$0xff] }
  0x21   :  { %3222 = vmatmul.mubr.msk.f32.gmra.mrb[6].mxu0 %vm70_vm0, %v57_v26  ;;  %2734 = vmatprep.subr.bf16.mxu1 %v271_v29  ;;  %v3602_v25 = vld [vmem:[#allocation4 + $0xd0] sm:$0xff]  ;;  %v3604_v26 = vld [vmem:[#allocation4 + $0xb8] sm:$0xff]  ;;  %v370_v29 = vunpack.c.l.s8.bf16 %v3582_v14  ;;  %vm598_vm4 = vcmp.lt.s32.totalorder %v3562_v2, 3  ;;  %vm672_vm5 = vcmp.lt.s32.totalorder %v3562_v2, 1  ;;  %vm561_vm6 = vcmp.lt.s32.totalorder %v3562_v2, 4 }
  0x22   :  { %3224 = vmatprep.mubr.msk.f32.mxu0 %vm70_vm0, %v58_v28  ;;  %v390_v28 = vunpack.c.l.s8.bf16 %v3580_v13  ;;  %vm635_vm7 = vcmp.lt.s32.totalorder %v3562_v2, 2 }
  0x23   :  { %2785 = vmatpush3.bf16.msra.mxu0 %v290_v30  ;;  %v391_v30 = vunpack.c.h.s8.bf16 %v3580_v13 }
  0x24   :  { %2786 = vmatprep.subr.bf16.mxu0 %v311_v32  ;;  %2735 = vmatpush3.bf16.msra.mxu1 %v251_v34  ;;  %v3612_v32 = vld [vmem:[#allocation4 + $0xf8] sm:$0xff] }
  0x25   :  { %3225 = vmatmul.mubr.msk.f32.gmra.mrb[8].mxu0 %vm70_vm0, %v59_v33  ;;  %2736 = vmatprep.subr.bf16.mxu1 %v272_v36 }
  0x26   :  { %3227 = vmatprep.mubr.msk.f32.mxu0 %vm70_vm0, %v60_v35 }
  0x27   :  { %2787 = vmatpush3.bf16.msra.mxu0 %v291_v37 }
  0x28   :  { %2788 = vmatprep.subr.bf16.mxu0 %v312_v41  ;;  %2737 = vmatpush3.bf16.msra.mxu1 %v252_v43 }
  0x29   :  { %3228 = vmatmul.mubr.msk.f32.gmra.mrb[10].mxu0 %vm70_vm0, %v61_v38  ;;  %2738 = vmatprep.subr.bf16.mxu1 %v273_v45  ;;  %v3618_v38 = vld [vmem:[#allocation4 + $0xd8] sm:$0xff] }
  0x2b   :  { %2789 = vmatpush3.bf16.msra.mxu0 %v292_v44  ;;  %v3624_v44 = vld [vmem:[#allocation4 + $0x100] sm:$0xff] }
  0x2c   :  { %2790 = vmatprep.subr.bf16.mxu0 %v313_v46  ;;  %2739 = vmatpush3.bf16.msra.mxu1 %v253_v47 }
  0x2d   :  { %2740 = vmatprep.subr.bf16.mxu1 %v274_v51 }
  0x2f   :  { %2791 = vmatpush3.bf16.msra.mxu0 %v293_v48 }
  0x30   :  { %2792 = vmatprep.subr.bf16.mxu0 %v314_v53  ;;  %2741 = vmatpush3.bf16.msra.mxu1 %v254_v55 }
  0x31   :  { %2742 = vmatprep.subr.bf16.mxu1 %v275_v57 }
  0x33   :  { %2793 = vmatpush3.bf16.msra.mxu0 %v294_v56 }
  0x34   :  { %2794 = vmatprep.subr.bf16.mxu0 %v315_v58  ;;  %2743 = vmatpush3.bf16.msra.mxu1 %v255_v59 }
  0x35   :  { %2832 = vmatprep.subr.bf16.mxu1 %v348_v62 }
  0x37   :  { %2795 = vmatpush3.bf16.msra.mxu0 %v295_v60 }
  0x38   :  { %2884 = vmatprep.subr.bf16.mxu0 %v388_v0 }
  0xe8   :  { %v3214_v33 = vpop.f32.mrb[0].mxu0 }
  0xe9   :  { %v179_v39 = vadd.f32 %v3214_v33, %v3587_v15  ;;  %v173_v40 = vpop.f32.mrb[1].mxu0 }
  0xea   :  { %v174_v45 = vadd.f32 %v3587_v15, %v173_v40 }
  0xeb   :  { %v3630_v49 = vmax.f32 %v179_v39, 0.0 }
  0xec   :  { %v3635_v53 = vmax.f32 %v174_v45, 0.0  ;;  %v3217_v54 = vpop.f32.mrb[2].mxu0 }
  0xed   :  { %5258 = vst [vmem:[#allocation7_spill] sm:$0xff] %v3630_v49  ;;  %v189_v58 = vadd.f32 %v3217_v54, %v3587_v15  ;;  %v183_v59 = vpop.f32.mrb[3].mxu0  ;;  %v437_v60 = vrot.slane %v3630_v49, 1  ;;  %v513_v62 = vrot.slane %v3630_v49, 3  ;;  %v476_v0 = vrot.slane %v3630_v49, 2 }
  0xee   :  { %v184_v1 = vadd.f32 %v3587_v15, %v183_v59  ;;  %v5246_v33 = vrot.slane %v3635_v53, 1  ;;  %v5245_v39 = vrot.slane %v3635_v53, 3  ;;  %v424_v40 = vpack.c.bf16 %v3630_v49, %v3635_v53 }
  0xef   :  { %v3649_v45 = vmax.f32 %v189_v58, 0.0  ;;  %v5244_v54 = vrot.slane %v3635_v53, 2 }
  0xf0   :  { %v3654_v55 = vmax.f32 %v184_v1, 0.0  ;;  %v3220_v51 = vpop.f32.mrb[4].mxu0  ;;  %v461_v59 = vsel %vm450_vm1, %v5246_v33, %v437_v60  ;;  %v535_v58 = vsel %vm524_vm2, %v5245_v39, %v513_v62 }
  0xf1   :  { %v199_v50 = vadd.f32 %v3220_v51, %v3587_v15  ;;  %v193_v48 = vpop.f32.mrb[5].mxu0  ;;  %v498_v1 = vsel %vm487_vm3, %v5244_v54, %v476_v0  ;;  %v439_v47 = vrot.slane %v3649_v45, 1  ;;  %v515_v43 = vrot.slane %v3649_v45, 3 }
  0xf2   :  { %5259 = vst [vmem:[#allocation8_spill] sm:$0xff] %v3654_v55  ;;  %v194_v46 = vadd.f32 %v3587_v15, %v193_v48  ;;  %v438_v42 = vrot.slane %v3654_v55, 1  ;;  %v514_v35 = vrot.slane %v3654_v55, 3  ;;  %v477_v52 = vrot.slane %v3654_v55, 2 }
  0xf3   :  { %v3676_v37 = vmax.f32 %v199_v50, 0.0  ;;  %v425_v51 = vpack.c.bf16 %v3649_v45, %v3654_v55  ;;  %v478_v57 = vrot.slane %v3649_v45, 2 }
  0xf4   :  { %v3682_v54 = vmax.f32 %v194_v46, 0.0  ;;  %v3223_v41 = vpop.f32.mrb[6].mxu0  ;;  %v460_v48 = vsel %vm450_vm1, %v437_v60, %v438_v42  ;;  %v534_v31 = vsel %vm524_vm2, %v513_v62, %v514_v35  ;;  %v497_v50 = vsel %vm487_vm3, %v476_v0, %v477_v52 }
  0xf5   :  { %v209_v36 = vadd.f32 %v3223_v41, %v3587_v15  ;;  %v203_v24 = vpop.f32.mrb[7].mxu0  ;;  %v463_v39 = vpack.c.bf16 %v460_v48, %v461_v59  ;;  %v537_v33 = vpack.c.bf16 %v534_v31, %v535_v58  ;;  %v500_v34 = vpack.c.bf16 %v497_v50, %v498_v1 }
  0xf6   :  { %v204_v56 = vadd.f32 %v3587_v15, %v203_v24  ;;  %v440_v46 = vrot.slane %v3682_v54, 1  ;;  %v459_v23 = vsel %vm450_vm1, %v438_v42, %v439_v47  ;;  %v516_v60 = vrot.slane %v3682_v54, 3 }
  0xf7   :  { %v3696_v18 = vmax.f32 %v209_v36, 0.0  ;;  %867 = vmatprep.mubr.bf16.mxu1 %v463_v39  ;;  %948 = vmatprep.mubr.bf16.mxu0 %v537_v33  ;;  %v533_v41 = vsel %vm524_vm2, %v514_v35, %v515_v43  ;;  %v479_v62 = vrot.slane %v3682_v54, 2  ;;  %v496_v31 = vsel %vm487_vm3, %v477_v52, %v478_v57 }
  0xf8   :  { %v3703_v24 = vmax.f32 %v204_v56, 0.0  ;;  %868 = vmatmul.mubr.bf16.vlgmr.msra.gmra.mrb[0].mxu1 %v424_v40  ;;  %949 = vmatmul.mubr.bf16.vlgmr.msra.gmra.mrb[12].mxu0 %v500_v34  ;;  %v3226_v0 = vpop.f32.mrb[8].mxu0  ;;  %v458_v42 = vsel %vm450_vm1, %v439_v47, %v440_v46  ;;  %v532_v36 = vsel %vm524_vm2, %v515_v43, %v516_v60  ;;  %v441_v33 = vrot.slane %v3676_v37, 1 }
  0xf9   :  { %2833 = vmatpush3.bf16.msra.mxu1 %v328_v9  ;;  %v219_v35 = vadd.f32 %v3226_v0, %v3587_v15  ;;  %v213_v39 = vpop.f32.mrb[9].mxu0  ;;  %v464_v52 = vpack.c.bf16 %v458_v42, %v459_v23  ;;  %v538_v56 = vpack.c.bf16 %v532_v36, %v533_v41  ;;  %v495_v34 = vsel %vm487_vm3, %v478_v57, %v479_v62 }
  0xfa   :  { %v214_v40 = vadd.f32 %v3587_v15, %v213_v39  ;;  %2834 = vmatprep.subr.bf16.mxu1 %v349_v10  ;;  %v501_v47 = vpack.c.bf16 %v495_v34, %v496_v31  ;;  %v442_v43 = vrot.slane %v3703_v24, 1  ;;  %v457_v59 = vsel %vm450_vm1, %v440_v46, %v441_v33  ;;  %2885 = vmatpush3.bf16.msra.mxu0 %v368_v21 }
  0xfb   :  { %v3723_v9 = vmax.f32 %v219_v35, 0.0  ;;  %875 = vmatprep.mubr.bf16.mxu1 %v464_v52  ;;  %956 = vmatprep.mubr.bf16.mxu0 %v538_v56  ;;  %v517_v23 = vrot.slane %v3676_v37, 3  ;;  %v518_v57 = vrot.slane %v3703_v24, 3  ;;  %v426_v61 = vpack.c.bf16 %v3676_v37, %v3682_v54 }
  0xfc   :  { %v3729_v10 = vmax.f32 %v214_v40, 0.0  ;;  %v3229_v58 = vpop.f32.mrb[10].mxu0  ;;  %v456_v1 = vsel %vm450_vm1, %v441_v33, %v442_v43  ;;  %v480_v48 = vrot.slane %v3676_v37, 2  ;;  %v481_v21 = vrot.slane %v3703_v24, 2  ;;  %2886 = vmatprep.subr.bf16.mxu0 %v389_v19 }
  0xfd   :  { %v229_v50 = vadd.f32 %v3229_v58, %v3587_v15  ;;  %v223_v46 = vpop.f32.mrb[11].mxu0  ;;  %2835 = vmatpush3.bf16.msra.mxu1 %v329_v11  ;;  %v465_v41 = vpack.c.bf16 %v456_v1, %v457_v59  ;;  %v530_v31 = vsel %vm524_vm2, %v517_v23, %v518_v57  ;;  %v531_v0 = vsel %vm524_vm2, %v516_v60, %v517_v23 }
  0xfe   :  { %v224_v42 = vadd.f32 %v3587_v15, %v223_v46  ;;  %v539_v36 = vpack.c.bf16 %v530_v31, %v531_v0  ;;  %2836 = vmatprep.subr.bf16.mxu1 %v350_v12  ;;  %v493_v63 = vsel %vm487_vm3, %v480_v48, %v481_v21  ;;  %v494_v3 = vsel %vm487_vm3, %v479_v62, %v480_v48 }
  0xff   :  { %v3751_v11 = vmax.f32 %v229_v50, 0.0  ;;  %v502_v19 = vpack.c.bf16 %v493_v63, %v494_v3  ;;  %v443_v33 = vrot.slane %v3696_v18, 1  ;;  %v444_v35 = vrot.slane %v3729_v10, 1  ;;  %2887 = vmatpush3.bf16.msra.mxu0 %v369_v22 }
 0x100   :  { %v3757_v15 = vmax.f32 %v224_v42, 0.0  ;;  %876 = vmatmul.mubr.bf16.gmra.mrb[4].mxu1 %v425_v51  ;;  %957 = vmatmul.mubr.bf16.gmra.mrb[16].mxu0 %v501_v47  ;;  %v519_v12 = vrot.slane %v3696_v18, 3  ;;  %v520_v60 = vrot.slane %v3729_v10, 3  ;;  %v427_v62 = vpack.c.bf16 %v3696_v18, %v3703_v24 }
 0x101   :  { %883 = vmatprep.mubr.bf16.mxu1 %v465_v41  ;;  %964 = vmatprep.mubr.bf16.mxu0 %v539_v36  ;;  %v454_v6 = vsel %vm450_vm1, %v443_v33, %v444_v35  ;;  %v455_v22 = vsel %vm450_vm1, %v442_v43, %v443_v33  ;;  %v482_v51 = vrot.slane %v3696_v18, 2  ;;  %v483_v39 = vrot.slane %v3729_v10, 2 }
 0x102   :  { %2837 = vmatpush3.bf16.msra.mxu1 %v330_v16  ;;  %v466_v52 = vpack.c.bf16 %v454_v6, %v455_v22  ;;  %v528_v56 = vsel %vm524_vm2, %v519_v12, %v520_v60  ;;  %v529_v34 = vsel %vm524_vm2, %v518_v57, %v519_v12  ;;  %2888 = vmatprep.subr.bf16.mxu0 %v390_v28  ;;  %v445_v40 = vrot.slane %v3723_v9, 1 }
 0x103   :  { %v540_v47 = vpack.c.bf16 %v528_v56, %v529_v34  ;;  %2838 = vmatprep.subr.bf16.mxu1 %v351_v17  ;;  %v3787_v43 = vsel %vm487_vm3, %v482_v51, %v483_v39  ;;  %v3791_v16 = vsel %vm487_vm3, %v481_v21, %v482_v51  ;;  %v446_v59 = vrot.slane %v3757_v15, 1  ;;  %2889 = vmatpush3.bf16.msra.mxu0 %v370_v29 }
 0x104   :  { %v503_v28 = vpack.c.bf16 %v3787_v43, %v3791_v16  ;;  %v3800_v4 = vsel %vm450_vm1, %v444_v35, %v445_v40  ;;  %v521_v17 = vrot.slane %v3723_v9, 3  ;;  %v522_v23 = vrot.slane %v3757_v15, 3  ;;  %2890 = vmatprep.subr.bf16.mxu0 %v391_v30 }
 0x105   :  { %v3809_v57 = vsel %vm450_vm1, %v445_v40, %v446_v59  ;;  %v428_v29 = vpack.c.bf16 %v3723_v9, %v3729_v10  ;;  %v484_v58 = vrot.slane %v3723_v9, 2  ;;  %v485_v1 = vrot.slane %v3757_v15, 2 }
 0x106   :  { %v5260_v48 = vunpack.c.h.s8.bf16 %v3568_v5  ;;  %v467_v13 = vpack.c.bf16 %v3809_v57, %v3800_v4  ;;  %v526_v30 = vsel %vm524_vm2, %v521_v17, %v522_v23  ;;  %v527_v21 = vsel %vm524_vm2, %v520_v60, %v521_v17 }
 0x107   :  { %v447_v50 = vrot.slane %v3751_v11, 1  ;;  %v5261_v46 = vunpack.c.l.s8.bf16 %v3572_v7  ;;  %v541_v41 = vpack.c.bf16 %v526_v30, %v527_v21  ;;  %v5262_v31 = vunpack.c.h.s8.bf16 %v3582_v14 }
 0x108   :  { %2839 = vmatpush3.bf16.msra.mxu1 %v5260_v48  ;;  %v3831_v5 = vsel %vm487_vm3, %v484_v58, %v485_v1  ;;  %v3835_v0 = vsel %vm487_vm3, %v483_v39, %v484_v58  ;;  %v523_v42 = vrot.slane %v3751_v11, 3  ;;  %965 = vmatmul.mubr.bf16.gmra.mrb[20].mxu0 %v502_v19  ;;  %v5263_v63 = vrot.slane %v3635_v53, 1 }
 0x109   :  { %2840 = vmatprep.subr.bf16.mxu1 %v5261_v46  ;;  %2891 = vmatpush3.bf16.msra.mxu0 %v5262_v31  ;;  %v504_v36 = vpack.c.bf16 %v3831_v5, %v3835_v0  ;;  %v3845_v14 = vsel %vm450_vm1, %v446_v59, %v447_v50  ;;  %v486_v33 = vrot.slane %v3751_v11, 2  ;;  %v5264_v35 = vrot.slane %v3635_v53, 3 }
 0x10a   :  { %884 = vmatmul.mubr.bf16.gmra.mrb[8].mxu1 %v426_v61  ;;  %v3851_v3 = vsel %vm450_vm1, %v447_v50, %v5263_v63  ;;  %972 = vmatprep.mubr.bf16.mxu0 %v540_v47  ;;  %v3858_v19 = vsel %vm524_vm2, %v522_v23, %v523_v42  ;;  %v661_v60 = vrot.slane %v3630_v49, 7  ;;  %v5265_v6 = vunpack.c.l.s8.bf16 %v3574_v8 }
 0x10b   :  { %891 = vmatprep.mubr.bf16.mxu1 %v466_v52  ;;  %v468_v61 = vpack.c.bf16 %v3851_v3, %v3845_v14  ;;  %v3864_v12 = vsel %vm524_vm2, %v523_v42, %v5264_v35  ;;  %v5266_v22 = vunpack.c.l.s8.bf16 %v3595_v20  ;;  %v429_v39 = vpack.c.bf16 %v3751_v11, %v3757_v15 }
 0x10c   :  { %2841 = vmatpush3.bf16.msra.mxu1 %v5265_v6  ;;  %v542_v51 = vpack.c.bf16 %v3864_v12, %v3858_v19  ;;  %v3877_v52 = vsel %vm487_vm3, %v485_v1, %v486_v33  ;;  %v662_v56 = vrot.slane %v3654_v55, 7  ;;  %v5267_v34 = vunpack.c.h.s8.bf16 %v3572_v7 }
 0x10d   :  { %2892 = vmatprep.subr.bf16.mxu0 %v5266_v22  ;;  %v5268_v40 = vunpack.c.l.s8.bf16 %v3602_v25  ;;  %v5269_v47 = vrot.slane %v3635_v53, 2  ;;  %v5270_v4 = vrot.slane %v3654_v55, 5  ;;  %v5271_v17 = vrot.slane %v3630_v49, 5 }
 0x10e   :  { %2842 = vmatprep.subr.bf16.mxu1 %v5267_v34  ;;  %v5273_v57 = vrot.slane %v3635_v53, 5  ;;  %v5248_v1 = vrot.slane %v3635_v53, 4  ;;  %v5274_v48 = vunpack.c.h.s8.bf16 %v3595_v20  ;;  %v3915_v50 = vsel %vm672_vm5, %v661_v60, %v662_v56 }
 0x10f   :  { %2893 = vmatpush3.bf16.msra.mxu0 %v5268_v40  ;;  %v3888_v59 = vsel %vm487_vm3, %v486_v33, %v5269_v47  ;;  %v3896_v23 = vsel %vm598_vm4, %v5271_v17, %v5270_v4  ;;  %v5272_v7 = vmov %v5271_v17  ;;  %v5275_v46 = vrot.slane %v3635_v53, 7 }
 0x110   :  { %v3904_v58 = vsel %vm598_vm4, %v5273_v57, %v5272_v7  ;;  %2894 = vmatprep.subr.bf16.mxu0 %v5274_v48  ;;  %v505_v30 = vpack.c.bf16 %v3888_v59, %v3877_v52  ;;  %v550_v42 = vrot.slane %v3630_v49, 4  ;;  %v551_v63 = vrot.slane %v3654_v55, 4  ;;  %973 = vmatmul.mubr.bf16.gmra.mrb[24].mxu0 %v503_v28 }
 0x111   :  { %v611_v21 = vpack.c.bf16 %v3896_v23, %v3904_v58  ;;  %v3921_v31 = vsel %vm672_vm5, %v5275_v46, %v661_v60  ;;  %v5247_v33 = vrot.slane %v3635_v53, 6  ;;  %v5276_v35 = vunpack.c.h.s8.bf16 %v3574_v8  ;;  %980 = vmatprep.mubr.bf16.mxu0 %v541_v41 }
 0x112   :  { %v624_v6 = vrot.slane %v3630_v49, 6  ;;  %v625_v22 = vrot.slane %v3654_v55, 6  ;;  %v589_v34 = vrot.slane %v3649_v45, 5  ;;  %v590_v60 = vrot.slane %v3682_v54, 5  ;;  %892 = vmatmul.mubr.bf16.gmra.mrb[12].mxu1 %v427_v62  ;;  %v405_v49 = vld [vmem:[#allocation4 + $0x108] sm:$0xff] }
 0x113   :  { %2843 = vmatpush3.bf16.msra.mxu1 %v5276_v35  ;;  %v5277_v40 = vunpack.c.l.s8.bf16 %v3604_v26  ;;  %v5278_v47 = vunpack.c.h.s8.bf16 %v3602_v25  ;;  %v3940_v4 = vsel %vm561_vm6, %v550_v42, %v551_v63  ;;  %v3946_v8 = vsel %vm561_vm6, %v5248_v1, %v550_v42  ;;  %899 = vmatprep.mubr.bf16.mxu1 %v467_v13 }
 0x114   :  { %v663_v17 = vrot.slane %v3649_v45, 7  ;;  %v664_v7 = vrot.slane %v3682_v54, 7  ;;  %v3960_v57 = vsel %vm635_vm7, %v624_v6, %v625_v22  ;;  %v3966_v48 = vsel %vm635_vm7, %v5247_v33, %v624_v6 }
 0x115   :  { %2844 = vmatprep.subr.bf16.mxu1 %v5277_v40  ;;  %2895 = vmatpush3.bf16.msra.mxu0 %v5278_v47  ;;  %v552_v46 = vrot.slane %v3649_v45, 4  ;;  %v3973_v43 = vsel %vm598_vm4, %v589_v34, %v590_v60  ;;  %v5279_v16 = vrot.slane %v3654_v55, 5  ;;  %v553_v42 = vrot.slane %v3682_v54, 4 }
 0x116   :  { %v5280_v35 = vunpack.c.l.s8.bf16 %v3606_v27  ;;  %v5281_v13 = vunpack.c.l.s8.bf16 %v3612_v32  ;;  %v3990_v6 = vsel %vm672_vm5, %v663_v17, %v664_v7  ;;  %v3994_v40 = vsel %vm672_vm5, %v662_v56, %v663_v17 }
 0x117   :  { %v3979_v28 = vsel %vm598_vm4, %v5279_v16, %v589_v34  ;;  %v626_v34 = vrot.slane %v3649_v45, 6  ;;  %v5282_v47 = vunpack.c.h.s8.bf16 %v3604_v26  ;;  %v5283_v16 = vunpack.c.l.s8.bf16 %v3618_v38 }
 0x118   :  { %2845 = vmatpush3.bf16.msra.mxu1 %v5280_v35  ;;  %2896 = vmatprep.subr.bf16.mxu0 %v5281_v13  ;;  %v4005_v13 = vsel %vm561_vm6, %v552_v46, %v553_v42  ;;  %v4009_v41 = vsel %vm561_vm6, %v551_v63, %v552_v46  ;;  %v627_v56 = vrot.slane %v3682_v54, 6  ;;  %v5284_v17 = vunpack.c.h.s8.bf16 %v3612_v32 }
 0x119   :  { %2846 = vmatprep.subr.bf16.mxu1 %v5282_v47  ;;  %2897 = vmatpush3.bf16.msra.mxu0 %v5283_v16  ;;  %v4018_v47 = vsel %vm635_vm7, %v625_v22, %v626_v34  ;;  %v591_v16 = vrot.slane %v3676_v37, 5  ;;  %v592_v35 = vrot.slane %v3703_v24, 5  ;;  %v665_v46 = vrot.slane %v3676_v37, 7 }
 0x11a   :  { %2898 = vmatprep.subr.bf16.mxu0 %v5284_v17  ;;  %v4024_v63 = vsel %vm635_vm7, %v626_v34, %v627_v56  ;;  %v666_v32 = vrot.slane %v3703_v24, 7  ;;  %v554_v17 = vrot.slane %v3676_v37, 4  ;;  %v5285_v26 = vunpack.c.h.s8.bf16 %v3606_v27  ;;  %900 = vmatmul.mubr.bf16.gmra.mrb[16].mxu1 %v428_v29 }
 0x11b   :  { %v4035_v62 = vsel %vm598_vm4, %v591_v16, %v592_v35  ;;  %v4039_v34 = vsel %vm598_vm4, %v590_v60, %v591_v16  ;;  %v555_v25 = vrot.slane %v3703_v24, 4  ;;  %v5286_v33 = vunpack.c.h.s8.bf16 %v3618_v38  ;;  %981 = vmatmul.mubr.bf16.gmra.mrb[28].mxu0 %v504_v36  ;;  %907 = vmatprep.mubr.bf16.mxu1 %v468_v61 }
 0x11c   :  { %2847 = vmatpush3.bf16.msra.mxu1 %v5285_v26  ;;  %v5287_v1 = vunpack.c.l.s8.bf16 %v3624_v44  ;;  %v4050_v26 = vsel %vm672_vm5, %v665_v46, %v666_v32  ;;  %v4054_v22 = vsel %vm672_vm5, %v664_v7, %v665_v46  ;;  %v628_v60 = vrot.slane %v3676_v37, 6  ;;  %988 = vmatprep.mubr.bf16.mxu0 %v542_v51 }
 0x11d   :  { %2899 = vmatpush3.bf16.msra.mxu0 %v5286_v33  ;;  %v4071_v33 = vsel %vm561_vm6, %v553_v42, %v554_v17  ;;  %v629_v7 = vrot.slane %v3703_v24, 6  ;;  %v593_v0 = vrot.slane %v3696_v18, 5  ;;  %v594_v36 = vrot.slane %v3729_v10, 5 }
 0x11e   :  { %3230 = vmatprep.subr.bf16.mxu1 %v5287_v1  ;;  %v4067_v1 = vsel %vm561_vm6, %v554_v17, %v555_v25  ;;  %v4084_v5 = vsel %vm635_vm7, %v627_v56, %v628_v60  ;;  %v667_v14 = vrot.slane %v3696_v18, 7  ;;  %v668_v3 = vrot.slane %v3729_v10, 7 }
 0x11f   :  { %v4090_v42 = vsel %vm635_vm7, %v628_v60, %v629_v7  ;;  %v556_v61 = vrot.slane %v3696_v18, 4  ;;  %v4099_v12 = vsel %vm598_vm4, %v593_v0, %v594_v36  ;;  %v4103_v51 = vsel %vm598_vm4, %v592_v35, %v593_v0 }
 0x120   :  { %v557_v56 = vrot.slane %v3729_v10, 4  ;;  %v4110_v46 = vsel %vm672_vm5, %v667_v14, %v668_v3  ;;  %v4114_v17 = vsel %vm672_vm5, %v666_v32, %v667_v14  ;;  %v630_v16 = vrot.slane %v3696_v18, 6 }
 0x121   :  { %v4118_v60 = vsel %vm561_vm6, %v555_v25, %v556_v61  ;;  %v631_v19 = vrot.slane %v3729_v10, 6  ;;  %v595_v32 = vrot.slane %v3723_v9, 5  ;;  %v596_v14 = vrot.slane %v3757_v15, 5 }
 0x122   :  { %v4124_v0 = vsel %vm561_vm6, %v556_v61, %v557_v56  ;;  %v669_v25 = vrot.slane %v3723_v9, 7  ;;  %v4139_v61 = vsel %vm635_vm7, %v629_v7, %v630_v16  ;;  %v670_v38 = vrot.slane %v3757_v15, 7  ;;  %908 = vmatmul.mubr.bf16.gmra.mrb[20].mxu1 %v429_v39 }
 0x123   :  { %v4135_v35 = vsel %vm635_vm7, %v630_v16, %v631_v19  ;;  %v558_v27 = vrot.slane %v3723_v9, 4  ;;  %989 = vmatmul.mubr.bf16.gmra.mrb[32].mxu0 %v505_v30  ;;  %v4153_v20 = vsel %vm598_vm4, %v595_v32, %v596_v14  ;;  %v4157_v7 = vsel %vm598_vm4, %v594_v36, %v595_v32  ;;  %1029 = vmatprep.mubr.bf16.mxu1 %v611_v21 }
 0x124   :  { %v559_v16 = vrot.slane %v3757_v15, 4  ;;  %v5288_v39 = vpack.c.bf16 %v3915_v50, %v3921_v31  ;;  %v4170_v59 = vsel %vm672_vm5, %v669_v25, %v670_v38  ;;  %v4174_v30 = vsel %vm672_vm5, %v668_v3, %v669_v25 }
 0x125   :  { %v632_v36 = vrot.slane %v3723_v9, 6  ;;  %v4185_v21 = vsel %vm561_vm6, %v557_v56, %v558_v27  ;;  %v633_v50 = vrot.slane %v3757_v15, 6  ;;  %v597_v32 = vrot.slane %v3751_v11, 5 }
 0x126   :  { %1110 = vmatprep.mubr.bf16.mxu0 %v5288_v39  ;;  %v4181_v58 = vsel %vm561_vm6, %v558_v27, %v559_v16  ;;  %5290 = vst [vmem:[#allocation10_spill] sm:$0xff] %v4185_v21  ;;  %v671_v25 = vrot.slane %v3751_v11, 7  ;;  %v560_v27 = vrot.slane %v3751_v11, 4  ;;  %v634_v56 = vrot.slane %v3751_v11, 6 }
 0x127   :  { %5289 = vst [vmem:[#allocation9_spill] sm:$0xff] %v4181_v58  ;;  %v4192_v3 = vsel %vm635_vm7, %v631_v19, %v632_v36  ;;  %v4198_v39 = vsel %vm635_vm7, %v632_v36, %v633_v50  ;;  %v599_v19 = vsel %vm598_vm4, %v596_v14, %v597_v32  ;;  %v5291_v52 = vrot.slane %v3635_v53, 5 }
 0x128   :  { %v652_v31 = vpack.c.bf16 %v4198_v39, %v4192_v3  ;;  %v673_v36 = vsel %vm672_vm5, %v670_v38, %v671_v25  ;;  %v5292_v58 = vrot.slane %v3635_v53, 7  ;;  %v562_v3 = vsel %vm561_vm6, %v559_v16, %v560_v27 }
 0x129   :  { %v610_v29 = vsel %vm598_vm4, %v597_v32, %v5291_v52  ;;  %v5293_v39 = vrot.slane %v3635_v53, 4  ;;  %v636_v38 = vsel %vm635_vm7, %v633_v50, %v634_v56  ;;  %v5296_v16 = vpack.c.bf16 %v3960_v57, %v3966_v48 }
 0x12a   :  { %v616_v21 = vpack.c.bf16 %v610_v29, %v599_v19  ;;  %v684_v23 = vsel %vm672_vm5, %v671_v25, %v5292_v58  ;;  %v5294_v29 = vrot.slane %v3635_v53, 6  ;;  %v5295_v58 = vpack.c.bf16 %v3940_v4, %v3946_v8 }
 0x12b   :  { %v573_v14 = vsel %vm561_vm6, %v560_v27, %v5293_v39  ;;  %v690_v55 = vpack.c.bf16 %v684_v23, %v673_v36  ;;  %1111 = vmatmul.mubr.bf16.vlgmr.msra.gmra.mrb[36].mxu0 %v5296_v16  ;;  %v698_v23 = vpack.c.bf16 %v3682_v54, %v3649_v45  ;;  %v699_v50 = vpack.c.bf16 %v3703_v24, %v3676_v37 }
 0x12c   :  { %v579_v52 = vpack.c.bf16 %v573_v14, %v562_v3  ;;  %v647_v32 = vsel %vm635_vm7, %v634_v56, %v5294_v29  ;;  %1030 = vmatmul.mubr.bf16.vlgmr.msra.gmra.mrb[24].mxu1 %v5295_v58  ;;  %v5297_v27 = vunpack.c.l.s8.bf16 %v3624_v44  ;;  %v5298_v56 = vpack.c.bf16 %v3973_v43, %v3979_v28  ;;  %v1301_v3 = vld [vmem:[#allocation4 + $0x150] sm:$0xff]  ;;  %v1320_v58 = vld [vmem:[#allocation4 + $0x168] sm:$0xff] }
 0x12d   :  { %v653_v25 = vpack.c.bf16 %v647_v32, %v636_v38  ;;  %v700_v4 = vpack.c.bf16 %v3729_v10, %v3696_v18  ;;  %v701_v8 = vpack.c.bf16 %v3757_v15, %v3723_v9  ;;  %v702_v57 = vpack.c.bf16 %v3635_v53, %v3751_v11  ;;  %v406_v9 = vld [vmem:[#allocation4 + $0x110] sm:$0xff]  ;;  %v1340_v38 = vld [vmem:[#allocation4 + $0x188] sm:$0xff] }
 0x12e   :  { %3231 = vmatpush3.bf16.msra.mxu1 %v5297_v27  ;;  %1037 = vmatprep.mubr.bf16.mxu1 %v5298_v56  ;;  %v5299_v45 = vpack.c.bf16 %v3990_v6, %v3994_v40  ;;  %v5300_v37 = vunpack.c.h.s8.bf16 %v3624_v44  ;;  %v410_v54 = vunpack.c.l.s8.bf16 %v405_v49  ;;  %v411_v48 = vunpack.c.h.s8.bf16 %v405_v49  ;;  %v1341_v56 = vld [vmem:[#allocation4 + $0x190] sm:$0xff] }
 0x12f   :  { %v5302_v18 = vpack.c.bf16 %v4005_v13, %v4009_v41  ;;  %v5303_v53 = vpack.c.bf16 %v4024_v63, %v4018_v47  ;;  %v5304_v10 = vpack.c.bf16 %v4035_v62, %v4039_v34  ;;  %v5305_v11 = vpack.c.bf16 %v4050_v26, %v4054_v22  ;;  %v407_v62 = vld [vmem:[#allocation4 + $0x118] sm:$0xff]  ;;  %v5314_v34 = vld [vmem:[#allocation9_spill] sm:$0xff] }
 0x130   :  { %1118 = vmatprep.mubr.bf16.mxu0 %v5299_v45  ;;  %3232 = vmatprep.subr.bf16.mxu1 %v5300_v37  ;;  %v5301_v24 = vmov %v5300_v37  ;;  %v412_v44 = vunpack.c.l.s8.bf16 %v406_v9  ;;  %v413_v49 = vunpack.c.h.s8.bf16 %v406_v9  ;;  %v5306_v15 = vpack.c.bf16 %v4067_v1, %v4071_v33  ;;  %v5315_v26 = vld [vmem:[#allocation10_spill] sm:$0xff]  ;;  %v5317_v33 = vld [vmem:[#allocation8_spill] sm:$0xff] }
 0x131   :  { %v5307_v43 = vpack.c.bf16 %v4090_v42, %v4084_v5  ;;  %v5308_v28 = vpack.c.bf16 %v4099_v12, %v4103_v51  ;;  %v5309_v41 = vpack.c.bf16 %v4110_v46, %v4114_v17  ;;  %v414_v6 = vunpack.c.l.s8.bf16 %v407_v62  ;;  %v5318_v5 = vld [vmem:[#allocation7_spill] sm:$0xff]  ;;  %v1302_v45 = vld [vmem:[#allocation4 + $0x158] sm:$0xff] }
 0x132   :  { %3233 = vmatpush3.bf16.msra.mxu1 %v5301_v24  ;;  %v415_v40 = vunpack.c.h.s8.bf16 %v407_v62  ;;  %v5310_v13 = vpack.c.bf16 %v4124_v0, %v4118_v60  ;;  %v5311_v47 = vpack.c.bf16 %v4135_v35, %v4139_v61  ;;  %v5312_v63 = vpack.c.bf16 %v4153_v20, %v4157_v7  ;;  %v1299_v42 = vld [vmem:[#allocation4 + $0x140] sm:$0xff]  ;;  %v1280_v35 = vld [vmem:[#allocation4 + $0x128] sm:$0xff]  ;;  %v1282_v37 = vld [vmem:[#allocation4 + $0x138] sm:$0xff] }
 0x133   :  { %3234 = vmatprep.subr.bf16.mxu1 %v410_v54  ;;  %1119 = vmatmul.mubr.bf16.gmra.mrb[40].mxu0 %v5303_v53  ;;  %v5313_v22 = vpack.c.bf16 %v4170_v59, %v4174_v30  ;;  %v5316_v1 = vpack.c.bf16 %v5314_v34, %v5315_v26  ;;  %v5319_v20 = vpack.c.bf16 %v5317_v33, %v5318_v5  ;;  %v1303_v12 = vunpack.c.l.s8.bf16 %v1299_v42  ;;  %v1279_v51 = vld [vmem:[#allocation4 + $0x120] sm:$0xff]  ;;  %v1342_v53 = vld [vmem:[#allocation4 + $0x198] sm:$0xff] }
 0x134   :  { %1038 = vmatmul.mubr.bf16.gmra.mrb[28].mxu1 %v5302_v18  ;;  %1126 = vmatprep.mubr.bf16.mxu0 %v5305_v11  ;;  %v1283_v46 = vunpack.c.l.s8.bf16 %v1279_v51  ;;  %v1304_v17 = vunpack.c.h.s8.bf16 %v1299_v42  ;;  %v1284_v60 = vunpack.c.h.s8.bf16 %v1279_v51  ;;  %v1285_v61 = vunpack.c.l.s8.bf16 %v1280_v35  ;;  %v1339_v7 = vld [vmem:[#allocation4 + $0x180] sm:$0xff]  ;;  %v1322_v11 = vld [vmem:[#allocation4 + $0x178] sm:$0xff] }
 0x135   :  { %1045 = vmatprep.mubr.bf16.mxu1 %v5304_v10  ;;  %2950 = vmatprep.subr.bf16.mxu0 %v1303_v12  ;;  %v1343_v59 = vunpack.c.l.s8.bf16 %v1339_v7  ;;  %v1344_v36 = vunpack.c.h.s8.bf16 %v1339_v7  ;;  %v1307_v14 = vunpack.c.l.s8.bf16 %v1301_v3  ;;  %v1345_v32 = vunpack.c.l.s8.bf16 %v1340_v38  ;;  %v4300_v62 = vld [vmem:[#allocation4 + $0x1c0] sm:$0xff] }
 0x136   :  { %3235 = vmatpush3.bf16.msra.mxu1 %v410_v54  ;;  %2951 = vmatpush3.bf16.msra.mxu0 %v1283_v46  ;;  %v1325_v16 = vunpack.c.l.s8.bf16 %v1320_v58  ;;  %v1326_v27 = vunpack.c.h.s8.bf16 %v1320_v58  ;;  %v1348_v54 = vunpack.c.h.s8.bf16 %v1341_v56  ;;  %v1309_v24 = vunpack.c.l.s8.bf16 %v1302_v45  ;;  %v4303_v26 = vld [vmem:[#allocation4 + $0x200] sm:$0xff] }
 0x137   :  { %3236 = vmatprep.subr.bf16.mxu1 %v411_v48  ;;  %2952 = vmatprep.subr.bf16.mxu0 %v1304_v17  ;;  %v1349_v9 = vunpack.c.l.s8.bf16 %v1342_v53  ;;  %v1310_v10 = vunpack.c.h.s8.bf16 %v1302_v45  ;;  %v1423_v5 = vunpack.c.l.s8.bf16 %v4303_v26 }
 0x13a   :  { %3237 = vmatpush3.bf16.msra.mxu1 %v411_v48  ;;  %2953 = vmatpush3.bf16.msra.mxu0 %v1284_v60  ;;  %v1289_v48 = vunpack.c.l.s8.bf16 %v1282_v37 }
 0x13b   :  { %3238 = vmatprep.subr.bf16.mxu1 %v412_v44  ;;  %1127 = vmatmul.mubr.bf16.gmra.mrb[44].mxu0 %v5307_v43  ;;  %v1330_v43 = vunpack.c.h.s8.bf16 %v1322_v11 }
 0x13c   :  { %1046 = vmatmul.mubr.bf16.gmra.mrb[32].mxu1 %v5306_v15  ;;  %1134 = vmatprep.mubr.bf16.mxu0 %v5309_v41  ;;  %v1350_v15 = vunpack.c.h.s8.bf16 %v1342_v53 }
 0x13d   :  { %1053 = vmatprep.mubr.bf16.mxu1 %v5308_v28  ;;  %v1383_v28 = vunpack.c.l.s8.bf16 %v4300_v62 }
 0x13e   :  { %3239 = vmatpush3.bf16.msra.mxu1 %v412_v44  ;;  %v1329_v44 = vunpack.c.l.s8.bf16 %v1322_v11 }
 0x13f   :  { %3240 = vmatprep.subr.bf16.mxu1 %v413_v49 }
 0x142   :  { %3241 = vmatpush3.bf16.msra.mxu1 %v413_v49  ;;  %v1290_v49 = vunpack.c.h.s8.bf16 %v1282_v37 }
 0x143   :  { %3242 = vmatprep.subr.bf16.mxu1 %v414_v6  ;;  %1135 = vmatmul.mubr.bf16.gmra.mrb[48].mxu0 %v5311_v47 }
 0x144   :  { %1054 = vmatmul.mubr.bf16.gmra.mrb[36].mxu1 %v5310_v13  ;;  %1142 = vmatprep.mubr.bf16.mxu0 %v5313_v22 }
 0x145   :  { %1061 = vmatprep.mubr.bf16.mxu1 %v5312_v63 }
 0x146   :  { %3243 = vmatpush3.bf16.msra.mxu1 %v414_v6 }
 0x147   :  { %3244 = vmatprep.subr.bf16.mxu1 %v415_v40 }
 0x14a   :  { %3245 = vmatpush3.bf16.msra.mxu1 %v415_v40 }
 0x14b   :  { %1143 = vmatmul.mubr.bf16.gmra.mrb[52].mxu0 %v652_v31  ;;  %3002 = vmatprep.subr.bf16.mxu1 %v1343_v59  ;;  %v1286_v31 = vunpack.c.h.s8.bf16 %v1280_v35 }
 0x14c   :  { %1062 = vmatmul.mubr.bf16.gmra.mrb[40].mxu1 %v5316_v1  ;;  %1150 = vmatprep.mubr.bf16.mxu0 %v690_v55  ;;  %v1300_v55 = vld [vmem:[#allocation4 + $0x148] sm:$0xff] }
 0x14d   :  { %1069 = vmatprep.mubr.bf16.mxu1 %v616_v21  ;;  %v1305_v0 = vunpack.c.l.s8.bf16 %v1300_v55  ;;  %v1306_v30 = vunpack.c.h.s8.bf16 %v1300_v55  ;;  %v1319_v21 = vld [vmem:[#allocation4 + $0x160] sm:$0xff] }
 0x14e   :  { %v1323_v19 = vunpack.c.l.s8.bf16 %v1319_v21  ;;  %v1324_v39 = vunpack.c.h.s8.bf16 %v1319_v21 }
 0x14f   :  { %2954 = vmatprep.subr.bf16.mxu0 %v1305_v0 }
 0x150   :  { %2955 = vmatpush3.bf16.msra.mxu0 %v1285_v61 }
 0x151   :  { %2956 = vmatprep.subr.bf16.mxu0 %v1306_v30 }
 0x153   :  { %1151 = vmatmul.mubr.bf16.gmra.mrb[56].mxu0 %v653_v25  ;;  %v1346_v25 = vunpack.c.h.s8.bf16 %v1340_v38 }
 0x154   :  { %1070 = vmatmul.mubr.bf16.gmra.mrb[44].mxu1 %v579_v52  ;;  %2957 = vmatpush3.bf16.msra.mxu0 %v1286_v31  ;;  %v1281_v52 = vld [vmem:[#allocation4 + $0x130] sm:$0xff] }
 0x155   :  { %3246 = vmatprep.mubr.bf16.mxu1 %v5319_v20  ;;  %2958 = vmatprep.subr.bf16.mxu0 %v1307_v14  ;;  %v1287_v29 = vunpack.c.l.s8.bf16 %v1281_v52 }
 0x158   :  { %2959 = vmatpush3.bf16.msra.mxu0 %v1287_v29 }
 0x15c   :  { %3247 = vmatmul.mubr.bf16.vlgmr.msra.gmra.mrb[48].mxu1 %v698_v23  ;;  %v1308_v23 = vunpack.c.h.s8.bf16 %v1301_v3 }
 0x15d   :  { %3250 = vmatprep.mubr.bf16.mxu1 %v699_v50  ;;  %3003 = vmatpush3.bf16.msra.mxu1 %v1323_v19  ;;  %v1288_v50 = vunpack.c.h.s8.bf16 %v1281_v52 }
 0x15e   :  { %3004 = vmatprep.subr.bf16.mxu1 %v1344_v36  ;;  %2960 = vmatprep.subr.bf16.mxu0 %v1308_v23 }
 0x15f   :  { %2961 = vmatpush3.bf16.msra.mxu0 %v1288_v50 }
 0x160   :  { %2962 = vmatprep.subr.bf16.mxu0 %v1309_v24 }
 0x161   :  { %3005 = vmatpush3.bf16.msra.mxu1 %v1324_v39 }
 0x162   :  { %3006 = vmatprep.subr.bf16.mxu1 %v1345_v32 }
 0x163   :  { %2963 = vmatpush3.bf16.msra.mxu0 %v1289_v48 }
 0x164   :  { %3251 = vmatmul.mubr.bf16.gmra.mrb[52].mxu1 %v700_v4  ;;  %v1347_v4 = vunpack.c.l.s8.bf16 %v1341_v56  ;;  %2964 = vmatprep.subr.bf16.mxu0 %v1310_v10 }
 0x165   :  { %3254 = vmatprep.mubr.bf16.mxu1 %v701_v8  ;;  %3007 = vmatpush3.bf16.msra.mxu1 %v1325_v16  ;;  %v1321_v8 = vld [vmem:[#allocation4 + $0x170] sm:$0xff] }
 0x166   :  { %3008 = vmatprep.subr.bf16.mxu1 %v1346_v25  ;;  %v1328_v18 = vunpack.c.h.s8.bf16 %v1321_v8 }
 0x167   :  { %2965 = vmatpush3.bf16.msra.mxu0 %v1290_v49 }
 0x168   :  { %3054 = vmatprep.subr.bf16.mxu0 %v1383_v28 }
 0x169   :  { %3009 = vmatpush3.bf16.msra.mxu1 %v1326_v27 }
 0x16a   :  { %3010 = vmatprep.subr.bf16.mxu1 %v1347_v4 }
 0x16c   :  { %3255 = vmatmul.mubr.bf16.gmra.mrb[56].mxu1 %v702_v57  ;;  %v1327_v57 = vunpack.c.l.s8.bf16 %v1321_v8 }
 0x16e   :  { %3011 = vmatpush3.bf16.msra.mxu1 %v1327_v57 }
 0x16f   :  { %3012 = vmatprep.subr.bf16.mxu1 %v1348_v54 }
 0x172   :  { %3013 = vmatpush3.bf16.msra.mxu1 %v1328_v18 }
 0x173   :  { %3014 = vmatprep.subr.bf16.mxu1 %v1349_v9 }
 0x176   :  { %3015 = vmatpush3.bf16.msra.mxu1 %v1329_v44 }
 0x177   :  { %3016 = vmatprep.subr.bf16.mxu1 %v1350_v15 }
 0x17a   :  { %3017 = vmatpush3.bf16.msra.mxu1 %v1330_v43 }
 0x17b   :  { %3106 = vmatprep.subr.bf16.mxu1 %v1423_v5 }
 0x1cb   :  { %v2744_v41 = vpop.f32.mrb[0].mxu1  ;;  %v2796_v6 = vpop.f32.mrb[12].mxu0 }
 0x1cc   :  { %v2745_v40 = vpop.f32.mrb[1].mxu1  ;;  %v2797_v13 = vpop.f32.mrb[13].mxu0 }
 0x1cd   :  { %v2746_v47 = vadd.f32 %v2745_v40, %v2744_v41  ;;  %v2798_v63 = vadd.f32 %v2797_v13, %v2796_v6  ;;  %v2747_v22 = vpop.f32.mrb[2].mxu1  ;;  %v2799_v34 = vpop.f32.mrb[14].mxu0 }
 0x1ce   :  { %v2748_v1 = vpop.f32.mrb[3].mxu1  ;;  %v2800_v33 = vpop.f32.mrb[15].mxu0 }
 0x1cf   :  { %v4306_v20 = vadd.f32 %v2798_v63, %v2746_v47  ;;  %v2749_v42 = vadd.f32 %v2748_v1, %v2747_v22  ;;  %v2801_v12 = vadd.f32 %v2800_v33, %v2799_v34 }
 0x1d1   :  { %v4308_v51 = vadd.f32 %v2801_v12, %v2749_v42 }
 0x1d3   :  { %v2750_v46 = vpop.f32.mrb[4].mxu1  ;;  %v2802_v17 = vpop.f32.mrb[16].mxu0 }
 0x1d4   :  { %v2751_v60 = vpop.f32.mrb[5].mxu1  ;;  %v2803_v55 = vpop.f32.mrb[17].mxu0 }
 0x1d5   :  { %v2752_v35 = vadd.f32 %v2751_v60, %v2750_v46  ;;  %v2804_v0 = vadd.f32 %v2803_v55, %v2802_v17  ;;  %v2753_v61 = vpop.f32.mrb[6].mxu1  ;;  %v2805_v7 = vpop.f32.mrb[18].mxu0 }
 0x1d6   :  { %v2754_v59 = vpop.f32.mrb[7].mxu1  ;;  %v2806_v30 = vpop.f32.mrb[19].mxu0 }
 0x1d7   :  { %v4310_v21 = vadd.f32 %v2804_v0, %v2752_v35  ;;  %v2755_v31 = vadd.f32 %v2754_v59, %v2753_v61  ;;  %v2807_v19 = vadd.f32 %v2806_v30, %v2805_v7 }
 0x1d9   :  { %v4312_v36 = vadd.f32 %v2807_v19, %v2755_v31 }
 0x1db   :  { %v2808_v39 = vpop.f32.mrb[20].mxu0 }
 0x1dc   :  { %v2809_v52 = vpop.f32.mrb[21].mxu0 }
 0x1dd   :  { %v2756_v3 = vpop.f32.mrb[8].mxu1  ;;  %v2810_v29 = vadd.f32 %v2809_v52, %v2808_v39  ;;  %v2811_v58 = vpop.f32.mrb[22].mxu0 }
 0x1de   :  { %v2757_v14 = vpop.f32.mrb[9].mxu1  ;;  %v2812_v25 = vpop.f32.mrb[23].mxu0 }
 0x1df   :  { %v2758_v38 = vadd.f32 %v2757_v14, %v2756_v3  ;;  %v2759_v32 = vpop.f32.mrb[10].mxu1  ;;  %v2813_v27 = vadd.f32 %v2812_v25, %v2811_v58 }
 0x1e0   :  { %v2760_v16 = vpop.f32.mrb[11].mxu1 }
 0x1e1   :  { %v4314_v23 = vadd.f32 %v2810_v29, %v2758_v38  ;;  %v2761_v50 = vadd.f32 %v2760_v16, %v2759_v32 }
 0x1e3   :  { %v4316_v56 = vadd.f32 %v2813_v27, %v2761_v50  ;;  %v2814_v8 = vpop.f32.mrb[24].mxu0 }
 0x1e4   :  { %v2815_v45 = vpop.f32.mrb[25].mxu0 }
 0x1e5   :  { %v2762_v4 = vpop.f32.mrb[12].mxu1  ;;  %v2816_v54 = vadd.f32 %v2815_v45, %v2814_v8  ;;  %v2817_v48 = vpop.f32.mrb[26].mxu0 }
 0x1e6   :  { %v2763_v57 = vpop.f32.mrb[13].mxu1  ;;  %v2818_v53 = vpop.f32.mrb[27].mxu0 }
 0x1e7   :  { %v2764_v37 = vadd.f32 %v2763_v57, %v2762_v4  ;;  %v2765_v24 = vpop.f32.mrb[14].mxu1  ;;  %v2819_v11 = vadd.f32 %v2818_v53, %v2817_v48 }
 0x1e8   :  { %v2766_v18 = vpop.f32.mrb[15].mxu1 }
 0x1e9   :  { %v4318_v9 = vadd.f32 %v2816_v54, %v2764_v37  ;;  %v2767_v10 = vadd.f32 %v2766_v18, %v2765_v24 }
 0x1eb   :  { %v4320_v44 = vadd.f32 %v2819_v11, %v2767_v10 }
 0x1ed   :  { %v2768_v49 = vpop.f32.mrb[16].mxu1 }
 0x1ee   :  { %v2820_v15 = vpop.f32.mrb[28].mxu0  ;;  %v2769_v43 = vpop.f32.mrb[17].mxu1 }
 0x1ef   :  { %v2821_v28 = vpop.f32.mrb[29].mxu0  ;;  %v2770_v41 = vadd.f32 %v2769_v43, %v2768_v49  ;;  %v2771_v40 = vpop.f32.mrb[18].mxu1 }
 0x1f0   :  { %v2822_v6 = vadd.f32 %v2821_v28, %v2820_v15  ;;  %v2823_v13 = vpop.f32.mrb[30].mxu0  ;;  %v2772_v47 = vpop.f32.mrb[19].mxu1 }
 0x1f1   :  { %v2824_v63 = vpop.f32.mrb[31].mxu0  ;;  %v2773_v34 = vadd.f32 %v2772_v47, %v2771_v40 }
 0x1f2   :  { %v4322_v22 = vadd.f32 %v2822_v6, %v2770_v41  ;;  %v2825_v1 = vadd.f32 %v2824_v63, %v2823_v13 }
 0x1f4   :  { %v4324_v33 = vadd.f32 %v2825_v1, %v2773_v34 }
 0x1f5   :  { %v2774_v5 = vpop.f32.mrb[20].mxu1 }
 0x1f6   :  { %v2826_v42 = vpop.f32.mrb[32].mxu0  ;;  %v2775_v12 = vpop.f32.mrb[21].mxu1 }
 0x1f7   :  { %v2827_v46 = vpop.f32.mrb[33].mxu0  ;;  %v2776_v17 = vadd.f32 %v2775_v12, %v2774_v5  ;;  %v2777_v55 = vpop.f32.mrb[22].mxu1 }
 0x1f8   :  { %v2828_v60 = vadd.f32 %v2827_v46, %v2826_v42  ;;  %v2829_v35 = vpop.f32.mrb[34].mxu0  ;;  %v2778_v0 = vpop.f32.mrb[23].mxu1 }
 0x1f9   :  { %v2830_v61 = vpop.f32.mrb[35].mxu0  ;;  %v2779_v59 = vadd.f32 %v2778_v0, %v2777_v55 }
 0x1fa   :  { %v4326_v7 = vadd.f32 %v2828_v60, %v2776_v17  ;;  %v2831_v30 = vadd.f32 %v2830_v61, %v2829_v35 }
 0x1fc   :  { %v4328_v31 = vadd.f32 %v2831_v30, %v2779_v59 }
 0x1fe   :  { %v2900_v3 = vpop.f32.mrb[36].mxu0 }
 0x1ff   :  { %v2848_v19 = vpop.f32.mrb[24].mxu1  ;;  %v2901_v14 = vpop.f32.mrb[37].mxu0 }
 0x200   :  { %v2849_v39 = vpop.f32.mrb[25].mxu1  ;;  %v2902_v38 = vadd.f32 %v2901_v14, %v2900_v3  ;;  %v2903_v32 = vpop.f32.mrb[38].mxu0 }
 0x201   :  { %v2850_v52 = vadd.f32 %v2849_v39, %v2848_v19  ;;  %v2851_v29 = vpop.f32.mrb[26].mxu1  ;;  %v2904_v16 = vpop.f32.mrb[39].mxu0 }
 0x202   :  { %v2852_v58 = vpop.f32.mrb[27].mxu1  ;;  %v2905_v27 = vadd.f32 %v2904_v16, %v2903_v32 }
 0x203   :  { %v1032_v25 = vadd.f32 %v2850_v52, %v4306_v20  ;;  %v2853_v50 = vadd.f32 %v2852_v58, %v2851_v29 }
 0x205   :  { %v1035_v4 = vadd.f32 %v2853_v50, %v4308_v51  ;;  %v4332_v8 = vadd.f32 %v2902_v38, %v1032_v25 }
 0x206   :  { %v2906_v45 = vpop.f32.mrb[40].mxu0 }
 0x207   :  { %v2854_v57 = vpop.f32.mrb[28].mxu1  ;;  %v4334_v37 = vadd.f32 %v2905_v27, %v1035_v4  ;;  %v2907_v24 = vpop.f32.mrb[41].mxu0 }
 0x208   :  { %v2855_v54 = vpop.f32.mrb[29].mxu1  ;;  %v2908_v18 = vadd.f32 %v2907_v24, %v2906_v45  ;;  %v2909_v10 = vpop.f32.mrb[42].mxu0 }
 0x209   :  { %v2856_v48 = vadd.f32 %v2855_v54, %v2854_v57  ;;  %v2857_v53 = vpop.f32.mrb[30].mxu1  ;;  %v2910_v49 = vpop.f32.mrb[43].mxu0 }
 0x20a   :  { %v2858_v11 = vpop.f32.mrb[31].mxu1  ;;  %v2911_v43 = vadd.f32 %v2910_v49, %v2909_v10 }
 0x20b   :  { %v1040_v20 = vadd.f32 %v2856_v48, %v4310_v21  ;;  %v2859_v15 = vadd.f32 %v2858_v11, %v2857_v53 }
 0x20d   :  { %v1043_v51 = vadd.f32 %v2859_v15, %v4312_v36  ;;  %v4338_v28 = vadd.f32 %v2908_v18, %v1040_v20  ;;  %v4358_v20 = vld [vmem:[#allocation4 + $0x1a0] sm:$0xff] }
 0x20e   :  { %v2912_v6 = vpop.f32.mrb[44].mxu0 }
 0x20f   :  { %v2860_v41 = vpop.f32.mrb[32].mxu1  ;;  %v4340_v40 = vadd.f32 %v2911_v43, %v1043_v51  ;;  %v2913_v47 = vpop.f32.mrb[45].mxu0  ;;  %v4362_v43 = vld [vmem:[#allocation4 + $0x1c8] sm:$0xff] }
 0x210   :  { %v2861_v13 = vpop.f32.mrb[33].mxu1  ;;  %v2914_v34 = vadd.f32 %v2913_v47, %v2912_v6  ;;  %v2915_v5 = vpop.f32.mrb[46].mxu0  ;;  %v4364_v6 = vld [vmem:[#allocation4 + $0x1a8] sm:$0xff] }
 0x211   :  { %v2862_v63 = vadd.f32 %v2861_v13, %v2860_v41  ;;  %v2863_v1 = vpop.f32.mrb[34].mxu1  ;;  %v2916_v12 = vpop.f32.mrb[47].mxu0 }
 0x212   :  { %v2864_v42 = vpop.f32.mrb[35].mxu1  ;;  %v2917_v17 = vadd.f32 %v2916_v12, %v2915_v5  ;;  %v1363_v5 = vunpack.c.l.s8.bf16 %v4358_v20  ;;  %v1364_v12 = vunpack.c.h.s8.bf16 %v4358_v20 }
 0x213   :  { %v1048_v21 = vadd.f32 %v2862_v63, %v4314_v23  ;;  %v2865_v46 = vadd.f32 %v2864_v42, %v2863_v1  ;;  %v1384_v42 = vunpack.c.h.s8.bf16 %v4300_v62 }
 0x215   :  { %v1051_v36 = vadd.f32 %v2865_v46, %v4316_v56  ;;  %v4344_v60 = vadd.f32 %v2914_v34, %v1048_v21  ;;  %v4366_v34 = vld [vmem:[#allocation4 + $0x1e0] sm:$0xff]  ;;  %v1385_v21 = vunpack.c.l.s8.bf16 %v4362_v43  ;;  %v4372_v46 = vld [vmem:[#allocation4 + $0x1d0] sm:$0xff] }
 0x216   :  { %v2918_v35 = vpop.f32.mrb[48].mxu0 }
 0x217   :  { %v2866_v55 = vpop.f32.mrb[36].mxu1  ;;  %v4346_v0 = vadd.f32 %v2917_v17, %v1051_v36  ;;  %v2919_v59 = vpop.f32.mrb[49].mxu0 }
 0x218   :  { %v2867_v61 = vpop.f32.mrb[37].mxu1  ;;  %v2920_v19 = vadd.f32 %v2919_v59, %v2918_v35  ;;  %v2921_v39 = vpop.f32.mrb[50].mxu0  ;;  %v1365_v35 = vunpack.c.l.s8.bf16 %v4364_v6  ;;  %v4378_v59 = vld [vmem:[#allocation4 + $0x208] sm:$0xff] }
 0x219   :  { %v2868_v30 = vadd.f32 %v2867_v61, %v2866_v55  ;;  %v2869_v3 = vpop.f32.mrb[38].mxu1  ;;  %v2922_v52 = vpop.f32.mrb[51].mxu0  ;;  %v4376_v61 = vld [vmem:[#allocation4 + $0x1b0] sm:$0xff] }
 0x21a   :  { %v2870_v14 = vpop.f32.mrb[39].mxu1  ;;  %v2923_v29 = vadd.f32 %v2922_v52, %v2921_v39  ;;  %v1424_v39 = vunpack.c.h.s8.bf16 %v4303_v26 }
 0x21b   :  { %v1056_v23 = vadd.f32 %v2868_v30, %v4318_v9  ;;  %v2871_v38 = vadd.f32 %v2870_v14, %v2869_v3  ;;  %v4384_v14 = vld [vmem:[#allocation4 + $0x1e8] sm:$0xff] }
 0x21d   :  { %v1059_v56 = vadd.f32 %v2871_v38, %v4320_v44  ;;  %v4350_v32 = vadd.f32 %v2920_v19, %v1056_v23  ;;  %v1403_v19 = vunpack.c.l.s8.bf16 %v4366_v34  ;;  %v1404_v23 = vunpack.c.h.s8.bf16 %v4366_v34 }
 0x21e   :  { %v2924_v16 = vpop.f32.mrb[52].mxu0 }
 0x21f   :  { %v2872_v58 = vpop.f32.mrb[40].mxu1  ;;  %v4352_v25 = vadd.f32 %v2923_v29, %v1059_v56  ;;  %v2925_v27 = vpop.f32.mrb[53].mxu0  ;;  %v4391_v29 = vld [vmem:[#allocation4 + $0x210] sm:$0xff] }
 0x220   :  { %v2873_v50 = vpop.f32.mrb[41].mxu1  ;;  %v2926_v57 = vadd.f32 %v2925_v27, %v2924_v16  ;;  %v2927_v54 = vpop.f32.mrb[54].mxu0  ;;  %v4393_v56 = vld [vmem:[#allocation4 + $0x1f0] sm:$0xff]  ;;  %v1425_v16 = vunpack.c.l.s8.bf16 %v4378_v59 }
 0x221   :  { %v2874_v4 = vadd.f32 %v2873_v50, %v2872_v58  ;;  %v2875_v45 = vpop.f32.mrb[42].mxu1  ;;  %v2928_v48 = vpop.f32.mrb[55].mxu0 }
 0x222   :  { %v2876_v24 = vpop.f32.mrb[43].mxu1  ;;  %v2929_v53 = vadd.f32 %v2928_v48, %v2927_v54 }
 0x223   :  { %v1064_v9 = vadd.f32 %v2874_v4, %v4322_v22  ;;  %v2877_v18 = vadd.f32 %v2876_v24, %v2875_v45  ;;  %v4399_v4 = vld [vmem:[#allocation4 + $0x1d8] sm:$0xff]  ;;  %v4406_v45 = vld [vmem:[%s5237_s4] ss:$0 sm:$0xff] }
 0x225   :  { %v1067_v44 = vadd.f32 %v2877_v18, %v4324_v33  ;;  %v4356_v10 = vadd.f32 %v2926_v57, %v1064_v9  ;;  %v4413_v18 = vld [vmem:[#allocation4 + $0x218] sm:$0xff] }
 0x226   :  { %v2930_v49 = vpop.f32.mrb[56].mxu0 }
 0x227   :  { %v2878_v11 = vpop.f32.mrb[44].mxu1  ;;  %v4360_v15 = vadd.f32 %v2929_v53, %v1067_v44  ;;  %v2931_v41 = vpop.f32.mrb[57].mxu0 }
 0x228   :  { %v2879_v51 = vpop.f32.mrb[45].mxu1  ;;  %v2932_v22 = vadd.f32 %v2931_v41, %v2930_v49  ;;  %v2933_v63 = vpop.f32.mrb[58].mxu0  ;;  %v4419_v41 = vld [vmem:[#allocation4 + $0x1f8] sm:$0xff] }
 0x229   :  { %v2880_v13 = vadd.f32 %v2879_v51, %v2878_v11  ;;  %v2881_v47 = vpop.f32.mrb[46].mxu1  ;;  %v2934_v1 = vpop.f32.mrb[59].mxu0 }
 0x22a   :  { %v2882_v33 = vpop.f32.mrb[47].mxu1  ;;  %v2935_v55 = vadd.f32 %v2934_v1, %v2933_v63 }
 0x22b   :  { %v1072_v17 = vadd.f32 %v2880_v13, %v4326_v7  ;;  %v2883_v36 = vadd.f32 %v2882_v33, %v2881_v47  ;;  %v4424_v13 = vld [vmem:[%s5238_s5] ss:$0 sm:$0xff] }
 0x22d   :  { %v1075_v7 = vadd.f32 %v2883_v36, %v4328_v31  ;;  %v4387_v52 = vadd.f32 %v2932_v22, %v1072_v17  ;;  %v4401_v31 = vld [vmem:[#allocation4 + $0x1b8] sm:$0xff] }
 0x22f   :  { %v3248_v57 = vpop.f32.mrb[48].mxu1  ;;  %v4408_v54 = vadd.f32 %v2935_v55, %v1075_v7 }
 0x230   :  { %v1202_v53 = vadd.f32 %v3248_v57, %v4338_v28  ;;  %v1193_v44 = vpop.f32.mrb[49].mxu1  ;;  %v4434_v57 = vld [vmem:[#allocation4 + $0x220] sm:$0xff] }
 0x231   :  { %v1194_v22 = vadd.f32 %v1193_v44, %v4332_v8  ;;  %v3249_v47 = vpop.f32.mrb[50].mxu1 }
 0x232   :  { %v1249_v1 = vmul.f32 %v4406_v45, %v1202_v53  ;;  %v1205_v17 = vadd.f32 %v3249_v47, %v4340_v40  ;;  %v1196_v36 = vpop.f32.mrb[51].mxu1 }
 0x233   :  { %v1247_v8 = vmul.f32 %v4406_v45, %v1194_v22  ;;  %v1197_v44 = vadd.f32 %v1196_v36, %v4334_v37 }
 0x234   :  { %v4441_v33 = vadd.f32 %v4424_v13, %v1249_v1  ;;  %v1250_v40 = vmul.f32 %v4406_v45, %v1205_v17 }
 0x235   :  { %v4447_v7 = vadd.f32 %v4424_v13, %v1247_v8  ;;  %v1248_v22 = vmul.f32 %v4406_v45, %v1197_v44 }
 0x236   :  { %v4453_v28 = vadd.f32 %v4424_v13, %v1250_v40  ;;  %v1473_v1 = vrot.slane %v4441_v33, 1  ;;  %v1545_v17 = vrot.slane %v4441_v33, 3  ;;  %v1509_v53 = vrot.slane %v4441_v33, 2 }
 0x237   :  { %v4459_v47 = vadd.f32 %v4424_v13, %v1248_v22  ;;  %v3252_v8 = vpop.f32.mrb[52].mxu1  ;;  %v1471_v63 = vrot.slane %v4447_v7, 1  ;;  %v1543_v44 = vrot.slane %v4447_v7, 3  ;;  %v5253_v37 = vrot.slane %v4447_v7, 2 }
 0x238   :  { %v1218_v36 = vadd.f32 %v3252_v8, %v4350_v32  ;;  %v1209_v40 = vpop.f32.mrb[53].mxu1  ;;  %v1474_v55 = vrot.slane %v4453_v28, 1  ;;  %v1546_v51 = vrot.slane %v4453_v28, 3  ;;  %v1460_v9 = vpack.c.bf16 %v4453_v28, %v4441_v33 }
 0x239   :  { %v1210_v22 = vadd.f32 %v1209_v40, %v4344_v60  ;;  %v3253_v49 = vpop.f32.mrb[54].mxu1  ;;  %v1472_v11 = vrot.slane %v4459_v47, 1  ;;  %v1544_v27 = vrot.slane %v4459_v47, 3  ;;  %v1459_v58 = vpack.c.bf16 %v4459_v47, %v4447_v7 }
 0x23a   :  { %v1253_v32 = vmul.f32 %v4406_v45, %v1218_v36  ;;  %v1221_v8 = vadd.f32 %v3253_v49, %v4352_v25  ;;  %v1212_v48 = vpop.f32.mrb[55].mxu1  ;;  %v1508_v38 = vrot.slane %v4459_v47, 2  ;;  %v1491_v3 = vsel %vm450_vm1, %v1473_v1, %v1474_v55 }
 0x23b   :  { %v1251_v60 = vmul.f32 %v4406_v45, %v1210_v22  ;;  %v1213_v40 = vadd.f32 %v1212_v48, %v4346_v0  ;;  %v1492_v50 = vsel %vm450_vm1, %v1472_v11, %v1473_v1  ;;  %v1493_v36 = vsel %vm450_vm1, %v1471_v63, %v1472_v11 }
 0x23c   :  { %v4488_v25 = vadd.f32 %v4424_v13, %v1253_v32  ;;  %v1254_v49 = vmul.f32 %v4406_v45, %v1221_v8  ;;  %v1495_v24 = vpack.c.bf16 %v1492_v50, %v1493_v36  ;;  %v1564_v30 = vsel %vm524_vm2, %v1544_v27, %v1545_v17 }
 0x23d   :  { %v4494_v22 = vadd.f32 %v4424_v13, %v1251_v60  ;;  %v1252_v0 = vmul.f32 %v4406_v45, %v1213_v40  ;;  %v1565_v48 = vsel %vm524_vm2, %v1543_v44, %v1544_v27  ;;  %v1528_v11 = vsel %vm487_vm3, %v1508_v38, %v1509_v53 }
 0x23e   :  { %v4506_v50 = vadd.f32 %v4424_v13, %v1254_v49  ;;  %1893 = vmatprep.mubr.bf16.mxu0 %v1495_v24  ;;  %v1567_v1 = vpack.c.bf16 %v1564_v30, %v1565_v48  ;;  %v1529_v32 = vsel %vm487_vm3, %v5253_v37, %v1508_v38  ;;  %v1563_v8 = vsel %vm524_vm2, %v1545_v17, %v1546_v51 }
 0x23f   :  { %v4515_v27 = vadd.f32 %v4424_v13, %v1252_v0  ;;  %v3256_v60 = vpop.f32.mrb[56].mxu1  ;;  %1894 = vmatmul.mubr.bf16.vlgmr.msra.gmra.mrb[60].mxu0 %v1459_v58  ;;  %v1531_v40 = vpack.c.bf16 %v1528_v11, %v1529_v32  ;;  %v1475_v36 = vrot.slane %v4494_v22, 1  ;;  %v1547_v49 = vrot.slane %v4494_v22, 3 }
 0x240   :  { %1974 = vmatprep.mubr.bf16.mxu1 %v1567_v1  ;;  %v1234_v30 = vadd.f32 %v3256_v60, %v4387_v52  ;;  %3055 = vmatpush3.bf16.msra.mxu0 %v1363_v5  ;;  %v1225_v38 = vpop.f32.mrb[57].mxu1  ;;  %v1510_v24 = vrot.slane %v4453_v28, 2  ;;  %v1511_v17 = vrot.slane %v4494_v22, 2  ;;  %v1477_v0 = vrot.slane %v4488_v25, 1 }
 0x241   :  { %1975 = vmatmul.mubr.bf16.vlgmr.msra.gmra.mrb[60].mxu1 %v1531_v40  ;;  %v1226_v58 = vadd.f32 %v1225_v38, %v4356_v10  ;;  %v3257_v48 = vpop.f32.mrb[58].mxu1  ;;  %v1490_v11 = vsel %vm450_vm1, %v1474_v55, %v1475_v36  ;;  %v1562_v52 = vsel %vm524_vm2, %v1546_v51, %v1547_v49  ;;  %3056 = vmatprep.subr.bf16.mxu0 %v1384_v42  ;;  %v1476_v5 = vrot.slane %v4515_v27, 1 }
 0x242   :  { %v1257_v1 = vmul.f32 %v4406_v45, %v1234_v30  ;;  %v1237_v32 = vadd.f32 %v3257_v48, %v4408_v54  ;;  %v1228_v60 = vpop.f32.mrb[59].mxu1  ;;  %v1496_v40 = vpack.c.bf16 %v1490_v11, %v1491_v3  ;;  %v1568_v37 = vpack.c.bf16 %v1562_v52, %v1563_v8  ;;  %3107 = vmatpush3.bf16.msra.mxu1 %v1403_v19 }
 0x243   :  { %v1255_v10 = vmul.f32 %v4406_v45, %v1226_v58  ;;  %v1229_v55 = vadd.f32 %v1228_v60, %v4360_v15  ;;  %v1526_v62 = vsel %vm487_vm3, %v1510_v24, %v1511_v17  ;;  %v1527_v42 = vsel %vm487_vm3, %v1509_v53, %v1510_v24  ;;  %3108 = vmatprep.subr.bf16.mxu1 %v1424_v39 }
 0x244   :  { %v4548_v3 = vadd.f32 %v4424_v13, %v1257_v1  ;;  %v1258_v19 = vmul.f32 %v4406_v45, %v1237_v32  ;;  %1901 = vmatprep.mubr.bf16.mxu0 %v1496_v40  ;;  %1982 = vmatprep.mubr.bf16.mxu1 %v1568_v37  ;;  %v1532_v54 = vpack.c.bf16 %v1526_v62, %v1527_v42  ;;  %v1548_v15 = vrot.slane %v4515_v27, 3 }
 0x245   :  { %v4553_v51 = vadd.f32 %v4424_v13, %v1255_v10  ;;  %v1256_v8 = vmul.f32 %v4406_v45, %v1229_v55  ;;  %3057 = vmatpush3.bf16.msra.mxu0 %v1364_v12  ;;  %v1488_v26 = vsel %vm450_vm1, %v1476_v5, %v1477_v0  ;;  %v1489_v39 = vsel %vm450_vm1, %v1475_v36, %v1476_v5 }
 0x246   :  { %v4563_v53 = vadd.f32 %v4424_v13, %v1258_v19  ;;  %v1497_v37 = vpack.c.bf16 %v1488_v26, %v1489_v39  ;;  %v1549_v30 = vrot.slane %v4488_v25, 3  ;;  %v1561_v38 = vsel %vm524_vm2, %v1547_v49, %v1548_v15  ;;  %3058 = vmatprep.subr.bf16.mxu0 %v1385_v21  ;;  %3109 = vmatpush3.bf16.msra.mxu1 %v1404_v23 }
 0x247   :  { %v4573_v20 = vadd.f32 %v4424_v13, %v1256_v8  ;;  %1902 = vmatmul.mubr.bf16.gmra.mrb[64].mxu0 %v1460_v9  ;;  %v1461_v12 = vpack.c.bf16 %v4515_v27, %v4494_v22  ;;  %v1512_v45 = vrot.slane %v4515_v27, 2  ;;  %v1513_v36 = vrot.slane %v4488_v25, 2  ;;  %3110 = vmatprep.subr.bf16.mxu1 %v1425_v16 }
 0x248   :  { %1909 = vmatprep.mubr.bf16.mxu0 %v1497_v37  ;;  %v1560_v34 = vsel %vm524_vm2, %v1548_v15, %v1549_v30  ;;  %v1478_v21 = vrot.slane %v4506_v50, 1  ;;  %v1479_v23 = vrot.slane %v4553_v51, 1  ;;  %v1550_v9 = vrot.slane %v4506_v50, 3 }
 0x249   :  { %1983 = vmatmul.mubr.bf16.gmra.mrb[64].mxu1 %v1532_v54  ;;  %v1569_v13 = vpack.c.bf16 %v1560_v34, %v1561_v38  ;;  %3059 = vmatpush3.bf16.msra.mxu0 %v1365_v35  ;;  %v1524_v49 = vsel %vm487_vm3, %v1512_v45, %v1513_v36  ;;  %v1525_v16 = vsel %vm487_vm3, %v1511_v17, %v1512_v45  ;;  %v1551_v24 = vrot.slane %v4553_v51, 3 }
 0x24a   :  { %v1533_v58 = vpack.c.bf16 %v1524_v49, %v1525_v16  ;;  %v1486_v48 = vsel %vm450_vm1, %v1478_v21, %v1479_v23  ;;  %v1487_v11 = vsel %vm450_vm1, %v1477_v0, %v1478_v21  ;;  %v1559_v52 = vsel %vm524_vm2, %v1549_v30, %v1550_v9 }
 0x24b   :  { %v5320_v35 = vunpack.c.h.s8.bf16 %v4362_v43  ;;  %1990 = vmatprep.mubr.bf16.mxu1 %v1569_v13  ;;  %v1498_v5 = vpack.c.bf16 %v1486_v48, %v1487_v11  ;;  %v1558_v17 = vsel %vm524_vm2, %v1550_v9, %v1551_v24  ;;  %v1462_v1 = vpack.c.bf16 %v4506_v50, %v4488_v25 }
 0x24c   :  { %v1514_v32 = vrot.slane %v4506_v50, 2  ;;  %v5321_v60 = vunpack.c.l.s8.bf16 %v4384_v14  ;;  %v1570_v0 = vpack.c.bf16 %v1558_v17, %v1559_v52  ;;  %v1515_v40 = vrot.slane %v4553_v51, 2 }
 0x24d   :  { %3060 = vmatprep.subr.bf16.mxu0 %v5320_v35  ;;  %v1480_v10 = vrot.slane %v4573_v20, 1  ;;  %v1481_v43 = vrot.slane %v4548_v3, 1  ;;  %v5322_v55 = vunpack.c.h.s8.bf16 %v4378_v59  ;;  %v5323_v62 = vunpack.c.h.s8.bf16 %v4364_v6 }
 0x24e   :  { %3111 = vmatpush3.bf16.msra.mxu1 %v5321_v60  ;;  %v4620_v42 = vsel %vm487_vm3, %v1513_v36, %v1514_v32  ;;  %v1552_v19 = vrot.slane %v4573_v20, 3  ;;  %v1553_v54 = vrot.slane %v4548_v3, 3  ;;  %v1463_v15 = vpack.c.bf16 %v4573_v20, %v4553_v51 }
 0x24f   :  { %3112 = vmatprep.subr.bf16.mxu1 %v5322_v55  ;;  %3061 = vmatpush3.bf16.msra.mxu0 %v5323_v62  ;;  %v5324_v8 = vunpack.c.l.s8.bf16 %v4372_v46  ;;  %v1522_v59 = vsel %vm487_vm3, %v1514_v32, %v1515_v40  ;;  %v1484_v6 = vsel %vm450_vm1, %v1480_v10, %v1481_v43  ;;  %v1485_v26 = vsel %vm450_vm1, %v1479_v23, %v1480_v10 }
 0x250   :  { %v1516_v39 = vrot.slane %v4573_v20, 2  ;;  %1910 = vmatmul.mubr.bf16.gmra.mrb[68].mxu0 %v1461_v12  ;;  %v1534_v37 = vpack.c.bf16 %v1522_v59, %v4620_v42  ;;  %v1499_v30 = vpack.c.bf16 %v1484_v6, %v1485_v26  ;;  %v1556_v38 = vsel %vm524_vm2, %v1552_v19, %v1553_v54 }
 0x251   :  { %3062 = vmatprep.subr.bf16.mxu0 %v5324_v8  ;;  %v1557_v45 = vsel %vm524_vm2, %v1551_v24, %v1552_v19  ;;  %1917 = vmatprep.mubr.bf16.mxu0 %v1498_v5  ;;  %v5325_v34 = vunpack.c.h.s8.bf16 %v4384_v14  ;;  %v1517_v21 = vrot.slane %v4548_v3, 2  ;;  %v1482_v12 = vrot.slane %v4563_v53, 1 }
 0x252   :  { %v1571_v36 = vpack.c.bf16 %v1556_v38, %v1557_v45  ;;  %v4645_v23 = vsel %vm487_vm3, %v1515_v40, %v1516_v39  ;;  %1991 = vmatmul.mubr.bf16.gmra.mrb[68].mxu1 %v1533_v58  ;;  %v5326_v9 = vunpack.c.l.s8.bf16 %v4376_v61  ;;  %v1554_v13 = vrot.slane %v4563_v53, 3 }
 0x253   :  { %3113 = vmatpush3.bf16.msra.mxu1 %v5325_v34  ;;  %v1464_v49 = vpack.c.bf16 %v4563_v53, %v4548_v3  ;;  %v1518_v14 = vrot.slane %v4563_v53, 2  ;;  %v5257_v16 = vrot.slane %v4447_v7, 5  ;;  %1998 = vmatprep.mubr.bf16.mxu1 %v1570_v0  ;;  %v5327_v24 = vunpack.c.h.s8.bf16 %v4372_v46 }
 0x254   :  { %3063 = vmatpush3.bf16.msra.mxu0 %v5326_v9  ;;  %v4659_v48 = vsel %vm487_vm3, %v1516_v39, %v1517_v21  ;;  %v4663_v58 = vsel %vm450_vm1, %v1481_v43, %v1482_v12  ;;  %v4669_v11 = vsel %vm450_vm1, %v1482_v12, %v1471_v63  ;;  %v1616_v52 = vrot.slane %v4459_v47, 5 }
 0x255   :  { %3064 = vmatprep.subr.bf16.mxu0 %v5327_v24  ;;  %v1535_v46 = vpack.c.bf16 %v4659_v48, %v4645_v23  ;;  %v5328_v35 = vunpack.c.l.s8.bf16 %v4391_v29  ;;  %v1500_v5 = vpack.c.bf16 %v4669_v11, %v4663_v58  ;;  %v4680_v17 = vsel %vm524_vm2, %v1553_v54, %v1554_v13 }
 0x256   :  { %v4686_v63 = vsel %vm524_vm2, %v1554_v13, %v1543_v44  ;;  %v5329_v60 = vunpack.c.l.s8.bf16 %v4393_v56  ;;  %v4694_v0 = vsel %vm487_vm3, %v1517_v21, %v1518_v14  ;;  %v5330_v40 = vrot.slane %v4447_v7, 2 }
 0x257   :  { %3114 = vmatprep.subr.bf16.mxu1 %v5328_v35  ;;  %v1572_v32 = vpack.c.bf16 %v4686_v63, %v4680_v17  ;;  %v1617_v43 = vrot.slane %v4441_v33, 5  ;;  %v5331_v44 = vunpack.c.h.s8.bf16 %v4376_v61  ;;  %v5332_v55 = vunpack.c.h.s8.bf16 %v4391_v29 }
 0x258   :  { %3115 = vmatpush3.bf16.msra.mxu1 %v5329_v60  ;;  %v4700_v10 = vsel %vm487_vm3, %v1518_v14, %v5330_v40  ;;  %v4713_v42 = vsel %vm598_vm4, %v5257_v16, %v1616_v52  ;;  %v5256_v19 = vrot.slane %v4447_v7, 7  ;;  %v1688_v54 = vrot.slane %v4459_v47, 7  ;;  %1918 = vmatmul.mubr.bf16.gmra.mrb[72].mxu0 %v1462_v1 }
 0x259   :  { %3065 = vmatpush3.bf16.msra.mxu0 %v5331_v44  ;;  %3116 = vmatprep.subr.bf16.mxu1 %v5332_v55  ;;  %v1536_v62 = vpack.c.bf16 %v4700_v10, %v4694_v0  ;;  %v5333_v8 = vunpack.c.l.s8.bf16 %v4399_v4  ;;  %v4721_v61 = vsel %vm598_vm4, %v1616_v52, %v1617_v43  ;;  %v1689_v29 = vrot.slane %v4441_v33, 7 }
 0x25a   :  { %v5255_v59 = vrot.slane %v4447_v7, 4  ;;  %v1580_v6 = vrot.slane %v4459_v47, 4  ;;  %v1639_v26 = vpack.c.bf16 %v4721_v61, %v4713_v42  ;;  %v4732_v39 = vsel %vm672_vm5, %v5256_v19, %v1688_v54  ;;  %1925 = vmatprep.mubr.bf16.mxu0 %v1499_v30  ;;  %1999 = vmatmul.mubr.bf16.gmra.mrb[72].mxu1 %v1534_v37 }
 0x25b   :  { %3066 = vmatprep.subr.bf16.mxu0 %v5333_v8  ;;  %v1581_v38 = vrot.slane %v4441_v33, 4  ;;  %v5254_v45 = vrot.slane %v4447_v7, 6  ;;  %v5334_v34 = vunpack.c.h.s8.bf16 %v4393_v56  ;;  %v4740_v1 = vsel %vm672_vm5, %v1688_v54, %v1689_v29  ;;  %2006 = vmatprep.mubr.bf16.mxu1 %v1571_v36 }
 0x25c   :  { %v4746_v21 = vsel %vm561_vm6, %v5255_v59, %v1580_v6  ;;  %v1652_v12 = vrot.slane %v4459_v47, 6  ;;  %v1653_v9 = vrot.slane %v4441_v33, 6  ;;  %v5335_v30 = vunpack.c.l.s8.bf16 %v4401_v31 }
 0x25d   :  { %3117 = vmatpush3.bf16.msra.mxu1 %v5334_v34  ;;  %v1711_v56 = vpack.c.bf16 %v4740_v1, %v4732_v39  ;;  %v4756_v13 = vsel %vm561_vm6, %v1580_v6, %v1581_v38  ;;  %v1618_v14 = vrot.slane %v4453_v28, 5  ;;  %v1619_v24 = vrot.slane %v4494_v22, 5 }
 0x25e   :  { %3067 = vmatpush3.bf16.msra.mxu0 %v5335_v30  ;;  %v5336_v52 = vunpack.c.l.s8.bf16 %v4413_v18  ;;  %v1603_v37 = vpack.c.bf16 %v4756_v13, %v4746_v21  ;;  %v4766_v35 = vsel %vm635_vm7, %v1652_v12, %v1653_v9  ;;  %v4772_v60 = vsel %vm635_vm7, %v5254_v45, %v1652_v12 }
 0x25f   :  { %v1690_v40 = vrot.slane %v4453_v28, 7  ;;  %v5337_v36 = vunpack.c.h.s8.bf16 %v4399_v4  ;;  %v4781_v55 = vsel %vm598_vm4, %v1618_v14, %v1619_v24  ;;  %v4785_v54 = vsel %vm598_vm4, %v1617_v43, %v1618_v14 }
 0x260   :  { %3118 = vmatprep.subr.bf16.mxu1 %v5336_v52  ;;  %v1691_v8 = vrot.slane %v4494_v22, 7  ;;  %v5338_v6 = vunpack.c.l.s8.bf16 %v4419_v41  ;;  %v1640_v4 = vpack.c.bf16 %v4781_v55, %v4785_v54  ;;  %v1582_v12 = vrot.slane %v4453_v28, 4  ;;  %1926 = vmatmul.mubr.bf16.gmra.mrb[76].mxu0 %v1463_v15 }
 0x261   :  { %3068 = vmatprep.subr.bf16.mxu0 %v5337_v36  ;;  %v4794_v34 = vsel %vm672_vm5, %v1689_v29, %v1690_v40  ;;  %v1583_v30 = vrot.slane %v4494_v22, 4  ;;  %v5339_v52 = vunpack.c.h.s8.bf16 %v4401_v31  ;;  %v5340_v43 = vunpack.c.h.s8.bf16 %v4413_v18  ;;  %1933 = vmatprep.mubr.bf16.mxu0 %v1500_v5 }
 0x262   :  { %3119 = vmatpush3.bf16.msra.mxu1 %v5338_v6  ;;  %v4804_v14 = vsel %vm672_vm5, %v1690_v40, %v1691_v8  ;;  %v1654_v36 = vrot.slane %v4453_v28, 6  ;;  %v1655_v6 = vrot.slane %v4494_v22, 6  ;;  %v1620_v29 = vrot.slane %v4515_v27, 5 }
 0x263   :  { %3069 = vmatpush3.bf16.msra.mxu0 %v5339_v52  ;;  %3120 = vmatprep.subr.bf16.mxu1 %v5340_v43  ;;  %v5341_v45 = vunpack.c.l.s8.bf16 %v4434_v57  ;;  %v4815_v18 = vsel %vm561_vm6, %v1582_v12, %v1583_v30  ;;  %v4819_v40 = vsel %vm561_vm6, %v1581_v38, %v1582_v12  ;;  %v1621_v52 = vrot.slane %v4488_v25, 5 }
 0x264   :  { %v4829_v43 = vsel %vm635_vm7, %v1654_v36, %v1655_v6  ;;  %v4833_v59 = vsel %vm635_vm7, %v1653_v9, %v1654_v36  ;;  %v4837_v38 = vsel %vm598_vm4, %v1619_v24, %v1620_v29  ;;  %v5342_v15 = vunpack.c.h.s8.bf16 %v4419_v41  ;;  %2007 = vmatmul.mubr.bf16.gmra.mrb[76].mxu1 %v1535_v46 }
 0x265   :  { %3258 = vmatprep.subr.bf16.mxu0 %v5341_v45  ;;  %v4848_v45 = vsel %vm598_vm4, %v1620_v29, %v1621_v52  ;;  %v1692_v9 = vrot.slane %v4515_v27, 7  ;;  %v1693_v36 = vrot.slane %v4488_v25, 7  ;;  %v1584_v41 = vrot.slane %v4515_v27, 4  ;;  %2014 = vmatprep.mubr.bf16.mxu1 %v1572_v32 }
 0x266   :  { %3121 = vmatpush3.bf16.msra.mxu1 %v5342_v15  ;;  %v1585_v11 = vrot.slane %v4488_v25, 4  ;;  %v1656_v5 = vrot.slane %v4515_v27, 6  ;;  %v1657_v48 = vrot.slane %v4488_v25, 6  ;;  %v1622_v46 = vrot.slane %v4506_v50, 5 }
 0x267   :  { %v4865_v24 = vsel %vm672_vm5, %v1692_v9, %v1693_v36  ;;  %v4869_v23 = vsel %vm672_vm5, %v1691_v8, %v1692_v9  ;;  %v4881_v17 = vsel %vm561_vm6, %v1583_v30, %v1584_v41  ;;  %v1623_v9 = vrot.slane %v4553_v51, 5 }
 0x268   :  { %v4877_v15 = vsel %vm561_vm6, %v1584_v41, %v1585_v11  ;;  %v4885_v63 = vsel %vm635_vm7, %v1655_v6, %v1656_v5  ;;  %v4891_v8 = vsel %vm635_vm7, %v1656_v5, %v1657_v48  ;;  %v4896_v29 = vsel %vm598_vm4, %v1621_v52, %v1622_v46  ;;  %1934 = vmatmul.mubr.bf16.gmra.mrb[80].mxu0 %v1464_v49 }
 0x269   :  { %v1694_v41 = vrot.slane %v4506_v50, 7  ;;  %v1695_v6 = vrot.slane %v4553_v51, 7  ;;  %v1586_v12 = vrot.slane %v4506_v50, 4  ;;  %v4905_v32 = vsel %vm598_vm4, %v1622_v46, %v1623_v9  ;;  %2055 = vmatprep.mubr.bf16.mxu0 %v1639_v26 }
 0x26a   :  { %v1587_v5 = vrot.slane %v4553_v51, 4  ;;  %v1658_v58 = vrot.slane %v4506_v50, 6  ;;  %v1659_v52 = vrot.slane %v4553_v51, 6  ;;  %v1624_v26 = vrot.slane %v4573_v20, 5 }
 0x26b   :  { %v4917_v31 = vsel %vm672_vm5, %v1694_v41, %v1695_v6  ;;  %v4921_v46 = vsel %vm672_vm5, %v1693_v36, %v1694_v41  ;;  %v4925_v19 = vsel %vm561_vm6, %v1585_v11, %v1586_v12  ;;  %v1697_v11 = vrot.slane %v4548_v3, 7 }
 0x26c   :  { %v4934_v30 = vsel %vm561_vm6, %v1586_v12, %v1587_v5  ;;  %v4938_v44 = vsel %vm635_vm7, %v1658_v58, %v1659_v52  ;;  %v4942_v36 = vsel %vm635_vm7, %v1657_v48, %v1658_v58  ;;  %2015 = vmatmul.mubr.bf16.gmra.mrb[80].mxu1 %v1536_v62  ;;  %v1625_v12 = vrot.slane %v4548_v3, 5 }
 0x26d   :  { %2136 = vmatprep.mubr.bf16.mxu1 %v1711_v56  ;;  %v1696_v58 = vrot.slane %v4573_v20, 7  ;;  %v1588_v0 = vrot.slane %v4573_v20, 4  ;;  %v1589_v10 = vrot.slane %v4548_v3, 4  ;;  %v4966_v48 = vsel %vm598_vm4, %v1623_v9, %v1624_v26 }
 0x26e   :  { %v4962_v62 = vsel %vm598_vm4, %v1624_v26, %v1625_v12  ;;  %v1660_v41 = vrot.slane %v4573_v20, 6  ;;  %v1661_v39 = vrot.slane %v4548_v3, 6  ;;  %v1626_v9 = vrot.slane %v4563_v53, 5 }
 0x26f   :  { %v4974_v56 = vsel %vm672_vm5, %v1696_v58, %v1697_v11  ;;  %v4978_v61 = vsel %vm672_vm5, %v1695_v6, %v1696_v58  ;;  %v4982_v42 = vsel %vm561_vm6, %v1588_v0, %v1589_v10  ;;  %v4988_v26 = vsel %vm561_vm6, %v1587_v5, %v1588_v0  ;;  %v1440_v6 = vld [vmem:[#allocation4 + $0x228] sm:$0xff] }
 0x270   :  { %v4992_v1 = vsel %vm635_vm7, %v1660_v41, %v1661_v39  ;;  %v4996_v49 = vsel %vm635_vm7, %v1659_v52, %v1660_v41  ;;  %v1607_v58 = vpack.c.bf16 %v4982_v42, %v4988_v26  ;;  %v1698_v5 = vrot.slane %v4563_v53, 7  ;;  %2056 = vmatmul.mubr.bf16.vlgmr.msra.gmra.mrb[84].mxu0 %v1603_v37 }
 0x271   :  { %v1679_v16 = vpack.c.bf16 %v4992_v1, %v4996_v49  ;;  %v1590_v0 = vrot.slane %v4563_v53, 4  ;;  %v1662_v52 = vrot.slane %v4563_v53, 6  ;;  %v1723_v41 = vpack.c.bf16 %v4441_v33, %v4459_v47  ;;  %2063 = vmatprep.mubr.bf16.mxu0 %v1640_v4  ;;  %v2315_v49 = vld [vmem:[%s5239_s6 + $0x48] sm:$0xff]  ;;  %v2318_v1 = vld [vmem:[%s5239_s6 + $0x60] sm:$0xff] }
 0x272   :  { %v1724_v42 = vpack.c.bf16 %v4494_v22, %v4453_v28  ;;  %v5343_v26 = vunpack.c.l.s8.bf16 %v4434_v57  ;;  %v1627_v21 = vsel %vm598_vm4, %v1625_v12, %v1626_v9  ;;  %v5344_v13 = vrot.slane %v4447_v7, 5 }
 0x273   :  { %v1699_v33 = vsel %vm672_vm5, %v1697_v11, %v1698_v5  ;;  %v5345_v28 = vpack.c.bf16 %v4766_v35, %v4772_v60  ;;  %v5346_v47 = vunpack.c.h.s8.bf16 %v4434_v57  ;;  %v1445_v22 = vunpack.c.l.s8.bf16 %v1440_v6 }
 0x274   :  { %3259 = vmatpush3.bf16.msra.mxu0 %v5343_v26  ;;  %v1638_v37 = vsel %vm598_vm4, %v1626_v9, %v5344_v13  ;;  %v5347_v54 = vrot.slane %v4447_v7, 7  ;;  %v1591_v12 = vsel %vm561_vm6, %v1589_v10, %v1590_v0  ;;  %v5348_v11 = vpack.c.bf16 %v4804_v14, %v4794_v34 }
 0x275   :  { %2137 = vmatmul.mubr.bf16.vlgmr.msra.gmra.mrb[84].mxu1 %v5345_v28  ;;  %3260 = vmatprep.subr.bf16.mxu0 %v5346_v47  ;;  %v1644_v55 = vpack.c.bf16 %v1638_v37, %v1627_v21  ;;  %v5349_v35 = vrot.slane %v4447_v7, 4  ;;  %v1663_v26 = vsel %vm635_vm7, %v1661_v39, %v1662_v52  ;;  %v5350_v21 = vrot.slane %v4447_v7, 6 }
 0x276   :  { %v1710_v4 = vsel %vm672_vm5, %v1698_v5, %v5347_v54  ;;  %2144 = vmatprep.mubr.bf16.mxu1 %v5348_v11  ;;  %v1725_v34 = vpack.c.bf16 %v4488_v25, %v4515_v27  ;;  %v1726_v14 = vpack.c.bf16 %v4553_v51, %v4506_v50  ;;  %v5351_v37 = vmov %v5346_v47 }
 0x277   :  { %v1716_v9 = vpack.c.bf16 %v1710_v4, %v1699_v33  ;;  %v1602_v60 = vsel %vm561_vm6, %v1590_v0, %v5349_v35  ;;  %v1674_v5 = vsel %vm635_vm7, %v1662_v52, %v5350_v21  ;;  %v1727_v0 = vpack.c.bf16 %v4548_v3, %v4573_v20  ;;  %v1441_v52 = vld [vmem:[#allocation4 + $0x230] sm:$0xff]  ;;  %v1442_v3 = vld [vmem:[#allocation4 + $0x238] sm:$0xff] }
 0x278   :  { %v1608_v13 = vpack.c.bf16 %v1602_v60, %v1591_v12  ;;  %v1680_v10 = vpack.c.bf16 %v1674_v5, %v1663_v26  ;;  %3261 = vmatpush3.bf16.msra.mxu0 %v5351_v37  ;;  %v1728_v39 = vpack.c.bf16 %v4447_v7, %v4563_v53  ;;  %v1446_v2 = vunpack.c.h.s8.bf16 %v1440_v6 }
 0x279   :  { %3262 = vmatprep.subr.bf16.mxu0 %v1445_v22  ;;  %v5352_v33 = vpack.c.bf16 %v4815_v18, %v4819_v40  ;;  %v5353_v25 = vpack.c.bf16 %v4848_v45, %v4837_v38  ;;  %v5354_v57 = vpack.c.bf16 %v4829_v43, %v4833_v59  ;;  %v1447_v50 = vunpack.c.l.s8.bf16 %v1441_v52 }
 0x27a   :  { %v5355_v7 = vpack.c.bf16 %v4865_v24, %v4869_v23  ;;  %v1448_v27 = vunpack.c.h.s8.bf16 %v1441_v52  ;;  %v5356_v51 = vpack.c.bf16 %v4877_v15, %v4881_v17  ;;  %v5357_v53 = vpack.c.bf16 %v4905_v32, %v4896_v29  ;;  %v2309_v23 = vld [vmem:[%s5239_s6 + $0x18] sm:$0xff]  ;;  %v2310_v15 = vld [vmem:[%s5239_s6 + $0x20] sm:$0xff]  ;;  %v2311_v17 = vld [vmem:[%s5239_s6 + $0x28] sm:$0xff] }
 0x27b   :  { %2064 = vmatmul.mubr.bf16.gmra.mrb[88].mxu0 %v5352_v33  ;;  %v5358_v20 = vpack.c.bf16 %v4891_v8, %v4885_v63  ;;  %v1449_v59 = vunpack.c.l.s8.bf16 %v1442_v3  ;;  %v5359_v18 = vpack.c.bf16 %v4917_v31, %v4921_v46  ;;  %v1450_v40 = vunpack.c.h.s8.bf16 %v1442_v3  ;;  %v2312_v32 = vld [vmem:[%s5239_s6 + $0x30] sm:$0xff]  ;;  %v2313_v8 = vld [vmem:[%s5239_s6 + $0x38] sm:$0xff]  ;;  %v2314_v46 = vld [vmem:[%s5239_s6 + $0x40] sm:$0xff] }
 0x27c   :  { %2071 = vmatprep.mubr.bf16.mxu0 %v5353_v25  ;;  %3263 = vmatpush3.bf16.msra.mxu0 %v1445_v22  ;;  %v5360_v45 = vpack.c.bf16 %v4934_v30, %v4925_v19  ;;  %v5361_v43 = vpack.c.bf16 %v4962_v62, %v4966_v48  ;;  %v5362_v38 = vpack.c.bf16 %v4938_v44, %v4942_v36  ;;  %v2306_v19 = vld [vmem:[%s5239_s6] sm:$0xff]  ;;  %v2307_v44 = vld [vmem:[%s5239_s6 + $0x8] sm:$0xff]  ;;  %v2317_v62 = vld [vmem:[%s5239_s6 + $0x58] sm:$0xff] }
 0x27d   :  { %2145 = vmatmul.mubr.bf16.gmra.mrb[88].mxu1 %v5354_v57  ;;  %3264 = vmatprep.subr.bf16.mxu0 %v1446_v2  ;;  %v5363_v31 = vpack.c.bf16 %v4974_v56, %v4978_v61  ;;  %v3358_v24 = vpack.c.bf16 %v2307_v44, %v2306_v19  ;;  %v3366_v63 = vpack.c.bf16 %v2311_v17, %v2310_v15  ;;  %v2316_v61 = vld [vmem:[%s5239_s6 + $0x50] sm:$0xff]  ;;  %v2319_v56 = vld [vmem:[%s5239_s6 + $0x68] sm:$0xff] }
 0x27e   :  { %2152 = vmatprep.mubr.bf16.mxu1 %v5355_v7  ;;  %v3370_v30 = vpack.c.bf16 %v2313_v8, %v2312_v32  ;;  %v3374_v36 = vpack.c.bf16 %v2315_v49, %v2314_v46  ;;  %v3378_v48 = vpack.c.bf16 %v2317_v62, %v2316_v61  ;;  %v3382_v6 = vpack.c.bf16 %v2319_v56, %v2318_v1 }
 0x27f   :  { %3359 = vmatprep.subr.bf16.mxu1 %v3358_v24 }
 0x280   :  { %3265 = vmatpush3.bf16.msra.mxu0 %v1446_v2  ;;  %3361 = vmatpush3.bf16.msra.mxu1 %v3358_v24 }
 0x281   :  { %3266 = vmatprep.subr.bf16.mxu0 %v1447_v50 }
 0x283   :  { %2072 = vmatmul.mubr.bf16.gmra.mrb[92].mxu0 %v5356_v51 }
 0x284   :  { %2079 = vmatprep.mubr.bf16.mxu0 %v5357_v53  ;;  %3267 = vmatpush3.bf16.msra.mxu0 %v1447_v50 }
 0x285   :  { %2153 = vmatmul.mubr.bf16.gmra.mrb[92].mxu1 %v5358_v20  ;;  %3268 = vmatprep.subr.bf16.mxu0 %v1448_v27 }
 0x286   :  { %2160 = vmatprep.mubr.bf16.mxu1 %v5359_v18 }
 0x288   :  { %3269 = vmatpush3.bf16.msra.mxu0 %v1448_v27 }
 0x289   :  { %3270 = vmatprep.subr.bf16.mxu0 %v1449_v59 }
 0x28b   :  { %2080 = vmatmul.mubr.bf16.gmra.mrb[96].mxu0 %v5360_v45 }
 0x28c   :  { %2087 = vmatprep.mubr.bf16.mxu0 %v5361_v43  ;;  %3271 = vmatpush3.bf16.msra.mxu0 %v1449_v59 }
 0x28d   :  { %2161 = vmatmul.mubr.bf16.gmra.mrb[96].mxu1 %v5362_v38  ;;  %3272 = vmatprep.subr.bf16.mxu0 %v1450_v40 }
 0x28e   :  { %2168 = vmatprep.mubr.bf16.mxu1 %v5363_v31 }
 0x290   :  { %3273 = vmatpush3.bf16.msra.mxu0 %v1450_v40 }
 0x293   :  { %2088 = vmatmul.mubr.bf16.gmra.mrb[100].mxu0 %v1607_v58  ;;  %v2320_v58 = vld [vmem:[%s5239_s6 + $0x70] sm:$0xff] }
 0x294   :  { %2095 = vmatprep.mubr.bf16.mxu0 %v1644_v55 }
 0x295   :  { %2169 = vmatmul.mubr.bf16.gmra.mrb[100].mxu1 %v1679_v16  ;;  %v2308_v16 = vld [vmem:[%s5239_s6 + $0x10] sm:$0xff] }
 0x296   :  { %2176 = vmatprep.mubr.bf16.mxu1 %v1716_v9  ;;  %v3362_v29 = vpack.c.bf16 %v2309_v23, %v2308_v16 }
 0x298   :  { %3363 = vmatprep.subr.bf16.mxu1 %v3362_v29 }
 0x299   :  { %3365 = vmatpush3.bf16.msra.mxu1 %v3362_v29 }
 0x29a   :  { %3367 = vmatprep.subr.bf16.mxu1 %v3366_v63 }
 0x29b   :  { %2096 = vmatmul.mubr.bf16.gmra.mrb[104].mxu0 %v1608_v13 }
 0x29c   :  { %3274 = vmatprep.mubr.bf16.mxu0 %v1723_v41  ;;  %v2321_v41 = vld [vmem:[%s5239_s6 + $0x78] sm:$0xff] }
 0x29d   :  { %2177 = vmatmul.mubr.bf16.gmra.mrb[104].mxu1 %v1680_v10 }
 0x29e   :  { %3369 = vmatpush3.bf16.msra.mxu1 %v3366_v63 }
 0x29f   :  { %3371 = vmatprep.subr.bf16.mxu1 %v3370_v30 }
 0x2a2   :  { %3373 = vmatpush3.bf16.msra.mxu1 %v3370_v30 }
 0x2a3   :  { %3275 = vmatmul.mubr.bf16.vlgmr.msra.gmra.mrb[108].mxu0 %v1724_v42  ;;  %3375 = vmatprep.subr.bf16.mxu1 %v3374_v36  ;;  %v3386_v42 = vpack.c.bf16 %v2321_v41, %v2320_v58 }
 0x2a4   :  { %3278 = vmatprep.mubr.bf16.mxu0 %v1725_v34 }
 0x2a6   :  { %3377 = vmatpush3.bf16.msra.mxu1 %v3374_v36 }
 0x2a7   :  { %3379 = vmatprep.subr.bf16.mxu1 %v3378_v48 }
 0x2aa   :  { %3381 = vmatpush3.bf16.msra.mxu1 %v3378_v48 }
 0x2ab   :  { %3279 = vmatmul.mubr.bf16.gmra.mrb[112].mxu0 %v1726_v14  ;;  %3383 = vmatprep.subr.bf16.mxu1 %v3382_v6 }
 0x2ac   :  { %3282 = vmatprep.mubr.bf16.mxu0 %v1727_v0 }
 0x2ae   :  { %3385 = vmatpush3.bf16.msra.mxu1 %v3382_v6 }
 0x2af   :  { %3387 = vmatprep.subr.bf16.mxu1 %v3386_v42 }
 0x2b2   :  { %3389 = vmatpush3.bf16.msra.mxu1 %v3386_v42 }
 0x2b3   :  { %3283 = vmatmul.mubr.bf16.gmra.mrb[116].mxu0 %v1728_v39 }
 0x312   :  { %v2966_v28 = vpop.f32.mrb[60].mxu0 }
 0x313   :  { %v2967_v47 = vpop.f32.mrb[61].mxu0 }
 0x314   :  { %v3018_v22 = vpop.f32.mrb[60].mxu1  ;;  %v2968_v55 = vadd.f32 %v2967_v47, %v2966_v28  ;;  %v2969_v54 = vpop.f32.mrb[62].mxu0 }
 0x315   :  { %v3019_v4 = vpop.f32.mrb[61].mxu1  ;;  %v2970_v12 = vpop.f32.mrb[63].mxu0 }
 0x316   :  { %v3020_v11 = vadd.f32 %v3019_v4, %v3018_v22  ;;  %v3021_v9 = vpop.f32.mrb[62].mxu1  ;;  %v2971_v35 = vadd.f32 %v2970_v12, %v2969_v54 }
 0x317   :  { %v3022_v60 = vpop.f32.mrb[63].mxu1 }
 0x318   :  { %v5147_v26 = vadd.f32 %v3020_v11, %v2968_v55  ;;  %v3023_v21 = vadd.f32 %v3022_v60, %v3021_v9 }
 0x31a   :  { %v5149_v5 = vadd.f32 %v3023_v21, %v2971_v35  ;;  %v2972_v13 = vpop.f32.mrb[64].mxu0 }
 0x31b   :  { %v2973_v10 = vpop.f32.mrb[65].mxu0 }
 0x31c   :  { %v3024_v34 = vpop.f32.mrb[64].mxu1  ;;  %v2974_v14 = vadd.f32 %v2973_v10, %v2972_v13  ;;  %v2975_v37 = vpop.f32.mrb[66].mxu0 }
 0x31d   :  { %v3025_v0 = vpop.f32.mrb[65].mxu1  ;;  %v2976_v39 = vpop.f32.mrb[67].mxu0 }
 0x31e   :  { %v3026_v2 = vadd.f32 %v3025_v0, %v3024_v34  ;;  %v3027_v52 = vpop.f32.mrb[66].mxu1  ;;  %v2977_v33 = vadd.f32 %v2976_v39, %v2975_v37 }
 0x31f   :  { %v3028_v25 = vpop.f32.mrb[67].mxu1 }
 0x320   :  { %v5151_v57 = vadd.f32 %v3026_v2, %v2974_v14  ;;  %v3029_v50 = vadd.f32 %v3028_v25, %v3027_v52 }
 0x322   :  { %v5153_v7 = vadd.f32 %v3029_v50, %v2977_v33 }
 0x323   :  { %v2978_v27 = vpop.f32.mrb[68].mxu0 }
 0x324   :  { %v2979_v3 = vpop.f32.mrb[69].mxu0 }
 0x325   :  { %v3030_v51 = vpop.f32.mrb[68].mxu1  ;;  %v2980_v53 = vadd.f32 %v2979_v3, %v2978_v27  ;;  %v2981_v20 = vpop.f32.mrb[70].mxu0 }
 0x326   :  { %v3031_v59 = vpop.f32.mrb[69].mxu1  ;;  %v2982_v18 = vpop.f32.mrb[71].mxu0 }
 0x327   :  { %v3032_v40 = vadd.f32 %v3031_v59, %v3030_v51  ;;  %v3033_v45 = vpop.f32.mrb[70].mxu1  ;;  %v2983_v43 = vadd.f32 %v2982_v18, %v2981_v20 }
 0x328   :  { %v3034_v38 = vpop.f32.mrb[71].mxu1 }
 0x329   :  { %v5155_v31 = vadd.f32 %v3032_v40, %v2980_v53  ;;  %v3035_v19 = vadd.f32 %v3034_v38, %v3033_v45 }
 0x32b   :  { %v5157_v44 = vadd.f32 %v3035_v19, %v2983_v43  ;;  %v2984_v24 = vpop.f32.mrb[72].mxu0 }
 0x32c   :  { %v2985_v16 = vpop.f32.mrb[73].mxu0 }
 0x32d   :  { %v3036_v23 = vpop.f32.mrb[72].mxu1  ;;  %v2986_v29 = vadd.f32 %v2985_v16, %v2984_v24  ;;  %v2987_v15 = vpop.f32.mrb[74].mxu0 }
 0x32e   :  { %v3037_v17 = vpop.f32.mrb[73].mxu1  ;;  %v2988_v63 = vpop.f32.mrb[75].mxu0 }
 0x32f   :  { %v3038_v32 = vadd.f32 %v3037_v17, %v3036_v23  ;;  %v3039_v8 = vpop.f32.mrb[74].mxu1  ;;  %v2989_v30 = vadd.f32 %v2988_v63, %v2987_v15 }
 0x330   :  { %v3040_v46 = vpop.f32.mrb[75].mxu1 }
 0x331   :  { %v5159_v49 = vadd.f32 %v3038_v32, %v2986_v29  ;;  %v3041_v36 = vadd.f32 %v3040_v46, %v3039_v8 }
 0x333   :  { %v5161_v61 = vadd.f32 %v3041_v36, %v2989_v30  ;;  %v2990_v62 = vpop.f32.mrb[76].mxu0 }
 0x334   :  { %v2991_v48 = vpop.f32.mrb[77].mxu0 }
 0x335   :  { %v2992_v56 = vadd.f32 %v2991_v48, %v2990_v62  ;;  %v2993_v6 = vpop.f32.mrb[78].mxu0 }
 0x336   :  { %v2994_v41 = vpop.f32.mrb[79].mxu0 }
 0x337   :  { %v3042_v1 = vpop.f32.mrb[76].mxu1  ;;  %v2995_v47 = vadd.f32 %v2994_v41, %v2993_v6 }
 0x338   :  { %v3043_v58 = vpop.f32.mrb[77].mxu1 }
 0x339   :  { %v3044_v42 = vadd.f32 %v3043_v58, %v3042_v1  ;;  %v3045_v28 = vpop.f32.mrb[78].mxu1 }
 0x33a   :  { %v3046_v22 = vpop.f32.mrb[79].mxu1 }
 0x33b   :  { %v5163_v55 = vadd.f32 %v3044_v42, %v2992_v56  ;;  %v3047_v54 = vadd.f32 %v3046_v22, %v3045_v28  ;;  %v2996_v12 = vpop.f32.mrb[80].mxu0 }
 0x33c   :  { %v2997_v11 = vpop.f32.mrb[81].mxu0 }
 0x33d   :  { %v5165_v4 = vadd.f32 %v3047_v54, %v2995_v47  ;;  %v2998_v35 = vadd.f32 %v2997_v11, %v2996_v12  ;;  %v2999_v60 = vpop.f32.mrb[82].mxu0 }
 0x33e   :  { %v3000_v13 = vpop.f32.mrb[83].mxu0 }
 0x33f   :  { %v3048_v9 = vpop.f32.mrb[80].mxu1  ;;  %v3001_v14 = vadd.f32 %v3000_v13, %v2999_v60 }
 0x340   :  { %v3049_v21 = vpop.f32.mrb[81].mxu1 }
 0x341   :  { %v3050_v10 = vadd.f32 %v3049_v21, %v3048_v9  ;;  %v3051_v34 = vpop.f32.mrb[82].mxu1 }
 0x342   :  { %v3052_v37 = vpop.f32.mrb[83].mxu1 }
 0x343   :  { %v5167_v0 = vadd.f32 %v3050_v10, %v2998_v35  ;;  %v3053_v39 = vadd.f32 %v3052_v37, %v3051_v34  ;;  %v3070_v52 = vpop.f32.mrb[84].mxu0 }
 0x344   :  { %v3071_v33 = vpop.f32.mrb[85].mxu0 }
 0x345   :  { %v5169_v2 = vadd.f32 %v3053_v39, %v3001_v14  ;;  %v3072_v50 = vadd.f32 %v3071_v33, %v3070_v52  ;;  %v3073_v27 = vpop.f32.mrb[86].mxu0 }
 0x346   :  { %v3074_v51 = vpop.f32.mrb[87].mxu0 }
 0x347   :  { %v2058_v53 = vadd.f32 %v3072_v50, %v5147_v26  ;;  %v3075_v18 = vadd.f32 %v3074_v51, %v3073_v27 }
 0x348   :  { %v3122_v25 = vpop.f32.mrb[84].mxu1 }
 0x349   :  { %v3123_v3 = vpop.f32.mrb[85].mxu1  ;;  %v2061_v45 = vadd.f32 %v3075_v18, %v5149_v5 }
 0x34a   :  { %v3124_v20 = vadd.f32 %v3123_v3, %v3122_v25  ;;  %v3125_v59 = vpop.f32.mrb[86].mxu1 }
 0x34b   :  { %v3126_v40 = vpop.f32.mrb[87].mxu1 }
 0x34c   :  { %v3127_v43 = vadd.f32 %v3126_v40, %v3125_v59  ;;  %v5173_v38 = vadd.f32 %v3124_v20, %v2058_v53 }
 0x34e   :  { %v3076_v19 = vpop.f32.mrb[88].mxu0  ;;  %v5175_v24 = vadd.f32 %v3127_v43, %v2061_v45 }
 0x34f   :  { %v3077_v16 = vpop.f32.mrb[89].mxu0 }
 0x350   :  { %v3128_v23 = vpop.f32.mrb[88].mxu1  ;;  %v3078_v29 = vadd.f32 %v3077_v16, %v3076_v19  ;;  %v3079_v15 = vpop.f32.mrb[90].mxu0 }
 0x351   :  { %v3129_v17 = vpop.f32.mrb[89].mxu1  ;;  %v3080_v63 = vpop.f32.mrb[91].mxu0 }
 0x352   :  { %v2066_v26 = vadd.f32 %v3078_v29, %v5151_v57  ;;  %v3130_v32 = vadd.f32 %v3129_v17, %v3128_v23  ;;  %v3131_v8 = vpop.f32.mrb[90].mxu1  ;;  %v3081_v30 = vadd.f32 %v3080_v63, %v3079_v15 }
 0x353   :  { %v3132_v46 = vpop.f32.mrb[91].mxu1 }
 0x354   :  { %v2069_v5 = vadd.f32 %v3081_v30, %v5153_v7  ;;  %v3133_v36 = vadd.f32 %v3132_v46, %v3131_v8  ;;  %v5179_v62 = vadd.f32 %v3130_v32, %v2066_v26 }
 0x356   :  { %v3082_v48 = vpop.f32.mrb[92].mxu0  ;;  %v5181_v1 = vadd.f32 %v3133_v36, %v2069_v5 }
 0x357   :  { %v3083_v56 = vpop.f32.mrb[93].mxu0 }
 0x358   :  { %v3134_v6 = vpop.f32.mrb[92].mxu1  ;;  %v3084_v58 = vadd.f32 %v3083_v56, %v3082_v48  ;;  %v3085_v41 = vpop.f32.mrb[94].mxu0 }
 0x359   :  { %v3135_v42 = vpop.f32.mrb[93].mxu1  ;;  %v3086_v28 = vpop.f32.mrb[95].mxu0 }
 0x35a   :  { %v2074_v57 = vadd.f32 %v3084_v58, %v5155_v31  ;;  %v3136_v47 = vadd.f32 %v3135_v42, %v3134_v6  ;;  %v3137_v22 = vpop.f32.mrb[94].mxu1  ;;  %v3087_v54 = vadd.f32 %v3086_v28, %v3085_v41 }
 0x35b   :  { %v3138_v12 = vpop.f32.mrb[95].mxu1 }
 0x35c   :  { %v2077_v7 = vadd.f32 %v3087_v54, %v5157_v44  ;;  %v3139_v11 = vadd.f32 %v3138_v12, %v3137_v22  ;;  %v5185_v9 = vadd.f32 %v3136_v47, %v2074_v57  ;;  %v2708_v47 = vld [vmem:[%s5237_s4 + $0x1] ss:$0 sm:$0xff] }
 0x35e   :  { %v3088_v35 = vpop.f32.mrb[96].mxu0  ;;  %v5187_v60 = vadd.f32 %v3139_v11, %v2077_v7 }
 0x35f   :  { %v3089_v21 = vpop.f32.mrb[97].mxu0 }
 0x360   :  { %v3140_v13 = vpop.f32.mrb[96].mxu1  ;;  %v3090_v10 = vadd.f32 %v3089_v21, %v3088_v35  ;;  %v3091_v34 = vpop.f32.mrb[98].mxu0 }
 0x361   :  { %v3141_v14 = vpop.f32.mrb[97].mxu1  ;;  %v3092_v37 = vpop.f32.mrb[99].mxu0 }
 0x362   :  { %v2082_v31 = vadd.f32 %v3090_v10, %v5159_v49  ;;  %v3142_v39 = vadd.f32 %v3141_v14, %v3140_v13  ;;  %v3143_v52 = vpop.f32.mrb[98].mxu1  ;;  %v3093_v33 = vadd.f32 %v3092_v37, %v3091_v34 }
 0x363   :  { %v3144_v25 = vpop.f32.mrb[99].mxu1 }
 0x364   :  { %v2085_v44 = vadd.f32 %v3093_v33, %v5161_v61  ;;  %v3145_v50 = vadd.f32 %v3144_v25, %v3143_v52  ;;  %v2163_v27 = vadd.f32 %v3142_v39, %v2082_v31 }
 0x366   :  { %v3094_v3 = vpop.f32.mrb[100].mxu0  ;;  %v2166_v51 = vadd.f32 %v3145_v50, %v2085_v44 }
 0x367   :  { %v3095_v53 = vpop.f32.mrb[101].mxu0 }
 0x368   :  { %v3146_v20 = vpop.f32.mrb[100].mxu1  ;;  %v3096_v59 = vadd.f32 %v3095_v53, %v3094_v3  ;;  %v3097_v18 = vpop.f32.mrb[102].mxu0 }
 0x369   :  { %v3147_v40 = vpop.f32.mrb[101].mxu1  ;;  %v3098_v45 = vpop.f32.mrb[103].mxu0 }
 0x36a   :  { %v2090_v43 = vadd.f32 %v3096_v59, %v5163_v55  ;;  %v3148_v19 = vadd.f32 %v3147_v40, %v3146_v20  ;;  %v3149_v49 = vpop.f32.mrb[102].mxu1  ;;  %v3099_v16 = vadd.f32 %v3098_v45, %v3097_v18 }
 0x36b   :  { %v3150_v23 = vpop.f32.mrb[103].mxu1 }
 0x36c   :  { %v2093_v29 = vadd.f32 %v3099_v16, %v5165_v4  ;;  %v3151_v15 = vadd.f32 %v3150_v23, %v3149_v49  ;;  %v2171_v61 = vadd.f32 %v3148_v19, %v2090_v43 }
 0x36e   :  { %v3100_v17 = vpop.f32.mrb[104].mxu0  ;;  %v5193_v63 = vadd.f32 %v3151_v15, %v2093_v29 }
 0x36f   :  { %v3101_v26 = vpop.f32.mrb[105].mxu0 }
 0x370   :  { %v3152_v32 = vpop.f32.mrb[104].mxu1  ;;  %v3102_v8 = vadd.f32 %v3101_v26, %v3100_v17  ;;  %v3103_v30 = vpop.f32.mrb[106].mxu0 }
 0x371   :  { %v3153_v46 = vpop.f32.mrb[105].mxu1  ;;  %v3104_v5 = vpop.f32.mrb[107].mxu0 }
 0x372   :  { %v2098_v36 = vadd.f32 %v3102_v8, %v5167_v0  ;;  %v3154_v55 = vadd.f32 %v3153_v46, %v3152_v32  ;;  %v3155_v48 = vpop.f32.mrb[106].mxu1  ;;  %v3105_v56 = vadd.f32 %v3104_v5, %v3103_v30  ;;  %v2458_v8 = vld [vmem:[%s5241_s8] sm:$0xff]  ;;  %v2460_v30 = vld [vmem:[%s5241_s8 + $0x10] sm:$0xff]  ;;  %v3435_v46 = vmov 0.0|0.0  }
 0x373   :  { %v3156_v6 = vpop.f32.mrb[107].mxu1  ;;  %3390 = vmatprep.subr.bf16.mxu0 %v3435_v46 }
 0x374   :  { %v2101_v58 = vadd.f32 %v3105_v56, %v5169_v2  ;;  %v3157_v4 = vadd.f32 %v3156_v6, %v3155_v48  ;;  %v2179_v41 = vadd.f32 %v3154_v55, %v2098_v36  ;;  %v2710_v2 = vld [vmem:[%s5238_s5 + $0x1] ss:$0 sm:$0xff]  ;;  %v2461_v36 = vld [vmem:[%s5241_s8 + $0x18] sm:$0xff]  ;;  %v3437_v55 = vmov 0.0   ;;  %v2711_v56 = vld [vmem:[%s5240_s7] ss:$0 sm:$0xff] }
 0x375   :  { %3344 = vmatprep.mubr.msk.f32.mxu0 %vm3436_vm8, %v3437_v55  ;;  %v3394_v48 = vpack.c.bf16 %v2461_v36, %v2460_v30 }
 0x376   :  { %v3276_v42 = vpop.f32.mrb[108].mxu0  ;;  %v2182_v28 = vadd.f32 %v3157_v4, %v2101_v58 }
 0x377   :  { %v2228_v57 = vadd.f32 %v3276_v42, %v5179_v62  ;;  %v2219_v22 = vpop.f32.mrb[109].mxu0 }
 0x378   :  { %v2220_v54 = vadd.f32 %v2219_v22, %v5173_v38  ;;  %v3277_v0 = vpop.f32.mrb[110].mxu0 }
 0x379   :  { %v2231_v12 = vadd.f32 %v3277_v0, %v5181_v1  ;;  %v2222_v7 = vpop.f32.mrb[111].mxu0  ;;  %v2276_v21 = vmul.f32 %v2708_v47, %v2228_v57 }
 0x37a   :  { %v2274_v11 = vmul.f32 %v2708_v47, %v2220_v54  ;;  %v2223_v35 = vadd.f32 %v2222_v7, %v5175_v24 }
 0x37b   :  { %v2277_v10 = vmul.f32 %v2708_v47, %v2231_v12  ;;  %v2296_v31 = vadd.f32 %v2710_v2, %v2276_v21 }
 0x37c   :  { %v2275_v62 = vmul.f32 %v2708_v47, %v2223_v35  ;;  %v2294_v13 = vadd.f32 %v2710_v2, %v2274_v11 }
 0x37d   :  { %v2297_v44 = vadd.f32 %v2710_v2, %v2277_v10 }
 0x37e   :  { %v2295_v34 = vadd.f32 %v2710_v2, %v2275_v62  ;;  %v3280_v14 = vpop.f32.mrb[112].mxu0  ;;  %3318 = vmatprep.mubr.f32.mxu1 %v2294_v13 }
 0x37f   :  { %v2244_v37 = vadd.f32 %v3280_v14, %v2163_v27  ;;  %v2235_v38 = vpop.f32.mrb[113].mxu0 }
 0x380   :  { %v2236_v1 = vadd.f32 %v2235_v38, %v5185_v9  ;;  %v3281_v39 = vpop.f32.mrb[114].mxu0  ;;  %3319 = vmatmul.mubr.f32.vlgmr.msra.gmra.mrb[108].mxu1 %v2295_v34 }
 0x381   :  { %v2247_v52 = vadd.f32 %v3281_v39, %v2166_v51  ;;  %v2238_v33 = vpop.f32.mrb[115].mxu0  ;;  %3321 = vmatprep.mubr.f32.mxu1 %v2296_v31  ;;  %v2280_v50 = vmul.f32 %v2708_v47, %v2244_v37 }
 0x382   :  { %v2278_v25 = vmul.f32 %v2708_v47, %v2236_v1  ;;  %v2239_v24 = vadd.f32 %v2238_v33, %v5187_v60 }
 0x383   :  { %v2281_v20 = vmul.f32 %v2708_v47, %v2247_v52  ;;  %v2300_v9 = vadd.f32 %v2710_v2, %v2280_v50 }
 0x384   :  { %v2279_v3 = vmul.f32 %v2708_v47, %v2239_v24  ;;  %3322 = vmatmul.mubr.f32.gmra.mrb[110].mxu1 %v2297_v44  ;;  %v2298_v53 = vadd.f32 %v2710_v2, %v2278_v25 }
 0x385   :  { %v2301_v16 = vadd.f32 %v2710_v2, %v2281_v20 }
 0x386   :  { %v3284_v59 = vpop.f32.mrb[116].mxu0  ;;  %3324 = vmatprep.mubr.f32.mxu1 %v2298_v53  ;;  %v2299_v27 = vadd.f32 %v2710_v2, %v2279_v3  ;;  %v2714_v53 = vld [vmem:[%s5242_s9] ss:$0 sm:$0xff] }
 0x387   :  { %v2260_v18 = vadd.f32 %v3284_v59, %v2179_v41  ;;  %v2251_v40 = vpop.f32.mrb[117].mxu0 }
 0x388   :  { %v2252_v45 = vadd.f32 %v2251_v40, %v2171_v61  ;;  %v3285_v43 = vpop.f32.mrb[118].mxu0  ;;  %3325 = vmatmul.mubr.f32.gmra.mrb[112].mxu1 %v2299_v27 }
 0x389   :  { %v2263_v51 = vadd.f32 %v3285_v43, %v2182_v28  ;;  %v2254_v19 = vpop.f32.mrb[119].mxu0  ;;  %3327 = vmatprep.mubr.f32.mxu1 %v2300_v9  ;;  %v2284_v23 = vmul.f32 %v2708_v47, %v2260_v18 }
 0x38a   :  { %v2282_v49 = vmul.f32 %v2708_v47, %v2252_v45  ;;  %v2255_v60 = vadd.f32 %v2254_v19, %v5193_v63  ;;  %v2459_v63 = vld [vmem:[%s5241_s8 + $0x8] sm:$0xff] }
 0x38b   :  { %v2285_v17 = vmul.f32 %v2708_v47, %v2263_v51  ;;  %v2304_v32 = vadd.f32 %v2710_v2, %v2284_v23  ;;  %v3391_v5 = vpack.c.bf16 %v2459_v63, %v2458_v8 }
 0x38c   :  { %v2283_v29 = vmul.f32 %v2708_v47, %v2255_v60  ;;  %3328 = vmatmul.mubr.f32.gmra.mrb[114].mxu1 %v2301_v16  ;;  %v2302_v15 = vadd.f32 %v2710_v2, %v2282_v49 }
 0x38d   :  { %v2305_v61 = vadd.f32 %v2710_v2, %v2285_v17  ;;  %3392 = vmatpush3.bf16.msra.mxu0 %v3391_v5 }
 0x38e   :  { %3330 = vmatprep.mubr.f32.mxu1 %v2302_v15  ;;  %v2303_v26 = vadd.f32 %v2710_v2, %v2283_v29  ;;  %3393 = vmatprep.subr.bf16.mxu0 %v3435_v46 }
 0x390   :  { %3331 = vmatmul.mubr.f32.gmra.mrb[116].mxu1 %v2303_v26 }
 0x391   :  { %3333 = vmatprep.mubr.f32.mxu1 %v2304_v32  ;;  %3395 = vmatpush3.bf16.msra.mxu0 %v3394_v48 }
 0x392   :  { %3396 = vmatprep.subr.bf16.mxu0 %v3435_v46 }
 0x394   :  { %3334 = vmatmul.mubr.f32.gmra.mrb[118].mxu1 %v2305_v61 }
 0x453   :  { %v3320_v6 = vpop.f32.mrb[108].mxu1 }
 0x454   :  { %v2395_v58 = vpop.f32.mrb[109].mxu1  ;;  %v2401_v41 = vadd.f32 %v3320_v6, %v2711_v56 }
 0x455   :  { %v2396_v4 = vadd.f32 %v2711_v56, %v2395_v58 }
 0x456   :  { %v2451_v47 = vmax.f32 %v2401_v41, 0.0 }
 0x457   :  { %v3323_v42 = vpop.f32.mrb[110].mxu1  ;;  %v2450_v28 = vmax.f32 %v2396_v4, 0.0 }
 0x458   :  { %v2405_v57 = vpop.f32.mrb[111].mxu1  ;;  %v2411_v12 = vadd.f32 %v3323_v42, %v2711_v56 }
 0x459   :  { %2462 = vxpose.xlu0.b32.start [1/4] (short) (narrow) %v2450_v28, 8  ;;  %v2406_v22 = vadd.f32 %v2711_v56, %v2405_v57 }
 0x45a   :  { %v2453_v21 = vmax.f32 %v2411_v12, 0.0 }
 0x45b   :  { %v3326_v54 = vpop.f32.mrb[112].mxu1  ;;  %v2452_v7 = vmax.f32 %v2406_v22, 0.0 }
 0x45c   :  { %v2415_v0 = vpop.f32.mrb[113].mxu1 }
 0x45d   :  { %2463 = vxpose.xlu0.b32.cont [2/4] (short) (narrow) %v2451_v47, 8 }
 0x45f   :  { %v3329_v2 = vpop.f32.mrb[114].mxu1 }
 0x460   :  { %v2423_v11 = vpop.f32.mrb[115].mxu1  ;;  %v2429_v62 = vadd.f32 %v3329_v2, %v2711_v56 }
 0x461   :  { %2464 = vxpose.xlu0.b32.cont [3/4] (short) (narrow) %v2452_v7, 8  ;;  %v2424_v35 = vadd.f32 %v2711_v56, %v2423_v11 }
 0x462   :  { %v2455_v14 = vmax.f32 %v2429_v62, 0.0 }
 0x463   :  { %v3332_v13 = vpop.f32.mrb[116].mxu1  ;;  %v2454_v10 = vmax.f32 %v2424_v35, 0.0 }
 0x464   :  { %v2433_v34 = vpop.f32.mrb[117].mxu1  ;;  %v2439_v1 = vadd.f32 %v3332_v13, %v2711_v56 }
 0x465   :  { %2568 = vxpose.xlu1.b32.start [1/4] (short) (narrow) %v2454_v10, 8  ;;  %2465 = vxpose.xlu0.b32.end [4/4] (short) (narrow) %v2453_v21, 8  ;;  %v2434_v37 = vadd.f32 %v2711_v56, %v2433_v34 }
 0x466   :  { %v2457_v52 = vmax.f32 %v2439_v1, 0.0 }
 0x467   :  { %v3335_v38 = vpop.f32.mrb[118].mxu1  ;;  %v2456_v39 = vmax.f32 %v2434_v37, 0.0 }
 0x468   :  { %v2443_v31 = vpop.f32.mrb[119].mxu1 }
 0x469   :  { %2569 = vxpose.xlu1.b32.cont [2/4] (short) (narrow) %v2455_v14, 8 }
 0x46d   :  { %2570 = vxpose.xlu1.b32.cont [3/4] (short) (narrow) %v2456_v39, 8 }
 0x471   :  { %2571 = vxpose.xlu1.b32.end [4/4] (short) (narrow) %v2457_v52, 8 }
 0x4d9   :  { %v2478_v33 = vpop.trf.xlu0 }
 0x4da   :  { %3345 = vmatmul.mubr.msk.f32.vlgmr.msra.gmra.mrb[120].mxu0 %vm2494_vm9, %v2478_v33 }
 0x4db   :  { %3398 = vmatpush3.bf16.msra.mxu0 %v3391_v5  ;;  %3355 = vmatprep.mubr.msk.f32.mxu0 %vm3436_vm8, %v3437_v55 }
 0x4dc   :  { %3399 = vmatprep.subr.bf16.mxu0 %v3435_v46 }
 0x4df   :  { %3401 = vmatpush3.bf16.msra.mxu0 %v3394_v48 }
 0x4e5   :  { %v2584_v25 = vpop.trf.xlu1 }
 0x4e6   :  { %3356 = vmatmul.mubr.msk.f32.vlgmr.msra.gmra.mrb[122].mxu0 %vm2494_vm9, %v2584_v25 }
 0x5ad   :  { %v2564_v24 = vpop.f32.mrb[120].mxu0 }
 0x5ae   :  { %v3346_v44 = vpop.f32.mrb[121].mxu0 }
 0x5b9   :  { %v2669_v50 = vpop.f32.mrb[122].mxu0 }
 0x5ba   :  { %v2674_v3 = vrot.slane %v2669_v50, 4  ;;  %v3357_v20 = vpop.f32.mrb[123].mxu0 }
 0x5bc   :  { %v2677_v59 = vsel %vm2676_vm10, %v2564_v24, %v2674_v3 }
 0x5bd   :  { %v2685_v27 = vadd.f32 %v2714_v53, %v2677_v59 }
 0x5bf   :  { %2686 = vst [vmem:[%s5243_s10] sm:$0xff] %v2685_v27 }
 0x5c0   :  { %2691 = vsyncpa [#allocation5], 1 }

</bundles_post_ra>
